<compile_context>
chip_gen: v7x
topology: tpu7x:2x2x1
jax: 0.10.0
libtpu: 0.0.40
codegen_flags: <defaults>
</compile_context>

<pallas_src>
import functools

import jax
import jax.numpy as jnp
from jax import lax
from jax.experimental import pallas as pl
from jax.experimental.pallas import tpu as pltpu

EPS = 1e-5
LANE = 128


def _round_up(v, m):
    return (v + m - 1) // m * m


def _row_tiling(m, target=512):
    """Pick TM (multiple of 16, <= target) and padded row count Mp.

    Prefers an exact divisor of m (no padding); otherwise chooses the tile
    that minimizes zero-row padding (review: never fall back to one giant
    block)."""
    t = max(16, min(target, _round_up(m, 16)))
    t -= t % 16
    best = None
    d = t
    while d >= 16:
        mp = _round_up(m, d)
        if mp == m:
            return d, mp
        if best is None or mp < best[1]:
            best = (d, mp)
        d -= 16
    return best


def _pick_spatial_tile(H, W, max_rows=512):
    """Largest TH dividing H with TH*W <= max_rows and 8-row aligned tiles,
    preferring >=2 tiles per image so the pipeline has grid steps."""
    cands = [th for th in range(1, H + 1)
             if H % th == 0 and th * W <= max_rows and (th * W) % 8 == 0]
    sub = [th for th in cands if th < H]
    if sub:
        return max(sub)
    if cands:
        return max(cands)
    # TODO(synk): HW not 8-row alignable (e.g. 14x14 / 7x7 stages) falls back
    #             to whole-image tiles; those shapes need HW row padding.
    return H


def _vmem_limit(block_bytes):
    """Scoped-VMEM budget derived from the actual block sizes (double
    buffering + slack), capped below v7x's 64 MiB physical VMEM."""
    need = 4 * int(sum(block_bytes)) + (8 << 20)
    return int(min(max(need, 32 << 20), 56 << 20))


def _pad_to(a, shape):
    return jnp.pad(a, [(0, s - d) for d, s in zip(a.shape, shape)])


def _pad1(a, n):
    a = a.reshape(-1)
    return jnp.pad(a, (0, n - a.shape[0]))


# ---------------------------------------------------------------------------
# Kernels
# ---------------------------------------------------------------------------
def _conv1x1_stats_kernel(x_ref, w_ref, y_ref, sum_ref, sq_ref):
    """y = x @ w (bf16 operands, f32 accum), store bf16, f32 partial stats."""
    y = jnp.dot(x_ref[...], w_ref[...], preferred_element_type=jnp.float32)
    y_ref[...] = y.astype(y_ref.dtype)
    sum_ref[...] = jnp.sum(y, axis=0, keepdims=True)[None]
    sq_ref[...] = jnp.sum(y * y, axis=0, keepdims=True)[None]


def _bn_relu_conv1x1_stats_kernel(y_ref, s_ref, t_ref, w_ref,
                                  y_out_ref, sum_ref, sq_ref, *, tm, m_valid):
    """h = relu(y*s + t) (pad rows masked); y_out = h @ w; partial stats."""
    h = jnp.maximum(y_ref[...].astype(jnp.float32) * s_ref[...] + t_ref[...],
                    0.0)
    if m_valid is not None:
        row = (pl.program_id(0) * tm
               + lax.broadcasted_iota(jnp.int32, (tm, 1), 0))
        h = jnp.where(row < m_valid, h, 0.0)
    y = jnp.dot(h.astype(jnp.bfloat16), w_ref[...],
                preferred_element_type=jnp.float32)
    y_out_ref[...] = y.astype(y_out_ref.dtype)
    sum_ref[...] = jnp.sum(y, axis=0, keepdims=True)[None]
    sq_ref[...] = jnp.sum(y * y, axis=0, keepdims=True)[None]


def _bn_relu_conv3x3_stats_kernel(y1_ref, s_ref, t_ref, w_ref,
                                  y2_ref, sum_ref, sq_ref, h1_sc,
                                  *, H, W, TH):
    """Spatially-tiled 3x3 conv on one image.

    At the first spatial tile (s==0) the whole-image h1 = relu(y1*s+t) is
    written into a row-padded VMEM scratch (W zero rows above and below).
    Each spatial tile then accumulates nine (L,Pp)@(Pp,Pp) MXU matmuls:
    dy handled by an aligned dynamic slice of the scratch, dx by an XLU roll
    plus a column border mask (no (HW, 9*Pp) patches buffer)."""
    HW = H * W
    L = TH * W
    PADW = W
    sblk = pl.program_id(1)

    @pl.when(sblk == 0)
    def _():
        h1 = jnp.maximum(
            y1_ref[...].astype(jnp.float32) * s_ref[...] + t_ref[...], 0.0)
        zeros = jnp.zeros((PADW, h1.shape[-1]), h1_sc.dtype)
        h1_sc[:PADW, :] = zeros
        h1_sc[PADW + HW:, :] = zeros
        h1_sc[PADW:PADW + HW, :] = h1

    Pp = y2_ref.shape[-1]
    col = lax.broadcasted_iota(jnp.int32, (L, 1), 0) % W
    r0 = sblk * L
    acc = jnp.zeros((L, Pp), jnp.float32)
    tap_i = 0
    for dy in (-1, 0, 1):
        start = PADW + r0 + dy * W
        if W % 8 == 0:
            start = pl.multiple_of(start, 8)
        for dx in (-1, 0, 1):
            tap = h1_sc[pl.ds(start, L), :]
            if dx != 0:
                tap = pltpu.roll(tap, shift=(-dx) % L, axis=0)
                valid = (col + dx >= 0) & (col + dx < W)
                tap = jnp.where(valid, tap, 0.0)
            acc = acc + jnp.dot(tap.astype(jnp.bfloat16), w_ref[tap_i],
                                preferred_element_type=jnp.float32)
            tap_i += 1
    y2_ref[...] = acc.astype(y2_ref.dtype)
    sum_ref[...] = jnp.sum(acc, axis=0, keepdims=True)[None]
    sq_ref[...] = jnp.sum(acc * acc, axis=0, keepdims=True)[None]


def _bn_residual_relu_kernel(y_ref, res_ref, s_ref, t_ref, out_ref):
    out_ref[...] = jnp.maximum(
        y_ref[...].astype(jnp.float32) * s_ref[...] + t_ref[...]
        + res_ref[...].astype(jnp.float32), 0.0).astype(out_ref.dtype)


# ---------------------------------------------------------------------------
# Wrapper
# ---------------------------------------------------------------------------
def _fold_bn(sum_parts, sq_parts, gamma, beta, count):
    """Fold batch statistics + BN affine into one fused scale/shift."""
    total = jnp.sum(sum_parts[:, 0, :], axis=0)
    total_sq = jnp.sum(sq_parts[:, 0, :], axis=0)
    mean = total / count
    var = jnp.maximum(total_sq / count - mean * mean, 0.0)   # clamp: no NaN
    scale = gamma * lax.rsqrt(var + EPS)
    shift = beta - mean * scale
    return scale.reshape(1, -1), shift.reshape(1, -1)


def bottleneck_forward(x_nchw, params):
    """x_nchw: (N, C, H, W) like PyTorch.  Returns (N, C, H, W)."""
    w1, w2, w3, g1, b1, g2, b2, g3, b3 = params
    N, Cin, H, W = x_nchw.shape
    P = w1.shape[1]
    Cout = w3.shape[1]
    assert Cin == Cout, "identity residual requires inplanes == planes * 4"
    # TODO(synk): stride>1 / non-None downsample branch not implemented.

    Cp = _round_up(Cin, LANE)
    Pp = _round_up(P, LANE)
    HW = H * W
    M = N * HW
    TM, Mp = _row_tiling(M, target=512)      # 512-row target fits all gens
    G = Mp // TM
    TH = _pick_spatial_tile(H, W)
    n_sp = H // TH
    L = TH * W
    bf = jnp.bfloat16
    f32 = jnp.float32
    out_dtype = x_nchw.dtype

    # Single bf16 copy of x: matmul operand for phase A AND residual stream
    # for phase D (halves both DMA streams vs an f32 copy).
    x_nhwc = jnp.transpose(x_nchw, (0, 2, 3, 1)).astype(bf)
    x2d = _pad_to(x_nhwc, (N, H, W, Cp)).reshape(M, Cp)
    if Mp > M:
        x2d = jnp.pad(x2d, ((0, Mp - M), (0, 0)))

    w1p = _pad_to(w1.astype(f32), (Cp, Pp)).astype(bf)
    w2p = _pad_to(w2.astype(f32), (9, Pp, Pp)).astype(bf)
    w3p = _pad_to(w3.astype(f32), (Pp, Cp)).astype(bf)
    g1p, b1p = _pad1(g1, Pp), _pad1(b1, Pp)
    g2p, b2p = _pad1(g2, Pp), _pad1(b2, Pp)
    g3p, b3p = _pad1(g3, Cp), _pad1(b3, Cp)

    # ---- phase A: conv1 (1x1) + BN1 partial stats -------------------------
    vA = _vmem_limit([TM * Cp * 2, Cp * Pp * 2, TM * Pp * 2, 2 * Pp * 4])
    y1, st1_s, st1_q = pl.pallas_call(
        _conv1x1_stats_kernel,
        out_shape=(jax.ShapeDtypeStruct((Mp, Pp), bf),
                   jax.ShapeDtypeStruct((G, 1, Pp), f32),
                   jax.ShapeDtypeStruct((G, 1, Pp), f32)),
        grid=(G,),
        in_specs=[pl.BlockSpec((TM, Cp), lambda i: (i, 0)),
                  pl.BlockSpec((Cp, Pp), lambda i: (0, 0))],
        out_specs=(pl.BlockSpec((TM, Pp), lambda i: (i, 0)),
                   pl.BlockSpec((1, 1, Pp), lambda i: (i, 0, 0)),
                   pl.BlockSpec((1, 1, Pp), lambda i: (i, 0, 0))),
        compiler_params=pltpu.CompilerParams(
            dimension_semantics=("parallel",), vmem_limit_bytes=vA),
    )(x2d, w1p)
    s1, t1 = _fold_bn(st1_s, st1_q, g1p, b1p, M)

    # ---- phase B: BN1+ReLU -> conv2 (3x3) + BN2 partial stats -------------
    kernelB = functools.partial(_bn_relu_conv3x3_stats_kernel, H=H, W=W, TH=TH)
    vB = _vmem_limit([HW * Pp * 2, 2 * Pp * 4, 9 * Pp * Pp * 2, L * Pp * 2,
                      2 * Pp * 4, (HW + 2 * W) * Pp * 4, HW * Pp * 4])
    y2, st2_s, st2_q = pl.pallas_call(
        kernelB,
        out_shape=(jax.ShapeDtypeStruct((M, Pp), bf),
                   jax.ShapeDtypeStruct((N * n_sp, 1, Pp), f32),
                   jax.ShapeDtypeStruct((N * n_sp, 1, Pp), f32)),
        grid=(N, n_sp),
        in_specs=[pl.BlockSpec((HW, Pp), lambda b, s: (b, 0)),
                  pl.BlockSpec((1, Pp), lambda b, s: (0, 0)),
                  pl.BlockSpec((1, Pp), lambda b, s: (0, 0)),
                  pl.BlockSpec((9, Pp, Pp), lambda b, s: (0, 0, 0))],
        out_specs=(pl.BlockSpec((L, Pp), lambda b, s: (b * n_sp + s, 0)),
                   pl.BlockSpec((1, 1, Pp), lambda b, s: (b * n_sp + s, 0, 0)),
                   pl.BlockSpec((1, 1, Pp), lambda b, s: (b * n_sp + s, 0, 0))),
        scratch_shapes=[pltpu.VMEM((HW + 2 * W, Pp), f32)],
        compiler_params=pltpu.CompilerParams(
            dimension_semantics=("parallel", "arbitrary"),
            vmem_limit_bytes=vB),
    )(y1, s1, t1, w2p)
    s2, t2 = _fold_bn(st2_s, st2_q, g2p, b2p, M)

    # ---- phase C: BN2+ReLU -> conv3 (1x1) + BN3 partial stats -------------
    m_valid = M if Mp > M else None
    y2p = jnp.pad(y2, ((0, Mp - M), (0, 0))) if Mp > M else y2
    kernelC = functools.partial(_bn_relu_conv1x1_stats_kernel,
                                tm=TM, m_valid=m_valid)
    vC = _vmem_limit([TM * Pp * 2, 2 * Pp * 4, Pp * Cp * 2, TM * Cp * 2,
                      2 * Cp * 4])
    y3, st3_s, st3_q = pl.pallas_call(
        kernelC,
        out_shape=(jax.ShapeDtypeStruct((Mp, Cp), bf),
                   jax.ShapeDtypeStruct((G, 1, Cp), f32),
                   jax.ShapeDtypeStruct((G, 1, Cp), f32)),
        grid=(G,),
        in_specs=[pl.BlockSpec((TM, Pp), lambda i: (i, 0)),
                  pl.BlockSpec((1, Pp), lambda i: (0, 0)),
                  pl.BlockSpec((1, Pp), lambda i: (0, 0)),
                  pl.BlockSpec((Pp, Cp), lambda i: (0, 0))],
        out_specs=(pl.BlockSpec((TM, Cp), lambda i: (i, 0)),
                   pl.BlockSpec((1, 1, Cp), lambda i: (i, 0, 0)),
                   pl.BlockSpec((1, 1, Cp), lambda i: (i, 0, 0))),
        compiler_params=pltpu.CompilerParams(
            dimension_semantics=("parallel",), vmem_limit_bytes=vC),
    )(y2p, s2, t2, w3p)
    s3, t3 = _fold_bn(st3_s, st3_q, g3p, b3p, M)

    # ---- phase D: BN3 + identity residual + ReLU (lane-dense output) ------
    vD = _vmem_limit([TM * Cp * 2, TM * Cp * 2, 2 * Cp * 4,
                      TM * Cp * jnp.dtype(out_dtype).itemsize])
    outp = pl.pallas_call(
        _bn_residual_relu_kernel,
        out_shape=jax.ShapeDtypeStruct((Mp, Cp), out_dtype),
        grid=(G,),
        in_specs=[pl.BlockSpec((TM, Cp), lambda i: (i, 0)),
                  pl.BlockSpec((TM, Cp), lambda i: (i, 0)),
                  pl.BlockSpec((1, Cp), lambda i: (0, 0)),
                  pl.BlockSpec((1, Cp), lambda i: (0, 0))],
        out_specs=pl.BlockSpec((TM, Cp), lambda i: (i, 0)),
        compiler_params=pltpu.CompilerParams(
            dimension_semantics=("parallel",), vmem_limit_bytes=vD),
    )(y3, x2d, s3, t3)

    out = outp[:M].reshape(N, H, W, Cp)[:, :, :, :Cout]
    return jnp.transpose(out, (0, 3, 1, 2))


# ---------------------------------------------------------------------------
# Pure-JAX reference mirroring the kernel numerics:
#   bf16 matmul operands + bf16 inter-phase activations, f32 BN statistics.
# ---------------------------------------------------------------------------
def bottleneck_reference(x_nchw, params):
    w1, w2, w3, g1, b1, g2, b2, g3, b3 = params
    x = jnp.transpose(x_nchw, (0, 2, 3, 1)).astype(jnp.float32)
    N, H, W, Cin = x.shape
    P = w1.shape[1]
    bf = jnp.bfloat16
    f32 = jnp.float32

    def fold(y, g, b):
        mean = jnp.mean(y, axis=(0, 1, 2))
        var = jnp.maximum(jnp.mean(y * y, axis=(0, 1, 2)) - mean * mean, 0.0)
        s = g * lax.rsqrt(var + EPS)
        return s, b - mean * s

    xb = x.astype(bf)
    y1 = jnp.einsum('nhwc,cp->nhwp', xb, w1.astype(bf),
                    preferred_element_type=f32)
    s1, t1 = fold(y1, g1, b1)
    h1 = jnp.maximum(y1.astype(bf).astype(f32) * s1 + t1, 0.0)
    hp = jnp.pad(h1, ((0, 0), (1, 1), (1, 1), (0, 0)))
    taps = [hp[:, dy:dy + H, dx:dx + W, :]
            for dy in range(3) for dx in range(3)]
    patches = jnp.concatenate(taps, axis=-1).astype(bf)
    y2 = jnp.einsum('nhwk,kp->nhwp', patches,
                    w2.reshape(9 * P, P).astype(bf),
                    preferred_element_type=f32)
    s2, t2 = fold(y2, g2, b2)
    h2 = jnp.maximum(y2.astype(bf).astype(f32) * s2 + t2, 0.0)
    y3 = jnp.einsum('nhwp,pc->nhwc', h2.astype(bf), w3.astype(bf),
                    preferred_element_type=f32)
    s3, t3 = fold(y3, g3, b3)
    out = jnp.maximum(y3.astype(bf).astype(f32) * s3 + t3 + xb.astype(f32),
                      0.0)
    return jnp.transpose(out, (0, 3, 1, 2)).astype(x_nchw.dtype)


if __name__ == "__main__":
    # Bottleneck(inplanes=16, planes=4): conv1 16->4, conv2 4->4 (3x3), conv3 4->16
    N, planes, H, W = 2, 4, 16, 16
    inplanes = planes * 4  # expansion = 4

    key = jax.random.PRNGKey(0)
    ks = jax.random.split(key, 10)

    w1 = jax.random.normal(ks[0], (inplanes, planes), jnp.float32) * 0.1   # (Cin, P)
    w2 = jax.random.normal(ks[1], (9, planes, planes), jnp.float32) * 0.1  # (tap, Ci, Co)
    w3 = jax.random.normal(ks[2], (planes, inplanes), jnp.float32) * 0.1   # (P, Cout)
    g1 = jax.random.uniform(ks[3], (planes,), jnp.float32, 0.5, 1.5)
    b1 = jax.random.normal(ks[4], (planes,), jnp.float32) * 0.1
    g2 = jax.random.uniform(ks[5], (planes,), jnp.float32, 0.5, 1.5)
    b2 = jax.random.normal(ks[6], (planes,), jnp.float32) * 0.1
    g3 = jax.random.uniform(ks[7], (inplanes,), jnp.float32, 0.5, 1.5)
    b3 = jax.random.normal(ks[8], (inplanes,), jnp.float32) * 0.1
    params = (w1, w2, w3, g1, b1, g2, b2, g3, b3)

    x = jax.random.normal(ks[9], (N, inplanes, H, W), jnp.float32)  # NCHW

    fwd = jax.jit(bottleneck_forward)
    out = jax.block_until_ready(fwd(x, params))
    ref = jax.block_until_ready(bottleneck_reference(x, params))

    assert out.shape == (N, inplanes, H, W)
    err = float(jnp.max(jnp.abs(out - ref)))
    # bf16 matmuls + bf16 inter-phase activations, amplified through the BN
    # 1/sqrt(var) scales, put the expected mismatch in the few-1e-3 range.
    assert err < 3e-2, f"max abs err {err}"
    print("KERNEL_OK")
</pallas_src>

<mosaic_0001>
module attributes {stable_mosaic.version = 11 : i64} {
  func.func @_conv1x1_stats_kernel(%arg0: i32, %arg1: memref<512x128xbf16, #tpu.memory_space<vmem>>, %arg2: memref<128x128xbf16, #tpu.memory_space<vmem>>, %arg3: memref<512x128xbf16, #tpu.memory_space<vmem>>, %arg4: memref<1x1x128xf32, #tpu.memory_space<vmem>>, %arg5: memref<1x1x128xf32, #tpu.memory_space<vmem>>) attributes {dimension_semantics = [#tpu.dimension_semantics<parallel>], iteration_bounds = array<i64: 1>, scalar_prefetch = 0 : i64, scratch_operands = 0 : i64, tpu.core_type = #tpu.core_type<tc>, window_params = [{transform_indices = @transform_0, window_bounds = array<i64: 512, 128>}, {pipeline_mode = #tpu.pipeline_mode<synchronous>, transform_indices = @transform_1, window_bounds = array<i64: 128, 128>}, {transform_indices = @transform_2, window_bounds = array<i64: 512, 128>}, {transform_indices = @transform_3, window_bounds = array<i64: 1, 1, 128>}, {transform_indices = @transform_4, window_bounds = array<i64: 1, 1, 128>}]} {
    %c0 = arith.constant 0 : index
    %c0_0 = arith.constant 0 : index
    %0 = vector.load %arg1[%c0, %c0_0] : memref<512x128xbf16, #tpu.memory_space<vmem>>, vector<512x128xbf16>
    %c0_1 = arith.constant 0 : index
    %c0_2 = arith.constant 0 : index
    %1 = vector.load %arg2[%c0_1, %c0_2] : memref<128x128xbf16, #tpu.memory_space<vmem>>, vector<128x128xbf16>
    %cst = arith.constant dense<0.000000e+00> : vector<512x128xf32>
    %2 = tpu.matmul %0, %1, %cst {dimension_numbers = #tpu.dot_dimension_numbers<[1], [0], [0], [1], [0, 0, 1, 1], [], []>} : vector<512x128xbf16>, vector<128x128xbf16>, vector<512x128xf32> -> vector<512x128xf32>
    %3 = arith.truncf %2 : vector<512x128xf32> to vector<512x128xbf16>
    %c0_3 = arith.constant 0 : index
    %c0_4 = arith.constant 0 : index
    %4 = vector.load %arg3[%c0_3, %c0_4] : memref<512x128xbf16, #tpu.memory_space<vmem>>, vector<512x128xbf16>
    tpu.vector_store %arg3[%c0_3, %c0_4], %3 {strides = array<i32>} : memref<512x128xbf16, #tpu.memory_space<vmem>>, vector<512x128xbf16>,
    %cst_5 = arith.constant dense<0.000000e+00> : vector<128xf32>
    %5 = vector.multi_reduction <add>, %2, %cst_5 [0] : vector<512x128xf32> to vector<128xf32>
    %6 = vector.shape_cast %5 : vector<128xf32> to vector<1x128xf32>
    %7 = vector.shape_cast %6 : vector<1x128xf32> to vector<1x1x128xf32>
    %c0_6 = arith.constant 0 : index
    %c0_7 = arith.constant 0 : index
    %c0_8 = arith.constant 0 : index
    %8 = vector.load %arg4[%c0_6, %c0_7, %c0_8] : memref<1x1x128xf32, #tpu.memory_space<vmem>>, vector<1x1x128xf32>
    tpu.vector_store %arg4[%c0_6, %c0_7, %c0_8], %7 {strides = array<i32>} : memref<1x1x128xf32, #tpu.memory_space<vmem>>, vector<1x1x128xf32>,
    %9 = arith.mulf %2, %2 : vector<512x128xf32>
    %cst_9 = arith.constant dense<0.000000e+00> : vector<128xf32>
    %10 = vector.multi_reduction <add>, %9, %cst_9 [0] : vector<512x128xf32> to vector<128xf32>
    %11 = vector.shape_cast %10 : vector<128xf32> to vector<1x128xf32>
    %12 = vector.shape_cast %11 : vector<1x128xf32> to vector<1x1x128xf32>
    %c0_10 = arith.constant 0 : index
    %c0_11 = arith.constant 0 : index
    %c0_12 = arith.constant 0 : index
    %13 = vector.load %arg5[%c0_10, %c0_11, %c0_12] : memref<1x1x128xf32, #tpu.memory_space<vmem>>, vector<1x1x128xf32>
    tpu.vector_store %arg5[%c0_10, %c0_11, %c0_12], %12 {strides = array<i32>} : memref<1x1x128xf32, #tpu.memory_space<vmem>>, vector<1x1x128xf32>,
    return
  }
  func.func @transform_0(%arg0: i32) -> (i32, i32) {
    %c0_i32 = arith.constant 0 : i32
    %c0_i32_0 = arith.constant 0 : i32
    return %arg0, %c0_i32 : i32, i32
  }
  func.func @transform_1(%arg0: i32) -> (i32, i32) {
    %c0_i32 = arith.constant 0 : i32
    %c0_i32_0 = arith.constant 0 : i32
    %c0_i32_1 = arith.constant 0 : i32
    return %c0_i32, %c0_i32_0 : i32, i32
  }
  func.func @transform_2(%arg0: i32) -> (i32, i32) {
    %c0_i32 = arith.constant 0 : i32
    %c0_i32_0 = arith.constant 0 : i32
    return %arg0, %c0_i32 : i32, i32
  }
  func.func @transform_3(%arg0: i32) -> (i32, i32, i32) {
    %c0_i32 = arith.constant 0 : i32
    %c0_i32_0 = arith.constant 0 : i32
    %c0_i32_1 = arith.constant 0 : i32
    return %arg0, %c0_i32, %c0_i32_0 : i32, i32, i32
  }
  func.func @transform_4(%arg0: i32) -> (i32, i32, i32) {
    %c0_i32 = arith.constant 0 : i32
    %c0_i32_0 = arith.constant 0 : i32
    %c0_i32_1 = arith.constant 0 : i32
    return %arg0, %c0_i32, %c0_i32_0 : i32, i32, i32
  }
}

module attributes {stable_mosaic.version = 11 : i64} {
  func.func @_bn_relu_conv3x3_stats_kernel(%arg0: i32, %arg1: i32, %arg2: memref<256x128xbf16, #tpu.memory_space<vmem>>, %arg3: memref<1x128xf32, #tpu.memory_space<vmem>>, %arg4: memref<1x128xf32, #tpu.memory_space<vmem>>, %arg5: memref<9x128x128xbf16, #tpu.memory_space<vmem>>, %arg6: memref<128x128xbf16, #tpu.memory_space<vmem>>, %arg7: memref<1x1x128xf32, #tpu.memory_space<vmem>>, %arg8: memref<1x1x128xf32, #tpu.memory_space<vmem>>, %arg9: memref<288x128xf32, #tpu.memory_space<vmem>>) attributes {dimension_semantics = [#tpu.dimension_semantics<parallel>, #tpu.dimension_semantics<arbitrary>], iteration_bounds = array<i64: 2, 2>, scalar_prefetch = 0 : i64, scratch_operands = 1 : i64, tpu.core_type = #tpu.core_type<tc>, window_params = [{transform_indices = @transform_0, window_bounds = array<i64: 256, 128>}, {pipeline_mode = #tpu.pipeline_mode<synchronous>, transform_indices = @transform_1, window_bounds = array<i64: 1, 128>}, {pipeline_mode = #tpu.pipeline_mode<synchronous>, transform_indices = @transform_2, window_bounds = array<i64: 1, 128>}, {pipeline_mode = #tpu.pipeline_mode<synchronous>, transform_indices = @transform_3, window_bounds = array<i64: 9, 128, 128>}, {transform_indices = @transform_4, window_bounds = array<i64: 128, 128>}, {transform_indices = @transform_5, window_bounds = array<i64: 1, 1, 128>}, {transform_indices = @transform_6, window_bounds = array<i64: 1, 1, 128>}]} {
    %c0_i32 = arith.constant 0 : i32
    %0 = arith.cmpi eq, %arg1, %c0_i32 : i32
    %1 = arith.extui %0 : i1 to i32
    %c0_i32_0 = arith.constant 0 : i32
    %2 = arith.cmpi ne, %1, %c0_i32_0 : i32
    scf.if %2 {
      %c0_90 = arith.constant 0 : index
      %c0_91 = arith.constant 0 : index
      %189 = vector.load %arg2[%c0_90, %c0_91] : memref<256x128xbf16, #tpu.memory_space<vmem>>, vector<256x128xbf16>
      %190 = arith.extf %189 : vector<256x128xbf16> to vector<256x128xf32>
      %c0_92 = arith.constant 0 : index
      %c0_93 = arith.constant 0 : index
      %191 = vector.load %arg3[%c0_92, %c0_93] : memref<1x128xf32, #tpu.memory_space<vmem>>, vector<1x128xf32>
      %192 = vector.broadcast %191 : vector<1x128xf32> to vector<256x128xf32>
      %193 = arith.mulf %190, %192 : vector<256x128xf32>
      %c0_94 = arith.constant 0 : index
      %c0_95 = arith.constant 0 : index
      %194 = vector.load %arg4[%c0_94, %c0_95] : memref<1x128xf32, #tpu.memory_space<vmem>>, vector<1x128xf32>
      %195 = vector.broadcast %194 : vector<1x128xf32> to vector<256x128xf32>
      %196 = arith.addf %193, %195 : vector<256x128xf32>
      %cst_96 = arith.constant 0.000000e+00 : f32
      %197 = vector.broadcast %cst_96 : f32 to vector<256x128xf32>
      %198 = arith.maximumf %196, %197 : vector<256x128xf32>
      %cst_97 = arith.constant 0.000000e+00 : f32
      %199 = vector.broadcast %cst_97 : f32 to vector<16x128xf32>
      %c0_98 = arith.constant 0 : index
      %c0_99 = arith.constant 0 : index
      %200 = vector.load %arg9[%c0_98, %c0_99] : memref<288x128xf32, #tpu.memory_space<vmem>>, vector<16x128xf32>
      tpu.vector_store %arg9[%c0_98, %c0_99], %199 {strides = array<i32>} : memref<288x128xf32, #tpu.memory_space<vmem>>, vector<16x128xf32>,
      %c272 = arith.constant 272 : index
      %c0_100 = arith.constant 0 : index
      %201 = vector.load %arg9[%c272, %c0_100] : memref<288x128xf32, #tpu.memory_space<vmem>>, vector<16x128xf32>
      tpu.vector_store %arg9[%c272, %c0_100], %199 {strides = array<i32>} : memref<288x128xf32, #tpu.memory_space<vmem>>, vector<16x128xf32>,
      %c16 = arith.constant 16 : index
      %c0_101 = arith.constant 0 : index
      %202 = vector.load %arg9[%c16, %c0_101] : memref<288x128xf32, #tpu.memory_space<vmem>>, vector<256x128xf32>
      tpu.vector_store %arg9[%c16, %c0_101], %198 {strides = array<i32>} : memref<288x128xf32, #tpu.memory_space<vmem>>, vector<256x128xf32>,
    } else {
    }
    %3 = tpu.iota {dimensions = array<i32: 0>} : vector<128x1xi32>
    %c16_i32 = arith.constant 16 : i32
    %c0_i32_1 = arith.constant 0 : i32
    %4 = arith.cmpi eq, %c16_i32, %c0_i32_1 : i32
    %c1_i32 = arith.constant 1 : i32
    %5 = arith.select %4, %c1_i32, %c16_i32 : i32
    %6 = vector.broadcast %5 : i32 to vector<128x1xi32>
    %7 = arith.remsi %3, %6 : vector<128x1xi32>
    %c0_i32_2 = arith.constant 0 : i32
    %8 = vector.broadcast %c0_i32_2 : i32 to vector<128x1xi32>
    %9 = arith.cmpi ne, %7, %8 : vector<128x1xi32>
    %c0_i32_3 = arith.constant 0 : i32
    %10 = vector.broadcast %c0_i32_3 : i32 to vector<128x1xi32>
    %11 = arith.cmpi slt, %7, %10 : vector<128x1xi32>
    %c0_i32_4 = arith.constant 0 : i32
    %12 = arith.cmpi slt, %5, %c0_i32_4 : i32
    %13 = vector.broadcast %12 : i1 to vector<128x1xi1>
    %14 = vector.broadcast %13 : vector<128x1xi1> to vector<128x1xi1>
    %15 = arith.xori %11, %14 : vector<128x1xi1>
    %16 = arith.andi %15, %9 : vector<128x1xi1>
    %17 = vector.broadcast %5 : i32 to vector<128x1xi32>
    %18 = arith.addi %7, %17 : vector<128x1xi32>
    %19 = arith.select %16, %18, %7 : vector<128x1xi1>, vector<128x1xi32>
    %c128_i32 = arith.constant 128 : i32
    %20 = arith.muli %arg1, %c128_i32 : i32
    %cst = arith.constant 0.000000e+00 : f32
    %21 = vector.broadcast %cst : f32 to vector<128x128xf32>
    %c16_i32_5 = arith.constant 16 : i32
    %22 = arith.addi %c16_i32_5, %20 : i32
    %c-16_i32 = arith.constant -16 : i32
    %23 = arith.addi %22, %c-16_i32 : i32
    %24 = tpu.assume_multiple %23, 8 : i32
    %25 = arith.index_cast %24 : i32 to index
    %c0 = arith.constant 0 : index
    %26 = vector.load %arg9[%25, %c0] : memref<288x128xf32, #tpu.memory_space<vmem>>, vector<128x128xf32>
    %c1_i32_6 = arith.constant 1 : i32
    %27 = tpu.dynamic_rotate %26 by %c1_i32_6 dim 0 : vector<128x128xf32>, i32 -> vector<128x128xf32>
    %c-1_i32 = arith.constant -1 : i32
    %28 = vector.broadcast %c-1_i32 : i32 to vector<128x1xi32>
    %29 = arith.addi %19, %28 : vector<128x1xi32>
    %c0_i32_7 = arith.constant 0 : i32
    %30 = vector.broadcast %c0_i32_7 : i32 to vector<128x1xi32>
    %31 = arith.cmpi sge, %29, %30 : vector<128x1xi32>
    %c-1_i32_8 = arith.constant -1 : i32
    %32 = vector.broadcast %c-1_i32_8 : i32 to vector<128x1xi32>
    %33 = arith.addi %19, %32 : vector<128x1xi32>
    %c16_i32_9 = arith.constant 16 : i32
    %34 = vector.broadcast %c16_i32_9 : i32 to vector<128x1xi32>
    %35 = arith.cmpi slt, %33, %34 : vector<128x1xi32>
    %36 = arith.andi %31, %35 : vector<128x1xi1>
    %cst_10 = arith.constant 0.000000e+00 : f32
    %37 = vector.shape_cast %36 : vector<128x1xi1> to vector<128x1xi1>
    %38 = vector.broadcast %37 : vector<128x1xi1> to vector<128x128xi1>
    %39 = vector.broadcast %cst_10 : f32 to vector<128x128xf32>
    %40 = arith.select %38, %27, %39 : vector<128x128xi1>, vector<128x128xf32>
    %41 = arith.truncf %40 : vector<128x128xf32> to vector<128x128xbf16>
    %c0_11 = arith.constant 0 : index
    %c0_12 = arith.constant 0 : index
    %c0_13 = arith.constant 0 : index
    %42 = vector.load %arg5[%c0_11, %c0_12, %c0_13] : memref<9x128x128xbf16, #tpu.memory_space<vmem>>, vector<1x128x128xbf16>
    %43 = vector.shape_cast %42 : vector<1x128x128xbf16> to vector<128x128xbf16>
    %cst_14 = arith.constant dense<0.000000e+00> : vector<128x128xf32>
    %44 = tpu.matmul %41, %43, %cst_14 {dimension_numbers = #tpu.dot_dimension_numbers<[1], [0], [0], [1], [0, 0, 1, 1], [], []>} : vector<128x128xbf16>, vector<128x128xbf16>, vector<128x128xf32> -> vector<128x128xf32>
    %45 = arith.addf %21, %44 : vector<128x128xf32>
    %46 = arith.index_cast %24 : i32 to index
    %c0_15 = arith.constant 0 : index
    %47 = vector.load %arg9[%46, %c0_15] : memref<288x128xf32, #tpu.memory_space<vmem>>, vector<128x128xf32>
    %48 = arith.truncf %47 : vector<128x128xf32> to vector<128x128xbf16>
    %c1 = arith.constant 1 : index
    %c0_16 = arith.constant 0 : index
    %c0_17 = arith.constant 0 : index
    %49 = vector.load %arg5[%c1, %c0_16, %c0_17] : memref<9x128x128xbf16, #tpu.memory_space<vmem>>, vector<1x128x128xbf16>
    %50 = vector.shape_cast %49 : vector<1x128x128xbf16> to vector<128x128xbf16>
    %cst_18 = arith.constant dense<0.000000e+00> : vector<128x128xf32>
    %51 = tpu.matmul %48, %50, %cst_18 {dimension_numbers = #tpu.dot_dimension_numbers<[1], [0], [0], [1], [0, 0, 1, 1], [], []>} : vector<128x128xbf16>, vector<128x128xbf16>, vector<128x128xf32> -> vector<128x128xf32>
    %52 = arith.addf %45, %51 : vector<128x128xf32>
    %53 = arith.index_cast %24 : i32 to index
    %c0_19 = arith.constant 0 : index
    %54 = vector.load %arg9[%53, %c0_19] : memref<288x128xf32, #tpu.memory_space<vmem>>, vector<128x128xf32>
    %c127_i32 = arith.constant 127 : i32
    %55 = tpu.dynamic_rotate %54 by %c127_i32 dim 0 : vector<128x128xf32>, i32 -> vector<128x128xf32>
    %c1_i32_20 = arith.constant 1 : i32
    %56 = vector.broadcast %c1_i32_20 : i32 to vector<128x1xi32>
    %57 = arith.addi %19, %56 : vector<128x1xi32>
    %c0_i32_21 = arith.constant 0 : i32
    %58 = vector.broadcast %c0_i32_21 : i32 to vector<128x1xi32>
    %59 = arith.cmpi sge, %57, %58 : vector<128x1xi32>
    %c1_i32_22 = arith.constant 1 : i32
    %60 = vector.broadcast %c1_i32_22 : i32 to vector<128x1xi32>
    %61 = arith.addi %19, %60 : vector<128x1xi32>
    %c16_i32_23 = arith.constant 16 : i32
    %62 = vector.broadcast %c16_i32_23 : i32 to vector<128x1xi32>
    %63 = arith.cmpi slt, %61, %62 : vector<128x1xi32>
    %64 = arith.andi %59, %63 : vector<128x1xi1>
    %cst_24 = arith.constant 0.000000e+00 : f32
    %65 = vector.shape_cast %64 : vector<128x1xi1> to vector<128x1xi1>
    %66 = vector.broadcast %65 : vector<128x1xi1> to vector<128x128xi1>
    %67 = vector.broadcast %cst_24 : f32 to vector<128x128xf32>
    %68 = arith.select %66, %55, %67 : vector<128x128xi1>, vector<128x128xf32>
    %69 = arith.truncf %68 : vector<128x128xf32> to vector<128x128xbf16>
    %c2 = arith.constant 2 : index
    %c0_25 = arith.constant 0 : index
    %c0_26 = arith.constant 0 : index
    %70 = vector.load %arg5[%c2, %c0_25, %c0_26] : memref<9x128x128xbf16, #tpu.memory_space<vmem>>, vector<1x128x128xbf16>
    %71 = vector.shape_cast %70 : vector<1x128x128xbf16> to vector<128x128xbf16>
    %cst_27 = arith.constant dense<0.000000e+00> : vector<128x128xf32>
    %72 = tpu.matmul %69, %71, %cst_27 {dimension_numbers = #tpu.dot_dimension_numbers<[1], [0], [0], [1], [0, 0, 1, 1], [], []>} : vector<128x128xbf16>, vector<128x128xbf16>, vector<128x128xf32> -> vector<128x128xf32>
    %73 = arith.addf %52, %72 : vector<128x128xf32>
    %c16_i32_28 = arith.constant 16 : i32
    %74 = arith.addi %c16_i32_28, %20 : i32
    %c0_i32_29 = arith.constant 0 : i32
    %75 = arith.addi %74, %c0_i32_29 : i32
    %76 = tpu.assume_multiple %75, 8 : i32
    %77 = arith.index_cast %76 : i32 to index
    %c0_30 = arith.constant 0 : index
    %78 = vector.load %arg9[%77, %c0_30] : memref<288x128xf32, #tpu.memory_space<vmem>>, vector<128x128xf32>
    %c1_i32_31 = arith.constant 1 : i32
    %79 = tpu.dynamic_rotate %78 by %c1_i32_31 dim 0 : vector<128x128xf32>, i32 -> vector<128x128xf32>
    %c-1_i32_32 = arith.constant -1 : i32
    %80 = vector.broadcast %c-1_i32_32 : i32 to vector<128x1xi32>
    %81 = arith.addi %19, %80 : vector<128x1xi32>
    %c0_i32_33 = arith.constant 0 : i32
    %82 = vector.broadcast %c0_i32_33 : i32 to vector<128x1xi32>
    %83 = arith.cmpi sge, %81, %82 : vector<128x1xi32>
    %c-1_i32_34 = arith.constant -1 : i32
    %84 = vector.broadcast %c-1_i32_34 : i32 to vector<128x1xi32>
    %85 = arith.addi %19, %84 : vector<128x1xi32>
    %c16_i32_35 = arith.constant 16 : i32
    %86 = vector.broadcast %c16_i32_35 : i32 to vector<128x1xi32>
    %87 = arith.cmpi slt, %85, %86 : vector<128x1xi32>
    %88 = arith.andi %83, %87 : vector<128x1xi1>
    %cst_36 = arith.constant 0.000000e+00 : f32
    %89 = vector.shape_cast %88 : vector<128x1xi1> to vector<128x1xi1>
    %90 = vector.broadcast %89 : vector<128x1xi1> to vector<128x128xi1>
    %91 = vector.broadcast %cst_36 : f32 to vector<128x128xf32>
    %92 = arith.select %90, %79, %91 : vector<128x128xi1>, vector<128x128xf32>
    %93 = arith.truncf %92 : vector<128x128xf32> to vector<128x128xbf16>
    %c3 = arith.constant 3 : index
    %c0_37 = arith.constant 0 : index
    %c0_38 = arith.constant 0 : index
    %94 = vector.load %arg5[%c3, %c0_37, %c0_38] : memref<9x128x128xbf16, #tpu.memory_space<vmem>>, vector<1x128x128xbf16>
    %95 = vector.shape_cast %94 : vector<1x128x128xbf16> to vector<128x128xbf16>
    %cst_39 = arith.constant dense<0.000000e+00> : vector<128x128xf32>
    %96 = tpu.matmul %93, %95, %cst_39 {dimension_numbers = #tpu.dot_dimension_numbers<[1], [0], [0], [1], [0, 0, 1, 1], [], []>} : vector<128x128xbf16>, vector<128x128xbf16>, vector<128x128xf32> -> vector<128x128xf32>
    %97 = arith.addf %73, %96 : vector<128x128xf32>
    %98 = arith.index_cast %76 : i32 to index
    %c0_40 = arith.constant 0 : index
    %99 = vector.load %arg9[%98, %c0_40] : memref<288x128xf32, #tpu.memory_space<vmem>>, vector<128x128xf32>
    %100 = arith.truncf %99 : vector<128x128xf32> to vector<128x128xbf16>
    %c4 = arith.constant 4 : index
    %c0_41 = arith.constant 0 : index
    %c0_42 = arith.constant 0 : index
    %101 = vector.load %arg5[%c4, %c0_41, %c0_42] : memref<9x128x128xbf16, #tpu.memory_space<vmem>>, vector<1x128x128xbf16>
    %102 = vector.shape_cast %101 : vector<1x128x128xbf16> to vector<128x128xbf16>
    %cst_43 = arith.constant dense<0.000000e+00> : vector<128x128xf32>
    %103 = tpu.matmul %100, %102, %cst_43 {dimension_numbers = #tpu.dot_dimension_numbers<[1], [0], [0], [1], [0, 0, 1, 1], [], []>} : vector<128x128xbf16>, vector<128x128xbf16>, vector<128x128xf32> -> vector<128x128xf32>
    %104 = arith.addf %97, %103 : vector<128x128xf32>
    %105 = arith.index_cast %76 : i32 to index
    %c0_44 = arith.constant 0 : index
    %106 = vector.load %arg9[%105, %c0_44] : memref<288x128xf32, #tpu.memory_space<vmem>>, vector<128x128xf32>
    %c127_i32_45 = arith.constant 127 : i32
    %107 = tpu.dynamic_rotate %106 by %c127_i32_45 dim 0 : vector<128x128xf32>, i32 -> vector<128x128xf32>
    %c1_i32_46 = arith.constant 1 : i32
    %108 = vector.broadcast %c1_i32_46 : i32 to vector<128x1xi32>
    %109 = arith.addi %19, %108 : vector<128x1xi32>
    %c0_i32_47 = arith.constant 0 : i32
    %110 = vector.broadcast %c0_i32_47 : i32 to vector<128x1xi32>
    %111 = arith.cmpi sge, %109, %110 : vector<128x1xi32>
    %c1_i32_48 = arith.constant 1 : i32
    %112 = vector.broadcast %c1_i32_48 : i32 to vector<128x1xi32>
    %113 = arith.addi %19, %112 : vector<128x1xi32>
    %c16_i32_49 = arith.constant 16 : i32
    %114 = vector.broadcast %c16_i32_49 : i32 to vector<128x1xi32>
    %115 = arith.cmpi slt, %113, %114 : vector<128x1xi32>
    %116 = arith.andi %111, %115 : vector<128x1xi1>
    %cst_50 = arith.constant 0.000000e+00 : f32
    %117 = vector.shape_cast %116 : vector<128x1xi1> to vector<128x1xi1>
    %118 = vector.broadcast %117 : vector<128x1xi1> to vector<128x128xi1>
    %119 = vector.broadcast %cst_50 : f32 to vector<128x128xf32>
    %120 = arith.select %118, %107, %119 : vector<128x128xi1>, vector<128x128xf32>
    %121 = arith.truncf %120 : vector<128x128xf32> to vector<128x128xbf16>
    %c5 = arith.constant 5 : index
    %c0_51 = arith.constant 0 : index
    %c0_52 = arith.constant 0 : index
    %122 = vector.load %arg5[%c5, %c0_51, %c0_52] : memref<9x128x128xbf16, #tpu.memory_space<vmem>>, vector<1x128x128xbf16>
    %123 = vector.shape_cast %122 : vector<1x128x128xbf16> to vector<128x128xbf16>
    %cst_53 = arith.constant dense<0.000000e+00> : vector<128x128xf32>
    %124 = tpu.matmul %121, %123, %cst_53 {dimension_numbers = #tpu.dot_dimension_numbers<[1], [0], [0], [1], [0, 0, 1, 1], [], []>} : vector<128x128xbf16>, vector<128x128xbf16>, vector<128x128xf32> -> vector<128x128xf32>
    %125 = arith.addf %104, %124 : vector<128x128xf32>
    %c16_i32_54 = arith.constant 16 : i32
    %126 = arith.addi %c16_i32_54, %20 : i32
    %c16_i32_55 = arith.constant 16 : i32
    %127 = arith.addi %126, %c16_i32_55 : i32
    %128 = tpu.assume_multiple %127, 8 : i32
    %129 = arith.index_cast %128 : i32 to index
    %c0_56 = arith.constant 0 : index
    %130 = vector.load %arg9[%129, %c0_56] : memref<288x128xf32, #tpu.memory_space<vmem>>, vector<128x128xf32>
    %c1_i32_57 = arith.constant 1 : i32
    %131 = tpu.dynamic_rotate %130 by %c1_i32_57 dim 0 : vector<128x128xf32>, i32 -> vector<128x128xf32>
    %c-1_i32_58 = arith.constant -1 : i32
    %132 = vector.broadcast %c-1_i32_58 : i32 to vector<128x1xi32>
    %133 = arith.addi %19, %132 : vector<128x1xi32>
    %c0_i32_59 = arith.constant 0 : i32
    %134 = vector.broadcast %c0_i32_59 : i32 to vector<128x1xi32>
    %135 = arith.cmpi sge, %133, %134 : vector<128x1xi32>
    %c-1_i32_60 = arith.constant -1 : i32
    %136 = vector.broadcast %c-1_i32_60 : i32 to vector<128x1xi32>
    %137 = arith.addi %19, %136 : vector<128x1xi32>
    %c16_i32_61 = arith.constant 16 : i32
    %138 = vector.broadcast %c16_i32_61 : i32 to vector<128x1xi32>
    %139 = arith.cmpi slt, %137, %138 : vector<128x1xi32>
    %140 = arith.andi %135, %139 : vector<128x1xi1>
    %cst_62 = arith.constant 0.000000e+00 : f32
    %141 = vector.shape_cast %140 : vector<128x1xi1> to vector<128x1xi1>
    %142 = vector.broadcast %141 : vector<128x1xi1> to vector<128x128xi1>
    %143 = vector.broadcast %cst_62 : f32 to vector<128x128xf32>
    %144 = arith.select %142, %131, %143 : vector<128x128xi1>, vector<128x128xf32>
    %145 = arith.truncf %144 : vector<128x128xf32> to vector<128x128xbf16>
    %c6 = arith.constant 6 : index
    %c0_63 = arith.constant 0 : index
    %c0_64 = arith.constant 0 : index
    %146 = vector.load %arg5[%c6, %c0_63, %c0_64] : memref<9x128x128xbf16, #tpu.memory_space<vmem>>, vector<1x128x128xbf16>
    %147 = vector.shape_cast %146 : vector<1x128x128xbf16> to vector<128x128xbf16>
    %cst_65 = arith.constant dense<0.000000e+00> : vector<128x128xf32>
    %148 = tpu.matmul %145, %147, %cst_65 {dimension_numbers = #tpu.dot_dimension_numbers<[1], [0], [0], [1], [0, 0, 1, 1], [], []>} : vector<128x128xbf16>, vector<128x128xbf16>, vector<128x128xf32> -> vector<128x128xf32>
    %149 = arith.addf %125, %148 : vector<128x128xf32>
    %150 = arith.index_cast %128 : i32 to index
    %c0_66 = arith.constant 0 : index
    %151 = vector.load %arg9[%150, %c0_66] : memref<288x128xf32, #tpu.memory_space<vmem>>, vector<128x128xf32>
    %152 = arith.truncf %151 : vector<128x128xf32> to vector<128x128xbf16>
    %c7 = arith.constant 7 : index
    %c0_67 = arith.constant 0 : index
    %c0_68 = arith.constant 0 : index
    %153 = vector.load %arg5[%c7, %c0_67, %c0_68] : memref<9x128x128xbf16, #tpu.memory_space<vmem>>, vector<1x128x128xbf16>
    %154 = vector.shape_cast %153 : vector<1x128x128xbf16> to vector<128x128xbf16>
    %cst_69 = arith.constant dense<0.000000e+00> : vector<128x128xf32>
    %155 = tpu.matmul %152, %154, %cst_69 {dimension_numbers = #tpu.dot_dimension_numbers<[1], [0], [0], [1], [0, 0, 1, 1], [], []>} : vector<128x128xbf16>, vector<128x128xbf16>, vector<128x128xf32> -> vector<128x128xf32>
    %156 = arith.addf %149, %155 : vector<128x128xf32>
    %157 = arith.index_cast %128 : i32 to index
    %c0_70 = arith.constant 0 : index
    %158 = vector.load %arg9[%157, %c0_70] : memref<288x128xf32, #tpu.memory_space<vmem>>, vector<128x128xf32>
    %c127_i32_71 = arith.constant 127 : i32
    %159 = tpu.dynamic_rotate %158 by %c127_i32_71 dim 0 : vector<128x128xf32>, i32 -> vector<128x128xf32>
    %c1_i32_72 = arith.constant 1 : i32
    %160 = vector.broadcast %c1_i32_72 : i32 to vector<128x1xi32>
    %161 = arith.addi %19, %160 : vector<128x1xi32>
    %c0_i32_73 = arith.constant 0 : i32
    %162 = vector.broadcast %c0_i32_73 : i32 to vector<128x1xi32>
    %163 = arith.cmpi sge, %161, %162 : vector<128x1xi32>
    %c1_i32_74 = arith.constant 1 : i32
    %164 = vector.broadcast %c1_i32_74 : i32 to vector<128x1xi32>
    %165 = arith.addi %19, %164 : vector<128x1xi32>
    %c16_i32_75 = arith.constant 16 : i32
    %166 = vector.broadcast %c16_i32_75 : i32 to vector<128x1xi32>
    %167 = arith.cmpi slt, %165, %166 : vector<128x1xi32>
    %168 = arith.andi %163, %167 : vector<128x1xi1>
    %cst_76 = arith.constant 0.000000e+00 : f32
    %169 = vector.shape_cast %168 : vector<128x1xi1> to vector<128x1xi1>
    %170 = vector.broadcast %169 : vector<128x1xi1> to vector<128x128xi1>
    %171 = vector.broadcast %cst_76 : f32 to vector<128x128xf32>
    %172 = arith.select %170, %159, %171 : vector<128x128xi1>, vector<128x128xf32>
    %173 = arith.truncf %172 : vector<128x128xf32> to vector<128x128xbf16>
    %c8 = arith.constant 8 : index
    %c0_77 = arith.constant 0 : index
    %c0_78 = arith.constant 0 : index
    %174 = vector.load %arg5[%c8, %c0_77, %c0_78] : memref<9x128x128xbf16, #tpu.memory_space<vmem>>, vector<1x128x128xbf16>
    %175 = vector.shape_cast %174 : vector<1x128x128xbf16> to vector<128x128xbf16>
    %cst_79 = arith.constant dense<0.000000e+00> : vector<128x128xf32>
    %176 = tpu.matmul %173, %175, %cst_79 {dimension_numbers = #tpu.dot_dimension_numbers<[1], [0], [0], [1], [0, 0, 1, 1], [], []>} : vector<128x128xbf16>, vector<128x128xbf16>, vector<128x128xf32> -> vector<128x128xf32>
    %177 = arith.addf %156, %176 : vector<128x128xf32>
    %178 = arith.truncf %177 : vector<128x128xf32> to vector<128x128xbf16>
    %c0_80 = arith.constant 0 : index
    %c0_81 = arith.constant 0 : index
    %179 = vector.load %arg6[%c0_80, %c0_81] : memref<128x128xbf16, #tpu.memory_space<vmem>>, vector<128x128xbf16>
    tpu.vector_store %arg6[%c0_80, %c0_81], %178 {strides = array<i32>} : memref<128x128xbf16, #tpu.memory_space<vmem>>, vector<128x128xbf16>,
    %cst_82 = arith.constant dense<0.000000e+00> : vector<128xf32>
    %180 = vector.multi_reduction <add>, %177, %cst_82 [0] : vector<128x128xf32> to vector<128xf32>
    %181 = vector.shape_cast %180 : vector<128xf32> to vector<1x128xf32>
    %182 = vector.shape_cast %181 : vector<1x128xf32> to vector<1x1x128xf32>
    %c0_83 = arith.constant 0 : index
    %c0_84 = arith.constant 0 : index
    %c0_85 = arith.constant 0 : index
    %183 = vector.load %arg7[%c0_83, %c0_84, %c0_85] : memref<1x1x128xf32, #tpu.memory_space<vmem>>, vector<1x1x128xf32>
    tpu.vector_store %arg7[%c0_83, %c0_84, %c0_85], %182 {strides = array<i32>} : memref<1x1x128xf32, #tpu.memory_space<vmem>>, vector<1x1x128xf32>,
    %184 = arith.mulf %177, %177 : vector<128x128xf32>
    %cst_86 = arith.constant dense<0.000000e+00> : vector<128xf32>
    %185 = vector.multi_reduction <add>, %184, %cst_86 [0] : vector<128x128xf32> to vector<128xf32>
    %186 = vector.shape_cast %185 : vector<128xf32> to vector<1x128xf32>
    %187 = vector.shape_cast %186 : vector<1x128xf32> to vector<1x1x128xf32>
    %c0_87 = arith.constant 0 : index
    %c0_88 = arith.constant 0 : index
    %c0_89 = arith.constant 0 : index
    %188 = vector.load %arg8[%c0_87, %c0_88, %c0_89] : memref<1x1x128xf32, #tpu.memory_space<vmem>>, vector<1x1x128xf32>
    tpu.vector_store %arg8[%c0_87, %c0_88, %c0_89], %187 {strides = array<i32>} : memref<1x1x128xf32, #tpu.memory_space<vmem>>, vector<1x1x128xf32>,
    return
  }
  func.func @transform_0(%arg0: i32, %arg1: i32) -> (i32, i32) {
    %c0_i32 = arith.constant 0 : i32
    %c0_i32_0 = arith.constant 0 : i32
    return %arg0, %c0_i32 : i32, i32
  }
  func.func @transform_1(%arg0: i32, %arg1: i32) -> (i32, i32) {
    %c0_i32 = arith.constant 0 : i32
    %c0_i32_0 = arith.constant 0 : i32
    %c0_i32_1 = arith.constant 0 : i32
    return %c0_i32, %c0_i32_0 : i32, i32
  }
  func.func @transform_2(%arg0: i32, %arg1: i32) -> (i32, i32) {
    %c0_i32 = arith.constant 0 : i32
    %c0_i32_0 = arith.constant 0 : i32
    %c0_i32_1 = arith.constant 0 : i32
    return %c0_i32, %c0_i32_0 : i32, i32
  }
  func.func @transform_3(%arg0: i32, %arg1: i32) -> (i32, i32, i32) {
    %c0_i32 = arith.constant 0 : i32
    %c0_i32_0 = arith.constant 0 : i32
    %c0_i32_1 = arith.constant 0 : i32
    %c0_i32_2 = arith.constant 0 : i32
    return %c0_i32, %c0_i32_0, %c0_i32_1 : i32, i32, i32
  }
  func.func @transform_4(%arg0: i32, %arg1: i32) -> (i32, i32) {
    %c2_i32 = arith.constant 2 : i32
    %0 = arith.muli %arg0, %c2_i32 : i32
    %1 = arith.addi %0, %arg1 : i32
    %c0_i32 = arith.constant 0 : i32
    %c0_i32_0 = arith.constant 0 : i32
    return %1, %c0_i32 : i32, i32
  }
  func.func @transform_5(%arg0: i32, %arg1: i32) -> (i32, i32, i32) {
    %c2_i32 = arith.constant 2 : i32
    %0 = arith.muli %arg0, %c2_i32 : i32
    %1 = arith.addi %0, %arg1 : i32
    %c0_i32 = arith.constant 0 : i32
    %c0_i32_0 = arith.constant 0 : i32
    %c0_i32_1 = arith.constant 0 : i32
    return %1, %c0_i32, %c0_i32_0 : i32, i32, i32
  }
  func.func @transform_6(%arg0: i32, %arg1: i32) -> (i32, i32, i32) {
    %c2_i32 = arith.constant 2 : i32
    %0 = arith.muli %arg0, %c2_i32 : i32
    %1 = arith.addi %0, %arg1 : i32
    %c0_i32 = arith.constant 0 : i32
    %c0_i32_0 = arith.constant 0 : i32
    %c0_i32_1 = arith.constant 0 : i32
    return %1, %c0_i32, %c0_i32_0 : i32, i32, i32
  }
}

module attributes {stable_mosaic.version = 11 : i64} {
  func.func @_bn_relu_conv1x1_stats_kernel(%arg0: i32, %arg1: memref<512x128xbf16, #tpu.memory_space<vmem>>, %arg2: memref<1x128xf32, #tpu.memory_space<vmem>>, %arg3: memref<1x128xf32, #tpu.memory_space<vmem>>, %arg4: memref<128x128xbf16, #tpu.memory_space<vmem>>, %arg5: memref<512x128xbf16, #tpu.memory_space<vmem>>, %arg6: memref<1x1x128xf32, #tpu.memory_space<vmem>>, %arg7: memref<1x1x128xf32, #tpu.memory_space<vmem>>) attributes {dimension_semantics = [#tpu.dimension_semantics<parallel>], iteration_bounds = array<i64: 1>, scalar_prefetch = 0 : i64, scratch_operands = 0 : i64, tpu.core_type = #tpu.core_type<tc>, window_params = [{transform_indices = @transform_0, window_bounds = array<i64: 512, 128>}, {pipeline_mode = #tpu.pipeline_mode<synchronous>, transform_indices = @transform_1, window_bounds = array<i64: 1, 128>}, {pipeline_mode = #tpu.pipeline_mode<synchronous>, transform_indices = @transform_2, window_bounds = array<i64: 1, 128>}, {pipeline_mode = #tpu.pipeline_mode<synchronous>, transform_indices = @transform_3, window_bounds = array<i64: 128, 128>}, {transform_indices = @transform_4, window_bounds = array<i64: 512, 128>}, {transform_indices = @transform_5, window_bounds = array<i64: 1, 1, 128>}, {transform_indices = @transform_6, window_bounds = array<i64: 1, 1, 128>}]} {
    %c0 = arith.constant 0 : index
    %c0_0 = arith.constant 0 : index
    %0 = vector.load %arg1[%c0, %c0_0] : memref<512x128xbf16, #tpu.memory_space<vmem>>, vector<512x128xbf16>
    %1 = arith.extf %0 : vector<512x128xbf16> to vector<512x128xf32>
    %c0_1 = arith.constant 0 : index
    %c0_2 = arith.constant 0 : index
    %2 = vector.load %arg2[%c0_1, %c0_2] : memref<1x128xf32, #tpu.memory_space<vmem>>, vector<1x128xf32>
    %3 = vector.broadcast %2 : vector<1x128xf32> to vector<512x128xf32>
    %4 = arith.mulf %1, %3 : vector<512x128xf32>
    %c0_3 = arith.constant 0 : index
    %c0_4 = arith.constant 0 : index
    %5 = vector.load %arg3[%c0_3, %c0_4] : memref<1x128xf32, #tpu.memory_space<vmem>>, vector<1x128xf32>
    %6 = vector.broadcast %5 : vector<1x128xf32> to vector<512x128xf32>
    %7 = arith.addf %4, %6 : vector<512x128xf32>
    %cst = arith.constant 0.000000e+00 : f32
    %8 = vector.broadcast %cst : f32 to vector<512x128xf32>
    %9 = arith.maximumf %7, %8 : vector<512x128xf32>
    %10 = arith.truncf %9 : vector<512x128xf32> to vector<512x128xbf16>
    %c0_5 = arith.constant 0 : index
    %c0_6 = arith.constant 0 : index
    %11 = vector.load %arg4[%c0_5, %c0_6] : memref<128x128xbf16, #tpu.memory_space<vmem>>, vector<128x128xbf16>
    %cst_7 = arith.constant dense<0.000000e+00> : vector<512x128xf32>
    %12 = tpu.matmul %10, %11, %cst_7 {dimension_numbers = #tpu.dot_dimension_numbers<[1], [0], [0], [1], [0, 0, 1, 1], [], []>} : vector<512x128xbf16>, vector<128x128xbf16>, vector<512x128xf32> -> vector<512x128xf32>
    %13 = arith.truncf %12 : vector<512x128xf32> to vector<512x128xbf16>
    %c0_8 = arith.constant 0 : index
    %c0_9 = arith.constant 0 : index
    %14 = vector.load %arg5[%c0_8, %c0_9] : memref<512x128xbf16, #tpu.memory_space<vmem>>, vector<512x128xbf16>
    tpu.vector_store %arg5[%c0_8, %c0_9], %13 {strides = array<i32>} : memref<512x128xbf16, #tpu.memory_space<vmem>>, vector<512x128xbf16>,
    %cst_10 = arith.constant dense<0.000000e+00> : vector<128xf32>
    %15 = vector.multi_reduction <add>, %12, %cst_10 [0] : vector<512x128xf32> to vector<128xf32>
    %16 = vector.shape_cast %15 : vector<128xf32> to vector<1x128xf32>
    %17 = vector.shape_cast %16 : vector<1x128xf32> to vector<1x1x128xf32>
    %c0_11 = arith.constant 0 : index
    %c0_12 = arith.constant 0 : index
    %c0_13 = arith.constant 0 : index
    %18 = vector.load %arg6[%c0_11, %c0_12, %c0_13] : memref<1x1x128xf32, #tpu.memory_space<vmem>>, vector<1x1x128xf32>
    tpu.vector_store %arg6[%c0_11, %c0_12, %c0_13], %17 {strides = array<i32>} : memref<1x1x128xf32, #tpu.memory_space<vmem>>, vector<1x1x128xf32>,
    %19 = arith.mulf %12, %12 : vector<512x128xf32>
    %cst_14 = arith.constant dense<0.000000e+00> : vector<128xf32>
    %20 = vector.multi_reduction <add>, %19, %cst_14 [0] : vector<512x128xf32> to vector<128xf32>
    %21 = vector.shape_cast %20 : vector<128xf32> to vector<1x128xf32>
    %22 = vector.shape_cast %21 : vector<1x128xf32> to vector<1x1x128xf32>
    %c0_15 = arith.constant 0 : index
    %c0_16 = arith.constant 0 : index
    %c0_17 = arith.constant 0 : index
    %23 = vector.load %arg7[%c0_15, %c0_16, %c0_17] : memref<1x1x128xf32, #tpu.memory_space<vmem>>, vector<1x1x128xf32>
    tpu.vector_store %arg7[%c0_15, %c0_16, %c0_17], %22 {strides = array<i32>} : memref<1x1x128xf32, #tpu.memory_space<vmem>>, vector<1x1x128xf32>,
    return
  }
  func.func @transform_0(%arg0: i32) -> (i32, i32) {
    %c0_i32 = arith.constant 0 : i32
    %c0_i32_0 = arith.constant 0 : i32
    return %arg0, %c0_i32 : i32, i32
  }
  func.func @transform_1(%arg0: i32) -> (i32, i32) {
    %c0_i32 = arith.constant 0 : i32
    %c0_i32_0 = arith.constant 0 : i32
    %c0_i32_1 = arith.constant 0 : i32
    return %c0_i32, %c0_i32_0 : i32, i32
  }
  func.func @transform_2(%arg0: i32) -> (i32, i32) {
    %c0_i32 = arith.constant 0 : i32
    %c0_i32_0 = arith.constant 0 : i32
    %c0_i32_1 = arith.constant 0 : i32
    return %c0_i32, %c0_i32_0 : i32, i32
  }
  func.func @transform_3(%arg0: i32) -> (i32, i32) {
    %c0_i32 = arith.constant 0 : i32
    %c0_i32_0 = arith.constant 0 : i32
    %c0_i32_1 = arith.constant 0 : i32
    return %c0_i32, %c0_i32_0 : i32, i32
  }
  func.func @transform_4(%arg0: i32) -> (i32, i32) {
    %c0_i32 = arith.constant 0 : i32
    %c0_i32_0 = arith.constant 0 : i32
    return %arg0, %c0_i32 : i32, i32
  }
  func.func @transform_5(%arg0: i32) -> (i32, i32, i32) {
    %c0_i32 = arith.constant 0 : i32
    %c0_i32_0 = arith.constant 0 : i32
    %c0_i32_1 = arith.constant 0 : i32
    return %arg0, %c0_i32, %c0_i32_0 : i32, i32, i32
  }
  func.func @transform_6(%arg0: i32) -> (i32, i32, i32) {
    %c0_i32 = arith.constant 0 : i32
    %c0_i32_0 = arith.constant 0 : i32
    %c0_i32_1 = arith.constant 0 : i32
    return %arg0, %c0_i32, %c0_i32_0 : i32, i32, i32
  }
}

module attributes {stable_mosaic.version = 11 : i64} {
  func.func @_bn_residual_relu_kernel(%arg0: i32, %arg1: memref<512x128xbf16, #tpu.memory_space<vmem>>, %arg2: memref<512x128xbf16, #tpu.memory_space<vmem>>, %arg3: memref<1x128xf32, #tpu.memory_space<vmem>>, %arg4: memref<1x128xf32, #tpu.memory_space<vmem>>, %arg5: memref<512x128xf32, #tpu.memory_space<vmem>>) attributes {dimension_semantics = [#tpu.dimension_semantics<parallel>], iteration_bounds = array<i64: 1>, scalar_prefetch = 0 : i64, scratch_operands = 0 : i64, tpu.core_type = #tpu.core_type<tc>, window_params = [{transform_indices = @transform_0, window_bounds = array<i64: 512, 128>}, {transform_indices = @transform_1, window_bounds = array<i64: 512, 128>}, {pipeline_mode = #tpu.pipeline_mode<synchronous>, transform_indices = @transform_2, window_bounds = array<i64: 1, 128>}, {pipeline_mode = #tpu.pipeline_mode<synchronous>, transform_indices = @transform_3, window_bounds = array<i64: 1, 128>}, {transform_indices = @transform_4, window_bounds = array<i64: 512, 128>}]} {
    %c0 = arith.constant 0 : index
    %c0_0 = arith.constant 0 : index
    %0 = vector.load %arg1[%c0, %c0_0] : memref<512x128xbf16, #tpu.memory_space<vmem>>, vector<512x128xbf16>
    %1 = arith.extf %0 : vector<512x128xbf16> to vector<512x128xf32>
    %c0_1 = arith.constant 0 : index
    %c0_2 = arith.constant 0 : index
    %2 = vector.load %arg3[%c0_1, %c0_2] : memref<1x128xf32, #tpu.memory_space<vmem>>, vector<1x128xf32>
    %3 = vector.broadcast %2 : vector<1x128xf32> to vector<512x128xf32>
    %4 = arith.mulf %1, %3 : vector<512x128xf32>
    %c0_3 = arith.constant 0 : index
    %c0_4 = arith.constant 0 : index
    %5 = vector.load %arg4[%c0_3, %c0_4] : memref<1x128xf32, #tpu.memory_space<vmem>>, vector<1x128xf32>
    %6 = vector.broadcast %5 : vector<1x128xf32> to vector<512x128xf32>
    %7 = arith.addf %4, %6 : vector<512x128xf32>
    %c0_5 = arith.constant 0 : index
    %c0_6 = arith.constant 0 : index
    %8 = vector.load %arg2[%c0_5, %c0_6] : memref<512x128xbf16, #tpu.memory_space<vmem>>, vector<512x128xbf16>
    %9 = arith.extf %8 : vector<512x128xbf16> to vector<512x128xf32>
    %10 = arith.addf %7, %9 : vector<512x128xf32>
    %cst = arith.constant 0.000000e+00 : f32
    %11 = vector.broadcast %cst : f32 to vector<512x128xf32>
    %12 = arith.maximumf %10, %11 : vector<512x128xf32>
    %c0_7 = arith.constant 0 : index
    %c0_8 = arith.constant 0 : index
    %13 = vector.load %arg5[%c0_7, %c0_8] : memref<512x128xf32, #tpu.memory_space<vmem>>, vector<512x128xf32>
    tpu.vector_store %arg5[%c0_7, %c0_8], %12 {strides = array<i32>} : memref<512x128xf32, #tpu.memory_space<vmem>>, vector<512x128xf32>,
    return
  }
  func.func @transform_0(%arg0: i32) -> (i32, i32) {
    %c0_i32 = arith.constant 0 : i32
    %c0_i32_0 = arith.constant 0 : i32
    return %arg0, %c0_i32 : i32, i32
  }
  func.func @transform_1(%arg0: i32) -> (i32, i32) {
    %c0_i32 = arith.constant 0 : i32
    %c0_i32_0 = arith.constant 0 : i32
    return %arg0, %c0_i32 : i32, i32
  }
  func.func @transform_2(%arg0: i32) -> (i32, i32) {
    %c0_i32 = arith.constant 0 : i32
    %c0_i32_0 = arith.constant 0 : i32
    %c0_i32_1 = arith.constant 0 : i32
    return %c0_i32, %c0_i32_0 : i32, i32
  }
  func.func @transform_3(%arg0: i32) -> (i32, i32) {
    %c0_i32 = arith.constant 0 : i32
    %c0_i32_0 = arith.constant 0 : i32
    %c0_i32_1 = arith.constant 0 : i32
    return %c0_i32, %c0_i32_0 : i32, i32
  }
  func.func @transform_4(%arg0: i32) -> (i32, i32) {
    %c0_i32 = arith.constant 0 : i32
    %c0_i32_0 = arith.constant 0 : i32
    return %arg0, %c0_i32 : i32, i32
  }
}

</mosaic_0001>

<bundles_post_ra>
// kernel: bottleneck_forward.7
= control target key start
LH: loop header
LB: loop body
LE: loop exit
PB: predicated region body
PF: predicated region fallthrough
CT: control target
= control target key end

     0   :  { %s1478_s0 = inlined_call_operand.vmem [shape: bf16[512,128], index: 0, kind: input, shape index: {}]   ;;  %s1479_s1 = inlined_call_operand.vmem [shape: bf16[512,128], index: 1, kind: input, shape index: {}]   ;;  %s1480_s2 = inlined_call_operand.vmem [shape: f32[1,128], index: 2, kind: input, shape index: {}]   ;;  %s1481_s3 = inlined_call_operand.vmem [shape: f32[1,128], index: 3, kind: input, shape index: {}]   ;;  %s1482_s4 = inlined_call_operand.vmem [shape: f32[512,128], index: 4, kind: output, shape index: {}]  }
   0x1   :  { %v614_v0 = vld [vmem:[%s1478_s0] sm:$0xff]   ;;  %v869_v5 = vld [vmem:[%s1478_s0 + $0x8] sm:$0xff]   ;;  %v870_v12 = vld [vmem:[%s1478_s0 + $0x10] sm:$0xff]  }
   0x2   :  { %v962_v1 = vld [vmem:[%s1480_s2] ss:$0 sm:$0xff]  ;;  %v615_v2 = vunpack.c.l.bf16 %v614_v0  ;;  %v616_v4 = vunpack.c.h.bf16 %v614_v0  ;;  %v900_v6 = vld [vmem:[%s1479_s1 + $0x8] sm:$0xff]   ;;  %v619_v10 = vunpack.c.l.bf16 %v869_v5  ;;  %v901_v13 = vld [vmem:[%s1479_s1 + $0x10] sm:$0xff]   ;;  %v620_v16 = vunpack.c.h.bf16 %v869_v5 }
   0x3   :  { %v742_v3 = vld [vmem:[%s1479_s1] sm:$0xff]   ;;  %v747_v11 = vunpack.c.l.bf16 %v900_v6  ;;  %v748_v17 = vunpack.c.h.bf16 %v900_v6  ;;  %v871_v18 = vld [vmem:[%s1478_s0 + $0x18] sm:$0xff]   ;;  %v623_v20 = vunpack.c.l.bf16 %v870_v12  ;;  %v751_v21 = vunpack.c.l.bf16 %v901_v13  ;;  %v873_v54 = vld [vmem:[%s1478_s0 + $0x28] sm:$0xff]  }
   0x4   :  { %v976_v7 = vld [vmem:[%s1481_s3] ss:$0 sm:$0xff]  ;;  %v743_v8 = vunpack.c.l.bf16 %v742_v3  ;;  %v744_v9 = vunpack.c.h.bf16 %v742_v3  ;;  %v152_v14 = vmul.f32 %v615_v2, %v962_v1  ;;  %v153_v15 = vmul.f32 %v616_v4, %v962_v1  ;;  %v902_v23 = vld [vmem:[%s1479_s1 + $0x18] sm:$0xff]   ;;  %v904_v55 = vld [vmem:[%s1479_s1 + $0x28] sm:$0xff]  }
   0x5   :  { %v154_v19 = vmul.f32 %v619_v10, %v962_v1  ;;  %v624_v22 = vunpack.c.h.bf16 %v870_v12  ;;  %v155_v26 = vmul.f32 %v620_v16, %v962_v1  ;;  %v752_v27 = vunpack.c.h.bf16 %v901_v13  ;;  %v872_v40 = vld [vmem:[%s1478_s0 + $0x20] sm:$0xff]   ;;  %v874_v0 = vld [vmem:[%s1478_s0 + $0x30] sm:$0xff]   ;;  %v875_v16 = vld [vmem:[%s1478_s0 + $0x38] sm:$0xff]  }
   0x6   :  { %v223_v24 = vadd.f32 %v976_v7, %v152_v14  ;;  %v224_v25 = vadd.f32 %v976_v7, %v153_v15  ;;  %v156_v29 = vmul.f32 %v623_v20, %v962_v1  ;;  %v627_v31 = vunpack.c.l.bf16 %v871_v18  ;;  %v903_v45 = vld [vmem:[%s1479_s1 + $0x20] sm:$0xff]   ;;  %v905_v2 = vld [vmem:[%s1479_s1 + $0x30] sm:$0xff]  }
   0x7   :  { %v225_v28 = vadd.f32 %v976_v7, %v154_v19  ;;  %v157_v30 = vmul.f32 %v624_v22, %v962_v1  ;;  %v226_v34 = vadd.f32 %v976_v7, %v155_v26  ;;  %v755_v35 = vunpack.c.l.bf16 %v902_v23 }
   0x8   :  { %v415_v32 = vadd.f32 %v743_v8, %v223_v24  ;;  %v416_v33 = vadd.f32 %v744_v9, %v224_v25  ;;  %v227_v37 = vadd.f32 %v976_v7, %v156_v29  ;;  %v158_v39 = vmul.f32 %v627_v31, %v962_v1 }
   0x9   :  { %v417_v36 = vadd.f32 %v747_v11, %v225_v28  ;;  %v228_v38 = vadd.f32 %v976_v7, %v157_v30  ;;  %v418_v43 = vadd.f32 %v748_v17, %v226_v34  ;;  %v628_v44 = vunpack.c.h.bf16 %v871_v18  ;;  %v876_v34 = vld [vmem:[%s1478_s0 + $0x40] sm:$0xff]  }
   0xa   :  { %v479_v41 = vmax.f32 %v415_v32, 0.0  ;;  %v480_v42 = vmax.f32 %v416_v33, 0.0  ;;  %v419_v47 = vadd.f32 %v751_v21, %v227_v37  ;;  %v229_v49 = vadd.f32 %v976_v7, %v158_v39  ;;  %v906_v21 = vld [vmem:[%s1479_s1 + $0x38] sm:$0xff]   ;;  %v907_v39 = vld [vmem:[%s1479_s1 + $0x40] sm:$0xff]  }
   0xb   :  { %v481_v46 = vmax.f32 %v417_v36, 0.0  ;;  %v420_v48 = vadd.f32 %v752_v27, %v228_v38  ;;  %v482_v50 = vmax.f32 %v418_v43, 0.0  ;;  %v159_v51 = vmul.f32 %v628_v44, %v962_v1 }
   0xc   :  { %543 = vst [vmem:[%s1482_s4] sm:$0xff] %v479_v41  ;;  %544 = vst [vmem:[%s1482_s4 + $0x8] sm:$0xff] %v480_v42  ;;  %v756_v52 = vunpack.c.h.bf16 %v902_v23  ;;  %v631_v53 = vunpack.c.l.bf16 %v872_v40  ;;  %v483_v56 = vmax.f32 %v419_v47, 0.0  ;;  %v421_v58 = vadd.f32 %v755_v35, %v229_v49  ;;  %v908_v49 = vld [vmem:[%s1479_s1 + $0x48] sm:$0xff]  }
   0xd   :  { %545 = vst [vmem:[%s1482_s4 + $0x10] sm:$0xff] %v481_v46  ;;  %v484_v57 = vmax.f32 %v420_v48, 0.0  ;;  %v759_v59 = vunpack.c.l.bf16 %v903_v45  ;;  %546 = vst [vmem:[%s1482_s4 + $0x18] sm:$0xff] %v482_v50  ;;  %v230_v60 = vadd.f32 %v976_v7, %v159_v51  ;;  %v632_v62 = vunpack.c.h.bf16 %v872_v40  ;;  %v877_v48 = vld [vmem:[%s1478_s0 + $0x48] sm:$0xff]  }
   0xe   :  { %v160_v61 = vmul.f32 %v631_v53, %v962_v1  ;;  %v760_v63 = vunpack.c.h.bf16 %v903_v45  ;;  %547 = vst [vmem:[%s1482_s4 + $0x20] sm:$0xff] %v483_v56  ;;  %v485_v3 = vmax.f32 %v421_v58, 0.0  ;;  %v635_v4 = vunpack.c.l.bf16 %v873_v54  ;;  %v878_v58 = vld [vmem:[%s1478_s0 + $0x50] sm:$0xff]  }
   0xf   :  { %548 = vst [vmem:[%s1482_s4 + $0x28] sm:$0xff] %v484_v57  ;;  %v763_v5 = vunpack.c.l.bf16 %v904_v55  ;;  %v636_v6 = vunpack.c.h.bf16 %v873_v54  ;;  %v422_v8 = vadd.f32 %v756_v52, %v230_v60  ;;  %v161_v10 = vmul.f32 %v632_v62, %v962_v1 }
  0x10   :  { %v231_v9 = vadd.f32 %v976_v7, %v160_v61  ;;  %v764_v11 = vunpack.c.h.bf16 %v904_v55  ;;  %549 = vst [vmem:[%s1482_s4 + $0x30] sm:$0xff] %v485_v3  ;;  %v162_v12 = vmul.f32 %v635_v4, %v962_v1  ;;  %v639_v14 = vunpack.c.l.bf16 %v874_v0 }
  0x11   :  { %v163_v13 = vmul.f32 %v636_v6, %v962_v1  ;;  %v767_v15 = vunpack.c.l.bf16 %v905_v2  ;;  %v486_v17 = vmax.f32 %v422_v8, 0.0  ;;  %v232_v19 = vadd.f32 %v976_v7, %v161_v10  ;;  %v879_v10 = vld [vmem:[%s1478_s0 + $0x58] sm:$0xff]  }
  0x12   :  { %v423_v18 = vadd.f32 %v759_v59, %v231_v9  ;;  %v640_v20 = vunpack.c.h.bf16 %v874_v0  ;;  %v233_v22 = vadd.f32 %v976_v7, %v162_v12  ;;  %v164_v24 = vmul.f32 %v639_v14, %v962_v1 }
  0x13   :  { %v234_v23 = vadd.f32 %v976_v7, %v163_v13  ;;  %v768_v25 = vunpack.c.h.bf16 %v905_v2  ;;  %550 = vst [vmem:[%s1482_s4 + $0x38] sm:$0xff] %v486_v17  ;;  %v424_v27 = vadd.f32 %v760_v63, %v232_v19  ;;  %v643_v29 = vunpack.c.l.bf16 %v875_v16  ;;  %v909_v63 = vld [vmem:[%s1479_s1 + $0x50] sm:$0xff]   ;;  %v910_v19 = vld [vmem:[%s1479_s1 + $0x58] sm:$0xff]  }
  0x14   :  { %v487_v26 = vmax.f32 %v423_v18, 0.0  ;;  %v165_v28 = vmul.f32 %v640_v20, %v962_v1  ;;  %v425_v30 = vadd.f32 %v763_v5, %v233_v22  ;;  %v235_v32 = vadd.f32 %v976_v7, %v164_v24 }
  0x15   :  { %v426_v31 = vadd.f32 %v764_v11, %v234_v23  ;;  %v771_v33 = vunpack.c.l.bf16 %v906_v21  ;;  %v488_v35 = vmax.f32 %v424_v27, 0.0  ;;  %v166_v37 = vmul.f32 %v643_v29, %v962_v1 }
  0x16   :  { %551 = vst [vmem:[%s1482_s4 + $0x40] sm:$0xff] %v487_v26  ;;  %v236_v36 = vadd.f32 %v976_v7, %v165_v28  ;;  %v644_v38 = vunpack.c.h.bf16 %v875_v16  ;;  %v489_v40 = vmax.f32 %v425_v30, 0.0  ;;  %v427_v42 = vadd.f32 %v767_v15, %v235_v32  ;;  %v880_v28 = vld [vmem:[%s1478_s0 + $0x60] sm:$0xff]  }
  0x17   :  { %v490_v41 = vmax.f32 %v426_v31, 0.0  ;;  %v772_v43 = vunpack.c.h.bf16 %v906_v21  ;;  %552 = vst [vmem:[%s1482_s4 + $0x48] sm:$0xff] %v488_v35  ;;  %v237_v45 = vadd.f32 %v976_v7, %v166_v37  ;;  %v647_v47 = vunpack.c.l.bf16 %v876_v34 }
  0x18   :  { %v428_v44 = vadd.f32 %v768_v25, %v236_v36  ;;  %v167_v46 = vmul.f32 %v644_v38, %v962_v1  ;;  %553 = vst [vmem:[%s1482_s4 + $0x50] sm:$0xff] %v489_v40  ;;  %v491_v50 = vmax.f32 %v427_v42, 0.0  ;;  %v775_v51 = vunpack.c.l.bf16 %v907_v39  ;;  %v881_v42 = vld [vmem:[%s1478_s0 + $0x68] sm:$0xff]  }
  0x19   :  { %554 = vst [vmem:[%s1482_s4 + $0x58] sm:$0xff] %v490_v41  ;;  %v648_v52 = vunpack.c.h.bf16 %v876_v34  ;;  %v776_v53 = vunpack.c.h.bf16 %v907_v39  ;;  %v429_v55 = vadd.f32 %v771_v33, %v237_v45  ;;  %v168_v57 = vmul.f32 %v647_v47, %v962_v1  ;;  %v911_v33 = vld [vmem:[%s1479_s1 + $0x60] sm:$0xff]  }
  0x1a   :  { %v492_v54 = vmax.f32 %v428_v44, 0.0  ;;  %v238_v56 = vadd.f32 %v976_v7, %v167_v46  ;;  %555 = vst [vmem:[%s1482_s4 + $0x60] sm:$0xff] %v491_v50  ;;  %v651_v60 = vunpack.c.l.bf16 %v877_v48  ;;  %v779_v61 = vunpack.c.l.bf16 %v908_v49 }
  0x1b   :  { %v169_v59 = vmul.f32 %v648_v52, %v962_v1  ;;  %v652_v62 = vunpack.c.h.bf16 %v877_v48  ;;  %v493_v0 = vmax.f32 %v429_v55, 0.0  ;;  %v239_v3 = vadd.f32 %v976_v7, %v168_v57  ;;  %v882_v52 = vld [vmem:[%s1478_s0 + $0x70] sm:$0xff]  }
  0x1c   :  { %556 = vst [vmem:[%s1482_s4 + $0x68] sm:$0xff] %v492_v54  ;;  %v430_v2 = vadd.f32 %v772_v43, %v238_v56  ;;  %v780_v4 = vunpack.c.h.bf16 %v908_v49  ;;  %v170_v6 = vmul.f32 %v651_v60, %v962_v1  ;;  %v655_v9 = vunpack.c.l.bf16 %v878_v58  ;;  %v912_v43 = vld [vmem:[%s1479_s1 + $0x68] sm:$0xff]   ;;  %v913_v57 = vld [vmem:[%s1479_s1 + $0x70] sm:$0xff]  }
  0x1d   :  { %v240_v5 = vadd.f32 %v976_v7, %v169_v59  ;;  %v171_v8 = vmul.f32 %v652_v62, %v962_v1  ;;  %557 = vst [vmem:[%s1482_s4 + $0x70] sm:$0xff] %v493_v0  ;;  %v431_v12 = vadd.f32 %v775_v51, %v239_v3  ;;  %v783_v13 = vunpack.c.l.bf16 %v909_v63  ;;  %v883_v3 = vld [vmem:[%s1478_s0 + $0x78] sm:$0xff]  }
  0x1e   :  { %v494_v11 = vmax.f32 %v430_v2, 0.0  ;;  %v656_v14 = vunpack.c.h.bf16 %v878_v58  ;;  %v241_v16 = vadd.f32 %v976_v7, %v170_v6  ;;  %v172_v18 = vmul.f32 %v655_v9, %v962_v1 }
  0x1f   :  { %v432_v15 = vadd.f32 %v776_v53, %v240_v5  ;;  %v242_v17 = vadd.f32 %v976_v7, %v171_v8  ;;  %v495_v20 = vmax.f32 %v431_v12, 0.0  ;;  %v784_v22 = vunpack.c.h.bf16 %v909_v63 }
  0x20   :  { %558 = vst [vmem:[%s1482_s4 + $0x78] sm:$0xff] %v494_v11  ;;  %v173_v21 = vmul.f32 %v656_v14, %v962_v1  ;;  %v659_v23 = vunpack.c.l.bf16 %v879_v10  ;;  %v433_v25 = vadd.f32 %v779_v61, %v241_v16  ;;  %v243_v27 = vadd.f32 %v976_v7, %v172_v18 }
  0x21   :  { %v496_v24 = vmax.f32 %v432_v15, 0.0  ;;  %v434_v26 = vadd.f32 %v780_v4, %v242_v17  ;;  %559 = vst [vmem:[%s1482_s4 + $0x80] sm:$0xff] %v495_v20  ;;  %v787_v31 = vunpack.c.l.bf16 %v910_v19  ;;  %v660_v32 = vunpack.c.h.bf16 %v879_v10 }
  0x22   :  { %v244_v29 = vadd.f32 %v976_v7, %v173_v21  ;;  %v174_v30 = vmul.f32 %v659_v23, %v962_v1  ;;  %v497_v34 = vmax.f32 %v433_v25, 0.0  ;;  %v435_v36 = vadd.f32 %v783_v13, %v243_v27  ;;  %v914_v13 = vld [vmem:[%s1479_s1 + $0x78] sm:$0xff]   ;;  %v915_v27 = vld [vmem:[%s1479_s1 + $0x80] sm:$0xff]  }
  0x23   :  { %560 = vst [vmem:[%s1482_s4 + $0x88] sm:$0xff] %v496_v24  ;;  %v498_v35 = vmax.f32 %v434_v26, 0.0  ;;  %v788_v37 = vunpack.c.h.bf16 %v910_v19  ;;  %v175_v40 = vmul.f32 %v660_v32, %v962_v1  ;;  %v663_v41 = vunpack.c.l.bf16 %v880_v28 }
  0x24   :  { %v436_v38 = vadd.f32 %v784_v22, %v244_v29  ;;  %v245_v39 = vadd.f32 %v976_v7, %v174_v30  ;;  %561 = vst [vmem:[%s1482_s4 + $0x90] sm:$0xff] %v497_v34  ;;  %v499_v44 = vmax.f32 %v435_v36, 0.0  ;;  %v791_v45 = vunpack.c.l.bf16 %v911_v33  ;;  %v884_v22 = vld [vmem:[%s1478_s0 + $0x80] sm:$0xff]   ;;  %v885_v36 = vld [vmem:[%s1478_s0 + $0x88] sm:$0xff]  }
  0x25   :  { %562 = vst [vmem:[%s1482_s4 + $0x98] sm:$0xff] %v498_v35  ;;  %v664_v46 = vunpack.c.h.bf16 %v880_v28  ;;  %v792_v47 = vunpack.c.h.bf16 %v911_v33  ;;  %v246_v50 = vadd.f32 %v976_v7, %v175_v40  ;;  %v176_v51 = vmul.f32 %v663_v41, %v962_v1 }
  0x26   :  { %v500_v48 = vmax.f32 %v436_v38, 0.0  ;;  %v437_v49 = vadd.f32 %v787_v31, %v245_v39  ;;  %563 = vst [vmem:[%s1482_s4 + $0xa0] sm:$0xff] %v499_v44  ;;  %v667_v54 = vunpack.c.l.bf16 %v881_v42  ;;  %v795_v55 = vunpack.c.l.bf16 %v912_v43 }
  0x27   :  { %v177_v53 = vmul.f32 %v664_v46, %v962_v1  ;;  %v668_v56 = vunpack.c.h.bf16 %v881_v42  ;;  %v438_v59 = vadd.f32 %v788_v37, %v246_v50  ;;  %v247_v60 = vadd.f32 %v976_v7, %v176_v51  ;;  %v916_v37 = vld [vmem:[%s1479_s1 + $0x88] sm:$0xff]   ;;  %v886_v46 = vld [vmem:[%s1478_s0 + $0x90] sm:$0xff]  }
  0x28   :  { %564 = vst [vmem:[%s1482_s4 + $0xa8] sm:$0xff] %v500_v48  ;;  %v501_v58 = vmax.f32 %v437_v49, 0.0  ;;  %v796_v61 = vunpack.c.h.bf16 %v912_v43  ;;  %v178_v63 = vmul.f32 %v667_v54, %v962_v1  ;;  %v671_v2 = vunpack.c.l.bf16 %v882_v52  ;;  %v917_v51 = vld [vmem:[%s1479_s1 + $0x90] sm:$0xff]  }
  0x29   :  { %v248_v62 = vadd.f32 %v976_v7, %v177_v53  ;;  %v179_v0 = vmul.f32 %v668_v56, %v962_v1  ;;  %v502_v4 = vmax.f32 %v438_v59, 0.0  ;;  %v439_v5 = vadd.f32 %v791_v45, %v247_v60  ;;  %v887_v60 = vld [vmem:[%s1478_s0 + $0x98] sm:$0xff]  }
  0x2a   :  { %565 = vst [vmem:[%s1482_s4 + $0xb0] sm:$0xff] %v501_v58  ;;  %v799_v6 = vunpack.c.l.bf16 %v913_v57  ;;  %v672_v8 = vunpack.c.h.bf16 %v882_v52  ;;  %v249_v10 = vadd.f32 %v976_v7, %v178_v63  ;;  %v180_v12 = vmul.f32 %v671_v2, %v962_v1 }
  0x2b   :  { %v440_v9 = vadd.f32 %v792_v47, %v248_v62  ;;  %v250_v11 = vadd.f32 %v976_v7, %v179_v0  ;;  %566 = vst [vmem:[%s1482_s4 + $0xb8] sm:$0xff] %v502_v4  ;;  %v503_v14 = vmax.f32 %v439_v5, 0.0  ;;  %v800_v16 = vunpack.c.h.bf16 %v913_v57 }
  0x2c   :  { %v181_v15 = vmul.f32 %v672_v8, %v962_v1  ;;  %v675_v17 = vunpack.c.l.bf16 %v883_v3  ;;  %v441_v19 = vadd.f32 %v795_v55, %v249_v10  ;;  %v251_v21 = vadd.f32 %v976_v7, %v180_v12 }
  0x2d   :  { %v504_v18 = vmax.f32 %v440_v9, 0.0  ;;  %v442_v20 = vadd.f32 %v796_v61, %v250_v11  ;;  %567 = vst [vmem:[%s1482_s4 + $0xc0] sm:$0xff] %v503_v14  ;;  %v803_v25 = vunpack.c.l.bf16 %v914_v13  ;;  %v676_v26 = vunpack.c.h.bf16 %v883_v3 }
  0x2e   :  { %v252_v23 = vadd.f32 %v976_v7, %v181_v15  ;;  %v182_v24 = vmul.f32 %v675_v17, %v962_v1  ;;  %v505_v28 = vmax.f32 %v441_v19, 0.0  ;;  %v443_v30 = vadd.f32 %v799_v6, %v251_v21  ;;  %v918_v6 = vld [vmem:[%s1479_s1 + $0x98] sm:$0xff]   ;;  %v919_v21 = vld [vmem:[%s1479_s1 + $0xa0] sm:$0xff]  }
  0x2f   :  { %568 = vst [vmem:[%s1482_s4 + $0xc8] sm:$0xff] %v504_v18  ;;  %v506_v29 = vmax.f32 %v442_v20, 0.0  ;;  %v804_v31 = vunpack.c.h.bf16 %v914_v13  ;;  %v183_v34 = vmul.f32 %v676_v26, %v962_v1  ;;  %v679_v35 = vunpack.c.l.bf16 %v884_v22 }
  0x30   :  { %v444_v32 = vadd.f32 %v800_v16, %v252_v23  ;;  %v253_v33 = vadd.f32 %v976_v7, %v182_v24  ;;  %569 = vst [vmem:[%s1482_s4 + $0xd0] sm:$0xff] %v505_v28  ;;  %v507_v38 = vmax.f32 %v443_v30, 0.0  ;;  %v807_v39 = vunpack.c.l.bf16 %v915_v27  ;;  %v888_v16 = vld [vmem:[%s1478_s0 + $0xa0] sm:$0xff]   ;;  %v889_v30 = vld [vmem:[%s1478_s0 + $0xa8] sm:$0xff]  }
  0x31   :  { %570 = vst [vmem:[%s1482_s4 + $0xd8] sm:$0xff] %v506_v29  ;;  %v680_v40 = vunpack.c.h.bf16 %v884_v22  ;;  %v808_v41 = vunpack.c.h.bf16 %v915_v27  ;;  %v254_v44 = vadd.f32 %v976_v7, %v183_v34  ;;  %v184_v45 = vmul.f32 %v679_v35, %v962_v1 }
  0x32   :  { %v508_v42 = vmax.f32 %v444_v32, 0.0  ;;  %v445_v43 = vadd.f32 %v803_v25, %v253_v33  ;;  %571 = vst [vmem:[%s1482_s4 + $0xe0] sm:$0xff] %v507_v38  ;;  %v683_v48 = vunpack.c.l.bf16 %v885_v36  ;;  %v811_v49 = vunpack.c.l.bf16 %v916_v37 }
  0x33   :  { %v185_v47 = vmul.f32 %v680_v40, %v962_v1  ;;  %v684_v50 = vunpack.c.h.bf16 %v885_v36  ;;  %v446_v53 = vadd.f32 %v804_v31, %v254_v44  ;;  %v255_v54 = vadd.f32 %v976_v7, %v184_v45  ;;  %v920_v31 = vld [vmem:[%s1479_s1 + $0xa8] sm:$0xff]   ;;  %v890_v40 = vld [vmem:[%s1478_s0 + $0xb0] sm:$0xff]  }
  0x34   :  { %572 = vst [vmem:[%s1482_s4 + $0xe8] sm:$0xff] %v508_v42  ;;  %v509_v52 = vmax.f32 %v445_v43, 0.0  ;;  %v812_v55 = vunpack.c.h.bf16 %v916_v37  ;;  %v186_v57 = vmul.f32 %v683_v48, %v962_v1  ;;  %v687_v59 = vunpack.c.l.bf16 %v886_v46  ;;  %v921_v45 = vld [vmem:[%s1479_s1 + $0xb0] sm:$0xff]  }
  0x35   :  { %v256_v56 = vadd.f32 %v976_v7, %v185_v47  ;;  %v187_v58 = vmul.f32 %v684_v50, %v962_v1  ;;  %v510_v61 = vmax.f32 %v446_v53, 0.0  ;;  %v447_v62 = vadd.f32 %v807_v39, %v255_v54  ;;  %v891_v54 = vld [vmem:[%s1478_s0 + $0xb8] sm:$0xff]  }
  0x36   :  { %573 = vst [vmem:[%s1482_s4 + $0xf0] sm:$0xff] %v509_v52  ;;  %v815_v63 = vunpack.c.l.bf16 %v917_v51  ;;  %v688_v0 = vunpack.c.h.bf16 %v886_v46  ;;  %v257_v3 = vadd.f32 %v976_v7, %v186_v57  ;;  %v188_v5 = vmul.f32 %v687_v59, %v962_v1 }
  0x37   :  { %v448_v2 = vadd.f32 %v808_v41, %v256_v56  ;;  %v258_v4 = vadd.f32 %v976_v7, %v187_v58  ;;  %574 = vst [vmem:[%s1482_s4 + $0xf8] sm:$0xff] %v510_v61  ;;  %v511_v8 = vmax.f32 %v447_v62, 0.0  ;;  %v816_v10 = vunpack.c.h.bf16 %v917_v51 }
  0x38   :  { %v189_v9 = vmul.f32 %v688_v0, %v962_v1  ;;  %v691_v11 = vunpack.c.l.bf16 %v887_v60  ;;  %v449_v13 = vadd.f32 %v811_v49, %v257_v3  ;;  %v259_v15 = vadd.f32 %v976_v7, %v188_v5 }
  0x39   :  { %v512_v12 = vmax.f32 %v448_v2, 0.0  ;;  %v450_v14 = vadd.f32 %v812_v55, %v258_v4  ;;  %575 = vst [vmem:[%s1482_s4 + $0x100] sm:$0xff] %v511_v8  ;;  %v819_v19 = vunpack.c.l.bf16 %v918_v6  ;;  %v692_v20 = vunpack.c.h.bf16 %v887_v60 }
  0x3a   :  { %v260_v17 = vadd.f32 %v976_v7, %v189_v9  ;;  %v190_v18 = vmul.f32 %v691_v11, %v962_v1  ;;  %v513_v22 = vmax.f32 %v449_v13, 0.0  ;;  %v451_v24 = vadd.f32 %v815_v63, %v259_v15  ;;  %v922_v63 = vld [vmem:[%s1479_s1 + $0xb8] sm:$0xff]   ;;  %v923_v15 = vld [vmem:[%s1479_s1 + $0xc0] sm:$0xff]  }
  0x3b   :  { %576 = vst [vmem:[%s1482_s4 + $0x108] sm:$0xff] %v512_v12  ;;  %v514_v23 = vmax.f32 %v450_v14, 0.0  ;;  %v820_v25 = vunpack.c.h.bf16 %v918_v6  ;;  %v191_v28 = vmul.f32 %v692_v20, %v962_v1  ;;  %v695_v29 = vunpack.c.l.bf16 %v888_v16 }
  0x3c   :  { %v452_v26 = vadd.f32 %v816_v10, %v260_v17  ;;  %v261_v27 = vadd.f32 %v976_v7, %v190_v18  ;;  %577 = vst [vmem:[%s1482_s4 + $0x110] sm:$0xff] %v513_v22  ;;  %v515_v32 = vmax.f32 %v451_v24, 0.0  ;;  %v823_v33 = vunpack.c.l.bf16 %v919_v21  ;;  %v892_v10 = vld [vmem:[%s1478_s0 + $0xc0] sm:$0xff]   ;;  %v893_v24 = vld [vmem:[%s1478_s0 + $0xc8] sm:$0xff]  }
  0x3d   :  { %578 = vst [vmem:[%s1482_s4 + $0x118] sm:$0xff] %v514_v23  ;;  %v696_v34 = vunpack.c.h.bf16 %v888_v16  ;;  %v824_v35 = vunpack.c.h.bf16 %v919_v21  ;;  %v262_v38 = vadd.f32 %v976_v7, %v191_v28  ;;  %v192_v39 = vmul.f32 %v695_v29, %v962_v1 }
  0x3e   :  { %v516_v36 = vmax.f32 %v452_v26, 0.0  ;;  %v453_v37 = vadd.f32 %v819_v19, %v261_v27  ;;  %579 = vst [vmem:[%s1482_s4 + $0x120] sm:$0xff] %v515_v32  ;;  %v699_v42 = vunpack.c.l.bf16 %v889_v30  ;;  %v827_v43 = vunpack.c.l.bf16 %v920_v31 }
  0x3f   :  { %v193_v41 = vmul.f32 %v696_v34, %v962_v1  ;;  %v700_v44 = vunpack.c.h.bf16 %v889_v30  ;;  %v454_v47 = vadd.f32 %v820_v25, %v262_v38  ;;  %v263_v48 = vadd.f32 %v976_v7, %v192_v39  ;;  %v924_v25 = vld [vmem:[%s1479_s1 + $0xc8] sm:$0xff]   ;;  %v894_v34 = vld [vmem:[%s1478_s0 + $0xd0] sm:$0xff]  }
  0x40   :  { %580 = vst [vmem:[%s1482_s4 + $0x128] sm:$0xff] %v516_v36  ;;  %v517_v46 = vmax.f32 %v453_v37, 0.0  ;;  %v828_v49 = vunpack.c.h.bf16 %v920_v31  ;;  %v194_v51 = vmul.f32 %v699_v42, %v962_v1  ;;  %v703_v53 = vunpack.c.l.bf16 %v890_v40  ;;  %v925_v39 = vld [vmem:[%s1479_s1 + $0xd0] sm:$0xff]  }
  0x41   :  { %v264_v50 = vadd.f32 %v976_v7, %v193_v41  ;;  %v195_v52 = vmul.f32 %v700_v44, %v962_v1  ;;  %v518_v55 = vmax.f32 %v454_v47, 0.0  ;;  %v455_v56 = vadd.f32 %v823_v33, %v263_v48  ;;  %v895_v48 = vld [vmem:[%s1478_s0 + $0xd8] sm:$0xff]  }
  0x42   :  { %581 = vst [vmem:[%s1482_s4 + $0x130] sm:$0xff] %v517_v46  ;;  %v831_v57 = vunpack.c.l.bf16 %v921_v45  ;;  %v704_v58 = vunpack.c.h.bf16 %v890_v40  ;;  %v265_v60 = vadd.f32 %v976_v7, %v194_v51  ;;  %v196_v62 = vmul.f32 %v703_v53, %v962_v1 }
  0x43   :  { %v456_v59 = vadd.f32 %v824_v35, %v264_v50  ;;  %v266_v61 = vadd.f32 %v976_v7, %v195_v52  ;;  %582 = vst [vmem:[%s1482_s4 + $0x138] sm:$0xff] %v518_v55  ;;  %v519_v0 = vmax.f32 %v455_v56, 0.0  ;;  %v832_v3 = vunpack.c.h.bf16 %v921_v45 }
  0x44   :  { %v197_v2 = vmul.f32 %v704_v58, %v962_v1  ;;  %v707_v4 = vunpack.c.l.bf16 %v891_v54  ;;  %v457_v6 = vadd.f32 %v827_v43, %v265_v60  ;;  %v267_v9 = vadd.f32 %v976_v7, %v196_v62 }
  0x45   :  { %v520_v5 = vmax.f32 %v456_v59, 0.0  ;;  %v458_v8 = vadd.f32 %v828_v49, %v266_v61  ;;  %583 = vst [vmem:[%s1482_s4 + $0x140] sm:$0xff] %v519_v0  ;;  %v835_v13 = vunpack.c.l.bf16 %v922_v63  ;;  %v708_v14 = vunpack.c.h.bf16 %v891_v54 }
  0x46   :  { %v268_v11 = vadd.f32 %v976_v7, %v197_v2  ;;  %v198_v12 = vmul.f32 %v707_v4, %v962_v1  ;;  %v521_v16 = vmax.f32 %v457_v6, 0.0  ;;  %v459_v18 = vadd.f32 %v831_v57, %v267_v9  ;;  %v926_v57 = vld [vmem:[%s1479_s1 + $0xd8] sm:$0xff]   ;;  %v927_v9 = vld [vmem:[%s1479_s1 + $0xe0] sm:$0xff]  }
  0x47   :  { %584 = vst [vmem:[%s1482_s4 + $0x148] sm:$0xff] %v520_v5  ;;  %v522_v17 = vmax.f32 %v458_v8, 0.0  ;;  %v836_v19 = vunpack.c.h.bf16 %v922_v63  ;;  %v199_v22 = vmul.f32 %v708_v14, %v962_v1  ;;  %v711_v23 = vunpack.c.l.bf16 %v892_v10 }
  0x48   :  { %v460_v20 = vadd.f32 %v832_v3, %v268_v11  ;;  %v269_v21 = vadd.f32 %v976_v7, %v198_v12  ;;  %585 = vst [vmem:[%s1482_s4 + $0x150] sm:$0xff] %v521_v16  ;;  %v523_v26 = vmax.f32 %v459_v18, 0.0  ;;  %v839_v27 = vunpack.c.l.bf16 %v923_v15  ;;  %v896_v3 = vld [vmem:[%s1478_s0 + $0xe0] sm:$0xff]   ;;  %v897_v18 = vld [vmem:[%s1478_s0 + $0xe8] sm:$0xff]  }
  0x49   :  { %586 = vst [vmem:[%s1482_s4 + $0x158] sm:$0xff] %v522_v17  ;;  %v712_v28 = vunpack.c.h.bf16 %v892_v10  ;;  %v840_v29 = vunpack.c.h.bf16 %v923_v15  ;;  %v270_v32 = vadd.f32 %v976_v7, %v199_v22  ;;  %v200_v33 = vmul.f32 %v711_v23, %v962_v1 }
  0x4a   :  { %v524_v30 = vmax.f32 %v460_v20, 0.0  ;;  %v461_v31 = vadd.f32 %v835_v13, %v269_v21  ;;  %587 = vst [vmem:[%s1482_s4 + $0x160] sm:$0xff] %v523_v26  ;;  %v715_v36 = vunpack.c.l.bf16 %v893_v24  ;;  %v843_v37 = vunpack.c.l.bf16 %v924_v25 }
  0x4b   :  { %v201_v35 = vmul.f32 %v712_v28, %v962_v1  ;;  %v716_v38 = vunpack.c.h.bf16 %v893_v24  ;;  %v462_v41 = vadd.f32 %v836_v19, %v270_v32  ;;  %v271_v42 = vadd.f32 %v976_v7, %v200_v33  ;;  %v928_v19 = vld [vmem:[%s1479_s1 + $0xe8] sm:$0xff]   ;;  %v898_v28 = vld [vmem:[%s1478_s0 + $0xf0] sm:$0xff]  }
  0x4c   :  { %588 = vst [vmem:[%s1482_s4 + $0x168] sm:$0xff] %v524_v30  ;;  %v525_v40 = vmax.f32 %v461_v31, 0.0  ;;  %v844_v43 = vunpack.c.h.bf16 %v924_v25  ;;  %v202_v45 = vmul.f32 %v715_v36, %v962_v1  ;;  %v719_v47 = vunpack.c.l.bf16 %v894_v34  ;;  %v929_v33 = vld [vmem:[%s1479_s1 + $0xf0] sm:$0xff]  }
  0x4d   :  { %v272_v44 = vadd.f32 %v976_v7, %v201_v35  ;;  %v203_v46 = vmul.f32 %v716_v38, %v962_v1  ;;  %v526_v49 = vmax.f32 %v462_v41, 0.0  ;;  %v463_v50 = vadd.f32 %v839_v27, %v271_v42  ;;  %v899_v42 = vld [vmem:[%s1478_s0 + $0xf8] sm:$0xff]  }
  0x4e   :  { %589 = vst [vmem:[%s1482_s4 + $0x170] sm:$0xff] %v525_v40  ;;  %v847_v51 = vunpack.c.l.bf16 %v925_v39  ;;  %v720_v52 = vunpack.c.h.bf16 %v894_v34  ;;  %v273_v54 = vadd.f32 %v976_v7, %v202_v45  ;;  %v204_v56 = vmul.f32 %v719_v47, %v962_v1 }
  0x4f   :  { %v464_v53 = vadd.f32 %v840_v29, %v272_v44  ;;  %v274_v55 = vadd.f32 %v976_v7, %v203_v46  ;;  %590 = vst [vmem:[%s1482_s4 + $0x178] sm:$0xff] %v526_v49  ;;  %v527_v58 = vmax.f32 %v463_v50, 0.0  ;;  %v848_v60 = vunpack.c.h.bf16 %v925_v39 }
  0x50   :  { %v205_v59 = vmul.f32 %v720_v52, %v962_v1  ;;  %v723_v61 = vunpack.c.l.bf16 %v895_v48  ;;  %v465_v63 = vadd.f32 %v843_v37, %v273_v54  ;;  %v275_v2 = vadd.f32 %v976_v7, %v204_v56 }
  0x51   :  { %v528_v62 = vmax.f32 %v464_v53, 0.0  ;;  %v466_v0 = vadd.f32 %v844_v43, %v274_v55  ;;  %591 = vst [vmem:[%s1482_s4 + $0x180] sm:$0xff] %v527_v58  ;;  %v851_v6 = vunpack.c.l.bf16 %v926_v57  ;;  %v724_v8 = vunpack.c.h.bf16 %v895_v48 }
  0x52   :  { %v276_v4 = vadd.f32 %v976_v7, %v205_v59  ;;  %v206_v5 = vmul.f32 %v723_v61, %v962_v1  ;;  %v529_v10 = vmax.f32 %v465_v63, 0.0  ;;  %v467_v12 = vadd.f32 %v847_v51, %v275_v2  ;;  %v930_v51 = vld [vmem:[%s1479_s1 + $0xf8] sm:$0xff]  }
  0x53   :  { %592 = vst [vmem:[%s1482_s4 + $0x188] sm:$0xff] %v528_v62  ;;  %v530_v11 = vmax.f32 %v466_v0, 0.0  ;;  %v852_v13 = vunpack.c.h.bf16 %v926_v57  ;;  %v207_v16 = vmul.f32 %v724_v8, %v962_v1  ;;  %v727_v17 = vunpack.c.l.bf16 %v896_v3 }
  0x54   :  { %v468_v14 = vadd.f32 %v848_v60, %v276_v4  ;;  %v277_v15 = vadd.f32 %v976_v7, %v206_v5  ;;  %593 = vst [vmem:[%s1482_s4 + $0x190] sm:$0xff] %v529_v10  ;;  %v531_v20 = vmax.f32 %v467_v12, 0.0  ;;  %v855_v21 = vunpack.c.l.bf16 %v927_v9 }
  0x55   :  { %594 = vst [vmem:[%s1482_s4 + $0x198] sm:$0xff] %v530_v11  ;;  %v728_v22 = vunpack.c.h.bf16 %v896_v3  ;;  %v856_v23 = vunpack.c.h.bf16 %v927_v9  ;;  %v278_v26 = vadd.f32 %v976_v7, %v207_v16  ;;  %v208_v27 = vmul.f32 %v727_v17, %v962_v1 }
  0x56   :  { %v532_v24 = vmax.f32 %v468_v14, 0.0  ;;  %v469_v25 = vadd.f32 %v851_v6, %v277_v15  ;;  %595 = vst [vmem:[%s1482_s4 + $0x1a0] sm:$0xff] %v531_v20  ;;  %v731_v30 = vunpack.c.l.bf16 %v897_v18  ;;  %v859_v31 = vunpack.c.l.bf16 %v928_v19 }
  0x57   :  { %v209_v29 = vmul.f32 %v728_v22, %v962_v1  ;;  %v732_v32 = vunpack.c.h.bf16 %v897_v18  ;;  %v470_v35 = vadd.f32 %v852_v13, %v278_v26  ;;  %v279_v36 = vadd.f32 %v976_v7, %v208_v27 }
  0x58   :  { %596 = vst [vmem:[%s1482_s4 + $0x1a8] sm:$0xff] %v532_v24  ;;  %v533_v34 = vmax.f32 %v469_v25, 0.0  ;;  %v860_v37 = vunpack.c.h.bf16 %v928_v19  ;;  %v210_v39 = vmul.f32 %v731_v30, %v962_v1  ;;  %v735_v41 = vunpack.c.l.bf16 %v898_v28 }
  0x59   :  { %v280_v38 = vadd.f32 %v976_v7, %v209_v29  ;;  %v211_v40 = vmul.f32 %v732_v32, %v962_v1  ;;  %v534_v43 = vmax.f32 %v470_v35, 0.0  ;;  %v471_v44 = vadd.f32 %v855_v21, %v279_v36 }
  0x5a   :  { %597 = vst [vmem:[%s1482_s4 + $0x1b0] sm:$0xff] %v533_v34  ;;  %v863_v45 = vunpack.c.l.bf16 %v929_v33  ;;  %v736_v46 = vunpack.c.h.bf16 %v898_v28  ;;  %v281_v48 = vadd.f32 %v976_v7, %v210_v39  ;;  %v212_v50 = vmul.f32 %v735_v41, %v962_v1 }
  0x5b   :  { %v472_v47 = vadd.f32 %v856_v23, %v280_v38  ;;  %v282_v49 = vadd.f32 %v976_v7, %v211_v40  ;;  %598 = vst [vmem:[%s1482_s4 + $0x1b8] sm:$0xff] %v534_v43  ;;  %v535_v52 = vmax.f32 %v471_v44, 0.0  ;;  %v864_v54 = vunpack.c.h.bf16 %v929_v33 }
  0x5c   :  { %v213_v53 = vmul.f32 %v736_v46, %v962_v1  ;;  %v739_v55 = vunpack.c.l.bf16 %v899_v42  ;;  %v473_v57 = vadd.f32 %v859_v31, %v281_v48  ;;  %v283_v59 = vadd.f32 %v976_v7, %v212_v50 }
  0x5d   :  { %v536_v56 = vmax.f32 %v472_v47, 0.0  ;;  %v474_v58 = vadd.f32 %v860_v37, %v282_v49  ;;  %599 = vst [vmem:[%s1482_s4 + $0x1c0] sm:$0xff] %v535_v52  ;;  %v867_v62 = vunpack.c.l.bf16 %v930_v51  ;;  %v740_v63 = vunpack.c.h.bf16 %v899_v42 }
  0x5e   :  { %v284_v60 = vadd.f32 %v976_v7, %v213_v53  ;;  %v214_v61 = vmul.f32 %v739_v55, %v962_v1  ;;  %v537_v0 = vmax.f32 %v473_v57, 0.0  ;;  %v475_v3 = vadd.f32 %v863_v45, %v283_v59 }
  0x5f   :  { %600 = vst [vmem:[%s1482_s4 + $0x1c8] sm:$0xff] %v536_v56  ;;  %v538_v2 = vmax.f32 %v474_v58, 0.0  ;;  %v215_v6 = vmul.f32 %v740_v63, %v962_v1  ;;  %v868_v8 = vunpack.c.h.bf16 %v930_v51 }
  0x60   :  { %v476_v4 = vadd.f32 %v864_v54, %v284_v60  ;;  %v285_v5 = vadd.f32 %v976_v7, %v214_v61  ;;  %601 = vst [vmem:[%s1482_s4 + $0x1d0] sm:$0xff] %v537_v0  ;;  %v539_v9 = vmax.f32 %v475_v3, 0.0 }
  0x61   :  { %602 = vst [vmem:[%s1482_s4 + $0x1d8] sm:$0xff] %v538_v2  ;;  %v286_v12 = vadd.f32 %v976_v7, %v215_v6 }
  0x62   :  { %v540_v10 = vmax.f32 %v476_v4, 0.0  ;;  %v477_v11 = vadd.f32 %v867_v62, %v285_v5  ;;  %603 = vst [vmem:[%s1482_s4 + $0x1e0] sm:$0xff] %v539_v9 }
  0x63   :  { %v478_v13 = vadd.f32 %v868_v8, %v286_v12 }
  0x64   :  { %604 = vst [vmem:[%s1482_s4 + $0x1e8] sm:$0xff] %v540_v10  ;;  %v541_v1 = vmax.f32 %v477_v11, 0.0 }
  0x65   :  { %v542_v14 = vmax.f32 %v478_v13, 0.0 }
  0x66   :  { %605 = vst [vmem:[%s1482_s4 + $0x1f0] sm:$0xff] %v541_v1 }
  0x67   :  { %606 = vst [vmem:[%s1482_s4 + $0x1f8] sm:$0xff] %v542_v14 }

// kernel: bottleneck_forward.4
= control target key start
LH: loop header
LB: loop body
LE: loop exit
PB: predicated region body
PF: predicated region fallthrough
CT: control target
= control target key end

     0   :  { %s2134_s1 = inlined_call_operand.vmem [shape: bf16[128,128], index: 1, kind: input, shape index: {}]   ;;  %s2135_s0 = inlined_call_operand.vmem [shape: bf16[512,128], index: 0, kind: input, shape index: {}]   ;;  %s2136_s2 = inlined_call_operand.vmem [shape: bf16[512,128], index: 2, kind: output, shape index: {0}]   ;;  %s2137_s3 = inlined_call_operand.vmem [shape: f32[1,1,128], index: 3, kind: output, shape index: {1}]   ;;  %s2138_s4 = inlined_call_operand.vmem [shape: f32[1,1,128], index: 4, kind: output, shape index: {2}]  }
   0x1   :  { %v1655_v0 = vld [vmem:[%s2134_s1] sm:$0xff]   ;;  %v1656_v1 = vld [vmem:[%s2134_s1 + $0x8] sm:$0xff]   ;;  %v1657_v2 = vld [vmem:[%s2134_s1 + $0x10] sm:$0xff]  }
   0x2   :  { %1559 = vmatprep.subr.bf16.mxu0 %v1655_v0  ;;  %1639 = vmatprep.subr.bf16.mxu1 %v1655_v0  ;;  %v1658_v3 = vld [vmem:[%s2134_s1 + $0x18] sm:$0xff]   ;;  %v1663_v4 = vld [vmem:[%s2135_s0] sm:$0xff]   ;;  %v1660_v6 = vld [vmem:[%s2134_s1 + $0x28] sm:$0xff]  }
   0x3   :  { %1560 = vmatpush3.bf16.msra.mxu0 %v1655_v0  ;;  %1647 = vmatpush3.bf16.msra.mxu1 %v1655_v0  ;;  %v1659_v5 = vld [vmem:[%s2134_s1 + $0x20] sm:$0xff]   ;;  %v1661_v7 = vld [vmem:[%s2134_s1 + $0x30] sm:$0xff]   ;;  %v1662_v8 = vld [vmem:[%s2134_s1 + $0x38] sm:$0xff]  }
   0x4   :  { %1561 = vmatprep.subr.bf16.mxu0 %v1656_v1  ;;  %1640 = vmatprep.subr.bf16.mxu1 %v1656_v1  ;;  %v1679_v9 = vld [vmem:[%s2135_s0 + $0x80] sm:$0xff]   ;;  %v1664_v10 = vld [vmem:[%s2135_s0 + $0x8] sm:$0xff]   ;;  %v1665_v11 = vld [vmem:[%s2135_s0 + $0x10] sm:$0xff]  }
   0x5   :  { %1575 = vmatprep.mubr.bf16.mxu0 %v1663_v4  ;;  %1607 = vmatprep.mubr.bf16.mxu1 %v1679_v9  ;;  %v1680_v12 = vld [vmem:[%s2135_s0 + $0x88] sm:$0xff]   ;;  %v1681_v13 = vld [vmem:[%s2135_s0 + $0x90] sm:$0xff]   ;;  %v1666_v14 = vld [vmem:[%s2135_s0 + $0x18] sm:$0xff]  }
   0x6   :  { %v1667_v15 = vld [vmem:[%s2135_s0 + $0x20] sm:$0xff]   ;;  %v1682_v16 = vld [vmem:[%s2135_s0 + $0x98] sm:$0xff]   ;;  %v1668_v18 = vld [vmem:[%s2135_s0 + $0x28] sm:$0xff]  }
   0x7   :  { %1562 = vmatpush3.bf16.msra.mxu0 %v1656_v1  ;;  %1648 = vmatpush3.bf16.msra.mxu1 %v1656_v1  ;;  %v1683_v17 = vld [vmem:[%s2135_s0 + $0xa0] sm:$0xff]   ;;  %v1684_v19 = vld [vmem:[%s2135_s0 + $0xa8] sm:$0xff]   ;;  %v1669_v20 = vld [vmem:[%s2135_s0 + $0x30] sm:$0xff]  }
   0x8   :  { %1563 = vmatprep.subr.bf16.mxu0 %v1657_v2  ;;  %1641 = vmatprep.subr.bf16.mxu1 %v1657_v2  ;;  %v1685_v21 = vld [vmem:[%s2135_s0 + $0xb0] sm:$0xff]   ;;  %v1670_v22 = vld [vmem:[%s2135_s0 + $0x38] sm:$0xff]   ;;  %v1671_v24 = vld [vmem:[%s2135_s0 + $0x40] sm:$0xff]  }
   0x9   :  { %v1686_v23 = vld [vmem:[%s2135_s0 + $0xb8] sm:$0xff]   ;;  %v1687_v25 = vld [vmem:[%s2135_s0 + $0xc0] sm:$0xff]   ;;  %v1672_v26 = vld [vmem:[%s2135_s0 + $0x48] sm:$0xff]  }
   0xa   :  { %v1688_v27 = vld [vmem:[%s2135_s0 + $0xc8] sm:$0xff]   ;;  %v1673_v28 = vld [vmem:[%s2135_s0 + $0x50] sm:$0xff]   ;;  %v1674_v30 = vld [vmem:[%s2135_s0 + $0x58] sm:$0xff]  }
   0xb   :  { %1564 = vmatpush3.bf16.msra.mxu0 %v1657_v2  ;;  %1649 = vmatpush3.bf16.msra.mxu1 %v1657_v2  ;;  %v1689_v29 = vld [vmem:[%s2135_s0 + $0xd0] sm:$0xff]   ;;  %v1690_v31 = vld [vmem:[%s2135_s0 + $0xd8] sm:$0xff]   ;;  %v1675_v32 = vld [vmem:[%s2135_s0 + $0x60] sm:$0xff]  }
   0xc   :  { %1565 = vmatprep.subr.bf16.mxu0 %v1658_v3  ;;  %1642 = vmatprep.subr.bf16.mxu1 %v1658_v3  ;;  %v1691_v33 = vld [vmem:[%s2135_s0 + $0xe0] sm:$0xff]   ;;  %v1676_v34 = vld [vmem:[%s2135_s0 + $0x68] sm:$0xff]   ;;  %v1677_v36 = vld [vmem:[%s2135_s0 + $0x70] sm:$0xff]  }
   0xd   :  { %v1692_v35 = vld [vmem:[%s2135_s0 + $0xe8] sm:$0xff]   ;;  %v1693_v37 = vld [vmem:[%s2135_s0 + $0xf0] sm:$0xff]   ;;  %v1678_v38 = vld [vmem:[%s2135_s0 + $0x78] sm:$0xff]  }
   0xe   :  { %v1694_v39 = vld [vmem:[%s2135_s0 + $0xf8] sm:$0xff]  }
   0xf   :  { %1566 = vmatpush3.bf16.msra.mxu0 %v1658_v3  ;;  %1650 = vmatpush3.bf16.msra.mxu1 %v1658_v3 }
  0x10   :  { %1567 = vmatprep.subr.bf16.mxu0 %v1659_v5  ;;  %1643 = vmatprep.subr.bf16.mxu1 %v1659_v5 }
  0x13   :  { %1568 = vmatpush3.bf16.msra.mxu0 %v1659_v5  ;;  %1651 = vmatpush3.bf16.msra.mxu1 %v1659_v5 }
  0x14   :  { %1569 = vmatprep.subr.bf16.mxu0 %v1660_v6  ;;  %1644 = vmatprep.subr.bf16.mxu1 %v1660_v6 }
  0x17   :  { %1570 = vmatpush3.bf16.msra.mxu0 %v1660_v6  ;;  %1652 = vmatpush3.bf16.msra.mxu1 %v1660_v6 }
  0x18   :  { %1571 = vmatprep.subr.bf16.mxu0 %v1661_v7  ;;  %1645 = vmatprep.subr.bf16.mxu1 %v1661_v7 }
  0x1b   :  { %1572 = vmatpush3.bf16.msra.mxu0 %v1661_v7  ;;  %1653 = vmatpush3.bf16.msra.mxu1 %v1661_v7 }
  0x1c   :  { %1573 = vmatprep.subr.bf16.mxu0 %v1662_v8  ;;  %1646 = vmatprep.subr.bf16.mxu1 %v1662_v8 }
  0x1f   :  { %1574 = vmatpush3.bf16.msra.mxu0 %v1662_v8  ;;  %1654 = vmatpush3.bf16.msra.mxu1 %v1662_v8 }
  0x22   :  { %1576 = vmatmul.mubr.bf16.vlgmr.msra.gmra.mrb[0].mxu0 %v1664_v10  ;;  %1608 = vmatmul.mubr.bf16.vlgmr.msra.gmra.mrb[0].mxu1 %v1680_v12 }
  0x23   :  { %1579 = vmatprep.mubr.bf16.mxu0 %v1665_v11  ;;  %1611 = vmatprep.mubr.bf16.mxu1 %v1681_v13 }
  0x2a   :  { %1580 = vmatmul.mubr.bf16.gmra.mrb[4].mxu0 %v1666_v14  ;;  %1612 = vmatmul.mubr.bf16.gmra.mrb[4].mxu1 %v1682_v16 }
  0x2b   :  { %1583 = vmatprep.mubr.bf16.mxu0 %v1667_v15  ;;  %1615 = vmatprep.mubr.bf16.mxu1 %v1683_v17 }
  0x32   :  { %1584 = vmatmul.mubr.bf16.gmra.mrb[8].mxu0 %v1668_v18  ;;  %1616 = vmatmul.mubr.bf16.gmra.mrb[8].mxu1 %v1684_v19 }
  0x33   :  { %1587 = vmatprep.mubr.bf16.mxu0 %v1669_v20  ;;  %1619 = vmatprep.mubr.bf16.mxu1 %v1685_v21 }
  0x3a   :  { %1588 = vmatmul.mubr.bf16.gmra.mrb[12].mxu0 %v1670_v22  ;;  %1620 = vmatmul.mubr.bf16.gmra.mrb[12].mxu1 %v1686_v23 }
  0x3b   :  { %1591 = vmatprep.mubr.bf16.mxu0 %v1671_v24  ;;  %1623 = vmatprep.mubr.bf16.mxu1 %v1687_v25 }
  0x42   :  { %1592 = vmatmul.mubr.bf16.gmra.mrb[16].mxu0 %v1672_v26  ;;  %1624 = vmatmul.mubr.bf16.gmra.mrb[16].mxu1 %v1688_v27 }
  0x43   :  { %1595 = vmatprep.mubr.bf16.mxu0 %v1673_v28  ;;  %1627 = vmatprep.mubr.bf16.mxu1 %v1689_v29 }
  0x4a   :  { %1596 = vmatmul.mubr.bf16.gmra.mrb[20].mxu0 %v1674_v30  ;;  %1628 = vmatmul.mubr.bf16.gmra.mrb[20].mxu1 %v1690_v31 }
  0x4b   :  { %1599 = vmatprep.mubr.bf16.mxu0 %v1675_v32  ;;  %1631 = vmatprep.mubr.bf16.mxu1 %v1691_v33 }
  0x52   :  { %1600 = vmatmul.mubr.bf16.gmra.mrb[24].mxu0 %v1676_v34  ;;  %1632 = vmatmul.mubr.bf16.gmra.mrb[24].mxu1 %v1692_v35 }
  0x53   :  { %1603 = vmatprep.mubr.bf16.mxu0 %v1677_v36  ;;  %1635 = vmatprep.mubr.bf16.mxu1 %v1693_v37 }
  0x5a   :  { %1604 = vmatmul.mubr.bf16.gmra.mrb[28].mxu0 %v1678_v38  ;;  %1636 = vmatmul.mubr.bf16.gmra.mrb[28].mxu1 %v1694_v39 }
  0xf5   :  { %v1577_v40 = vpop.f32.mrb[0].mxu0  ;;  %v1840_v41 = vpop.f32.mrb[0].mxu1 }
  0xf6   :  { %v369_v42 = vpop.f32.mrb[1].mxu0  ;;  %v1842_v43 = vpop.f32.mrb[1].mxu1  ;;  %v1016_v55 = vmul.f32 %v1577_v40, %v1577_v40 }
  0xf7   :  { %v1578_v44 = vpop.f32.mrb[2].mxu0  ;;  %v1844_v45 = vpop.f32.mrb[2].mxu1  ;;  %v1014_v46 = vmul.f32 %v369_v42, %v369_v42 }
  0xf8   :  { %v1336_v47 = vpack.c.bf16 %v1578_v44, %v1577_v40  ;;  %v372_v48 = vpop.f32.mrb[3].mxu0  ;;  %v1416_v49 = vpack.c.bf16 %v1844_v45, %v1840_v41  ;;  %v1848_v50 = vpop.f32.mrb[3].mxu1  ;;  %v1017_v58 = vmul.f32 %v1578_v44, %v1578_v44 }
  0xf9   :  { %v1331_v51 = vpack.c.bf16 %v372_v48, %v369_v42  ;;  %v944_v52 = vadd.f32 %v372_v48, %v369_v42  ;;  %v1015_v53 = vmul.f32 %v372_v48, %v372_v48  ;;  %v1411_v54 = vpack.c.bf16 %v1848_v50, %v1842_v43 }
  0xfa   :  { %1488 = vst [vmem:[%s2136_s2 + $0x8] sm:$0xff] %v1336_v47   ;;  %1504 = vst [vmem:[%s2136_s2 + $0x88] sm:$0xff] %v1416_v49  }
  0xfb   :  { %1332 = vst [vmem:[%s2136_s2] sm:$0xff] %v1331_v51   ;;  %v945_v56 = vadd.f32 %v1577_v40, %v944_v52  ;;  %v1078_v57 = vadd.f32 %v1015_v53, %v1014_v46  ;;  %1503 = vst [vmem:[%s2136_s2 + $0x80] sm:$0xff] %v1411_v54  }
  0xfd   :  { %v1079_v59 = vadd.f32 %v1078_v57, %v1016_v55  ;;  %v1581_v60 = vpop.f32.mrb[4].mxu0  ;;  %v946_v61 = vadd.f32 %v1578_v44, %v945_v56  ;;  %v1864_v62 = vpop.f32.mrb[4].mxu1 }
  0xfe   :  { %v385_v63 = vpop.f32.mrb[5].mxu0  ;;  %v1866_v0 = vpop.f32.mrb[5].mxu1  ;;  %v1020_v15 = vmul.f32 %v1581_v60, %v1581_v60 }
  0xff   :  { %v947_v1 = vadd.f32 %v946_v61, %v385_v63  ;;  %v1018_v2 = vmul.f32 %v385_v63, %v385_v63  ;;  %v1080_v3 = vadd.f32 %v1079_v59, %v1017_v58  ;;  %v1582_v4 = vpop.f32.mrb[6].mxu0  ;;  %v1868_v5 = vpop.f32.mrb[6].mxu1 }
 0x100   :  { %v1346_v6 = vpack.c.bf16 %v1582_v4, %v1581_v60  ;;  %v388_v7 = vpop.f32.mrb[7].mxu0  ;;  %v1426_v8 = vpack.c.bf16 %v1868_v5, %v1864_v62  ;;  %v1872_v9 = vpop.f32.mrb[7].mxu1  ;;  %v1021_v18 = vmul.f32 %v1582_v4, %v1582_v4 }
 0x101   :  { %v1081_v10 = vadd.f32 %v1080_v3, %v1018_v2  ;;  %v1341_v11 = vpack.c.bf16 %v388_v7, %v385_v63  ;;  %v948_v12 = vadd.f32 %v947_v1, %v388_v7  ;;  %v1019_v13 = vmul.f32 %v388_v7, %v388_v7 }
 0x102   :  { %1490 = vst [vmem:[%s2136_s2 + $0x18] sm:$0xff] %v1346_v6   ;;  %1506 = vst [vmem:[%s2136_s2 + $0x98] sm:$0xff] %v1426_v8   ;;  %v1421_v14 = vpack.c.bf16 %v1872_v9, %v1866_v0 }
 0x103   :  { %1489 = vst [vmem:[%s2136_s2 + $0x10] sm:$0xff] %v1341_v11   ;;  %v949_v16 = vadd.f32 %v1581_v60, %v948_v12  ;;  %v1082_v17 = vadd.f32 %v1081_v10, %v1019_v13 }
 0x104   :  { %1505 = vst [vmem:[%s2136_s2 + $0x90] sm:$0xff] %v1421_v14  }
 0x105   :  { %v1083_v19 = vadd.f32 %v1082_v17, %v1020_v15  ;;  %v1585_v20 = vpop.f32.mrb[8].mxu0  ;;  %v950_v21 = vadd.f32 %v1582_v4, %v949_v16  ;;  %v1888_v22 = vpop.f32.mrb[8].mxu1 }
 0x106   :  { %v401_v23 = vpop.f32.mrb[9].mxu0  ;;  %v1890_v24 = vpop.f32.mrb[9].mxu1  ;;  %v1024_v39 = vmul.f32 %v1585_v20, %v1585_v20 }
 0x107   :  { %v951_v25 = vadd.f32 %v950_v21, %v401_v23  ;;  %v1022_v26 = vmul.f32 %v401_v23, %v401_v23  ;;  %v1084_v27 = vadd.f32 %v1083_v19, %v1021_v18  ;;  %v1586_v28 = vpop.f32.mrb[10].mxu0  ;;  %v1892_v29 = vpop.f32.mrb[10].mxu1 }
 0x108   :  { %v1356_v30 = vpack.c.bf16 %v1586_v28, %v1585_v20  ;;  %v404_v31 = vpop.f32.mrb[11].mxu0  ;;  %v1436_v32 = vpack.c.bf16 %v1892_v29, %v1888_v22  ;;  %v1896_v33 = vpop.f32.mrb[11].mxu1  ;;  %v1025_v44 = vmul.f32 %v1586_v28, %v1586_v28 }
 0x109   :  { %v1085_v34 = vadd.f32 %v1084_v27, %v1022_v26  ;;  %v1351_v35 = vpack.c.bf16 %v404_v31, %v401_v23  ;;  %v952_v36 = vadd.f32 %v951_v25, %v404_v31  ;;  %v1023_v37 = vmul.f32 %v404_v31, %v404_v31 }
 0x10a   :  { %1492 = vst [vmem:[%s2136_s2 + $0x28] sm:$0xff] %v1356_v30   ;;  %1508 = vst [vmem:[%s2136_s2 + $0xa8] sm:$0xff] %v1436_v32   ;;  %v1431_v38 = vpack.c.bf16 %v1896_v33, %v1890_v24 }
 0x10b   :  { %1491 = vst [vmem:[%s2136_s2 + $0x20] sm:$0xff] %v1351_v35   ;;  %v953_v40 = vadd.f32 %v1585_v20, %v952_v36  ;;  %v1086_v42 = vadd.f32 %v1085_v34, %v1023_v37 }
 0x10c   :  { %1507 = vst [vmem:[%s2136_s2 + $0xa0] sm:$0xff] %v1431_v38  }
 0x10d   :  { %v1087_v46 = vadd.f32 %v1086_v42, %v1024_v39  ;;  %v1589_v47 = vpop.f32.mrb[12].mxu0  ;;  %v954_v48 = vadd.f32 %v1586_v28, %v953_v40  ;;  %v1912_v49 = vpop.f32.mrb[12].mxu1 }
 0x10e   :  { %v417_v51 = vpop.f32.mrb[13].mxu0  ;;  %v1914_v52 = vpop.f32.mrb[13].mxu1  ;;  %v1028_v6 = vmul.f32 %v1589_v47, %v1589_v47 }
 0x10f   :  { %v955_v53 = vadd.f32 %v954_v48, %v417_v51  ;;  %v1026_v54 = vmul.f32 %v417_v51, %v417_v51  ;;  %v1088_v55 = vadd.f32 %v1087_v46, %v1025_v44  ;;  %v1590_v56 = vpop.f32.mrb[14].mxu0  ;;  %v1916_v57 = vpop.f32.mrb[14].mxu1 }
 0x110   :  { %v1366_v58 = vpack.c.bf16 %v1590_v56, %v1589_v47  ;;  %v420_v59 = vpop.f32.mrb[15].mxu0  ;;  %v1446_v60 = vpack.c.bf16 %v1916_v57, %v1912_v49  ;;  %v1920_v61 = vpop.f32.mrb[15].mxu1  ;;  %v1029_v10 = vmul.f32 %v1590_v56, %v1590_v56 }
 0x111   :  { %v1089_v63 = vadd.f32 %v1088_v55, %v1026_v54  ;;  %v1361_v1 = vpack.c.bf16 %v420_v59, %v417_v51  ;;  %v956_v2 = vadd.f32 %v955_v53, %v420_v59  ;;  %v1027_v3 = vmul.f32 %v420_v59, %v420_v59 }
 0x112   :  { %1494 = vst [vmem:[%s2136_s2 + $0x38] sm:$0xff] %v1366_v58   ;;  %1510 = vst [vmem:[%s2136_s2 + $0xb8] sm:$0xff] %v1446_v60   ;;  %v1441_v4 = vpack.c.bf16 %v1920_v61, %v1914_v52 }
 0x113   :  { %1493 = vst [vmem:[%s2136_s2 + $0x30] sm:$0xff] %v1361_v1   ;;  %v957_v7 = vadd.f32 %v1589_v47, %v956_v2  ;;  %v1090_v8 = vadd.f32 %v1089_v63, %v1027_v3 }
 0x114   :  { %1509 = vst [vmem:[%s2136_s2 + $0xb0] sm:$0xff] %v1441_v4  }
 0x115   :  { %v1091_v11 = vadd.f32 %v1090_v8, %v1028_v6  ;;  %v1593_v12 = vpop.f32.mrb[16].mxu0  ;;  %v958_v13 = vadd.f32 %v1590_v56, %v957_v7  ;;  %v1936_v14 = vpop.f32.mrb[16].mxu1 }
 0x116   :  { %v433_v15 = vpop.f32.mrb[17].mxu0  ;;  %v1938_v16 = vpop.f32.mrb[17].mxu1  ;;  %v1032_v35 = vmul.f32 %v1593_v12, %v1593_v12 }
 0x117   :  { %v959_v17 = vadd.f32 %v958_v13, %v433_v15  ;;  %v1030_v18 = vmul.f32 %v433_v15, %v433_v15  ;;  %v1092_v19 = vadd.f32 %v1091_v11, %v1029_v10  ;;  %v1594_v20 = vpop.f32.mrb[18].mxu0  ;;  %v1940_v21 = vpop.f32.mrb[18].mxu1 }
 0x118   :  { %v1376_v23 = vpack.c.bf16 %v1594_v20, %v1593_v12  ;;  %v436_v25 = vpop.f32.mrb[19].mxu0  ;;  %v1456_v26 = vpack.c.bf16 %v1940_v21, %v1936_v14  ;;  %v1944_v27 = vpop.f32.mrb[19].mxu1  ;;  %v1033_v38 = vmul.f32 %v1594_v20, %v1594_v20 }
 0x119   :  { %v1093_v28 = vadd.f32 %v1092_v19, %v1030_v18  ;;  %v1371_v30 = vpack.c.bf16 %v436_v25, %v433_v15  ;;  %v960_v31 = vadd.f32 %v959_v17, %v436_v25  ;;  %v1031_v32 = vmul.f32 %v436_v25, %v436_v25 }
 0x11a   :  { %1496 = vst [vmem:[%s2136_s2 + $0x48] sm:$0xff] %v1376_v23   ;;  %1512 = vst [vmem:[%s2136_s2 + $0xc8] sm:$0xff] %v1456_v26   ;;  %v1451_v34 = vpack.c.bf16 %v1944_v27, %v1938_v16 }
 0x11b   :  { %1495 = vst [vmem:[%s2136_s2 + $0x40] sm:$0xff] %v1371_v30   ;;  %v961_v36 = vadd.f32 %v1593_v12, %v960_v31  ;;  %v1094_v37 = vadd.f32 %v1093_v28, %v1031_v32 }
 0x11c   :  { %1511 = vst [vmem:[%s2136_s2 + $0xc0] sm:$0xff] %v1451_v34  }
 0x11d   :  { %v1095_v39 = vadd.f32 %v1094_v37, %v1032_v35  ;;  %v1597_v40 = vpop.f32.mrb[20].mxu0  ;;  %v962_v42 = vadd.f32 %v1594_v20, %v961_v36  ;;  %v1960_v44 = vpop.f32.mrb[20].mxu1 }
 0x11e   :  { %v449_v46 = vpop.f32.mrb[21].mxu0  ;;  %v1962_v47 = vpop.f32.mrb[21].mxu1  ;;  %v1036_v6 = vmul.f32 %v1597_v40, %v1597_v40 }
 0x11f   :  { %v963_v48 = vadd.f32 %v962_v42, %v449_v46  ;;  %v1034_v51 = vmul.f32 %v449_v46, %v449_v46  ;;  %v1096_v53 = vadd.f32 %v1095_v39, %v1033_v38  ;;  %v1598_v54 = vpop.f32.mrb[22].mxu0  ;;  %v1964_v55 = vpop.f32.mrb[22].mxu1 }
 0x120   :  { %v1386_v56 = vpack.c.bf16 %v1598_v54, %v1597_v40  ;;  %v452_v58 = vpop.f32.mrb[23].mxu0  ;;  %v1466_v59 = vpack.c.bf16 %v1964_v55, %v1960_v44  ;;  %v1968_v60 = vpop.f32.mrb[23].mxu1  ;;  %v1037_v10 = vmul.f32 %v1598_v54, %v1598_v54 }
 0x121   :  { %v1097_v63 = vadd.f32 %v1096_v53, %v1034_v51  ;;  %v1381_v1 = vpack.c.bf16 %v452_v58, %v449_v46  ;;  %v964_v2 = vadd.f32 %v963_v48, %v452_v58  ;;  %v1035_v3 = vmul.f32 %v452_v58, %v452_v58 }
 0x122   :  { %1498 = vst [vmem:[%s2136_s2 + $0x58] sm:$0xff] %v1386_v56   ;;  %1514 = vst [vmem:[%s2136_s2 + $0xd8] sm:$0xff] %v1466_v59   ;;  %v1461_v4 = vpack.c.bf16 %v1968_v60, %v1962_v47 }
 0x123   :  { %1497 = vst [vmem:[%s2136_s2 + $0x50] sm:$0xff] %v1381_v1   ;;  %v965_v7 = vadd.f32 %v1597_v40, %v964_v2  ;;  %v1098_v8 = vadd.f32 %v1097_v63, %v1035_v3 }
 0x124   :  { %1513 = vst [vmem:[%s2136_s2 + $0xd0] sm:$0xff] %v1461_v4  }
 0x125   :  { %v1099_v11 = vadd.f32 %v1098_v8, %v1036_v6  ;;  %v1601_v12 = vpop.f32.mrb[24].mxu0  ;;  %v966_v13 = vadd.f32 %v1598_v54, %v965_v7  ;;  %v1984_v15 = vpop.f32.mrb[24].mxu1 }
 0x126   :  { %v465_v17 = vpop.f32.mrb[25].mxu0  ;;  %v1986_v18 = vpop.f32.mrb[25].mxu1  ;;  %v1040_v39 = vmul.f32 %v1601_v12, %v1601_v12 }
 0x127   :  { %v967_v19 = vadd.f32 %v966_v13, %v465_v17  ;;  %v1038_v20 = vmul.f32 %v465_v17, %v465_v17  ;;  %v1100_v23 = vadd.f32 %v1099_v11, %v1037_v10  ;;  %v1602_v25 = vpop.f32.mrb[26].mxu0  ;;  %v1988_v26 = vpop.f32.mrb[26].mxu1 }
 0x128   :  { %v1396_v28 = vpack.c.bf16 %v1602_v25, %v1601_v12  ;;  %v468_v30 = vpop.f32.mrb[27].mxu0  ;;  %v1476_v31 = vpack.c.bf16 %v1988_v26, %v1984_v15  ;;  %v1992_v32 = vpop.f32.mrb[27].mxu1  ;;  %v1041_v46 = vmul.f32 %v1602_v25, %v1602_v25 }
 0x129   :  { %v1101_v34 = vadd.f32 %v1100_v23, %v1038_v20  ;;  %v1391_v35 = vpack.c.bf16 %v468_v30, %v465_v17  ;;  %v968_v36 = vadd.f32 %v967_v19, %v468_v30  ;;  %v1039_v37 = vmul.f32 %v468_v30, %v468_v30 }
 0x12a   :  { %1500 = vst [vmem:[%s2136_s2 + $0x68] sm:$0xff] %v1396_v28   ;;  %1516 = vst [vmem:[%s2136_s2 + $0xe8] sm:$0xff] %v1476_v31   ;;  %v1471_v38 = vpack.c.bf16 %v1992_v32, %v1986_v18  ;;  %v1046_v31 = vmul.f32 %v1842_v43, %v1842_v43 }
 0x12b   :  { %1499 = vst [vmem:[%s2136_s2 + $0x60] sm:$0xff] %v1391_v35   ;;  %v969_v40 = vadd.f32 %v1601_v12, %v968_v36  ;;  %v1102_v42 = vadd.f32 %v1101_v34, %v1039_v37 }
 0x12c   :  { %1515 = vst [vmem:[%s2136_s2 + $0xe0] sm:$0xff] %v1471_v38   ;;  %v1047_v38 = vmul.f32 %v1848_v50, %v1848_v50 }
 0x12d   :  { %v1103_v48 = vadd.f32 %v1102_v42, %v1040_v39  ;;  %v1605_v51 = vpop.f32.mrb[28].mxu0  ;;  %v970_v53 = vadd.f32 %v1602_v25, %v969_v40  ;;  %v2008_v54 = vpop.f32.mrb[28].mxu1  ;;  %v1048_v39 = vmul.f32 %v1840_v41, %v1840_v41 }
 0x12e   :  { %v481_v56 = vpop.f32.mrb[29].mxu0  ;;  %v2010_v58 = vpop.f32.mrb[29].mxu1  ;;  %v1044_v19 = vmul.f32 %v1605_v51, %v1605_v51 }
 0x12f   :  { %v971_v59 = vadd.f32 %v970_v53, %v481_v56  ;;  %v1042_v63 = vmul.f32 %v481_v56, %v481_v56  ;;  %v1104_v1 = vadd.f32 %v1103_v48, %v1041_v46  ;;  %v1606_v2 = vpop.f32.mrb[30].mxu0  ;;  %v2012_v3 = vpop.f32.mrb[30].mxu1  ;;  %v1049_v46 = vmul.f32 %v1844_v45, %v1844_v45 }
 0x130   :  { %v1406_v4 = vpack.c.bf16 %v1606_v2, %v1605_v51  ;;  %v484_v6 = vpop.f32.mrb[31].mxu0  ;;  %v1486_v7 = vpack.c.bf16 %v2012_v3, %v2008_v54  ;;  %v2016_v8 = vpop.f32.mrb[31].mxu1  ;;  %v1045_v25 = vmul.f32 %v1606_v2, %v1606_v2 }
 0x131   :  { %v1105_v10 = vadd.f32 %v1104_v1, %v1042_v63  ;;  %v1401_v11 = vpack.c.bf16 %v484_v6, %v481_v56  ;;  %v972_v12 = vadd.f32 %v971_v59, %v484_v6  ;;  %v1043_v13 = vmul.f32 %v484_v6, %v484_v6 }
 0x132   :  { %1502 = vst [vmem:[%s2136_s2 + $0x78] sm:$0xff] %v1406_v4   ;;  %1518 = vst [vmem:[%s2136_s2 + $0xf8] sm:$0xff] %v1486_v7   ;;  %v1481_v17 = vpack.c.bf16 %v2016_v8, %v2010_v58  ;;  %v1051_v63 = vmul.f32 %v1872_v9, %v1872_v9 }
 0x133   :  { %1501 = vst [vmem:[%s2136_s2 + $0x70] sm:$0xff] %v1401_v11   ;;  %v973_v20 = vadd.f32 %v1605_v51, %v972_v12  ;;  %v1106_v23 = vadd.f32 %v1105_v10, %v1043_v13  ;;  %v1055_v12 = vmul.f32 %v1896_v33, %v1896_v33 }
 0x134   :  { %1517 = vst [vmem:[%s2136_s2 + $0xf0] sm:$0xff] %v1481_v17  }
 0x135   :  { %v1107_v28 = vadd.f32 %v1106_v23, %v1044_v19  ;;  %v974_v30 = vadd.f32 %v1606_v2, %v973_v20 }
 0x137   :  { %v975_v34 = vadd.f32 %v974_v30, %v1842_v43  ;;  %v1108_v35 = vadd.f32 %v1107_v28, %v1045_v25  ;;  %v1050_v43 = vmul.f32 %v1866_v0, %v1866_v0  ;;  %v1059_v30 = vmul.f32 %v1920_v61, %v1920_v61 }
 0x139   :  { %v1109_v36 = vadd.f32 %v1108_v35, %v1046_v31  ;;  %v976_v37 = vadd.f32 %v975_v34, %v1848_v50 }
 0x13b   :  { %v977_v40 = vadd.f32 %v1840_v41, %v976_v37  ;;  %v1110_v42 = vadd.f32 %v1109_v36, %v1047_v38  ;;  %v1052_v41 = vmul.f32 %v1864_v62, %v1864_v62 }
 0x13d   :  { %v1111_v48 = vadd.f32 %v1110_v42, %v1048_v39  ;;  %v978_v51 = vadd.f32 %v1844_v45, %v977_v40  ;;  %v1053_v45 = vmul.f32 %v1868_v5, %v1868_v5  ;;  %v1063_v40 = vmul.f32 %v1944_v27, %v1944_v27 }
 0x13f   :  { %v979_v53 = vadd.f32 %v978_v51, %v1866_v0  ;;  %v1112_v56 = vadd.f32 %v1111_v48, %v1049_v46  ;;  %v1054_v0 = vmul.f32 %v1890_v24, %v1890_v24 }
 0x141   :  { %v1113_v59 = vadd.f32 %v1112_v56, %v1050_v43  ;;  %v980_v50 = vadd.f32 %v979_v53, %v1872_v9 }
 0x143   :  { %v981_v1 = vadd.f32 %v1864_v62, %v980_v50  ;;  %v1114_v2 = vadd.f32 %v1113_v59, %v1051_v63  ;;  %v1056_v62 = vmul.f32 %v1888_v22, %v1888_v22  ;;  %v1067_v59 = vmul.f32 %v1968_v60, %v1968_v60 }
 0x145   :  { %v1115_v4 = vadd.f32 %v1114_v2, %v1052_v41  ;;  %v982_v6 = vadd.f32 %v1868_v5, %v981_v1  ;;  %v1057_v5 = vmul.f32 %v1892_v29, %v1892_v29 }
 0x147   :  { %v983_v7 = vadd.f32 %v982_v6, %v1890_v24  ;;  %v1116_v10 = vadd.f32 %v1115_v4, %v1053_v45  ;;  %v1058_v24 = vmul.f32 %v1914_v52, %v1914_v52  ;;  %v1071_v6 = vmul.f32 %v1992_v32, %v1992_v32 }
 0x149   :  { %v1117_v11 = vadd.f32 %v1116_v10, %v1054_v0  ;;  %v984_v9 = vadd.f32 %v983_v7, %v1896_v33 }
 0x14b   :  { %v985_v13 = vadd.f32 %v1888_v22, %v984_v9  ;;  %v1118_v17 = vadd.f32 %v1117_v11, %v1055_v12  ;;  %v1060_v22 = vmul.f32 %v1912_v49, %v1912_v49 }
 0x14d   :  { %v1119_v19 = vadd.f32 %v1118_v17, %v1056_v62  ;;  %v986_v20 = vadd.f32 %v1892_v29, %v985_v13  ;;  %v1061_v29 = vmul.f32 %v1916_v57, %v1916_v57  ;;  %v1075_v13 = vmul.f32 %v2016_v8, %v2016_v8 }
 0x14f   :  { %v987_v23 = vadd.f32 %v986_v20, %v1914_v52  ;;  %v1120_v25 = vadd.f32 %v1119_v19, %v1057_v5  ;;  %v1062_v52 = vmul.f32 %v1938_v16, %v1938_v16 }
 0x151   :  { %v1121_v28 = vadd.f32 %v1120_v25, %v1058_v24  ;;  %v988_v33 = vadd.f32 %v987_v23, %v1920_v61 }
 0x153   :  { %v989_v31 = vadd.f32 %v1912_v49, %v988_v33  ;;  %v1122_v34 = vadd.f32 %v1121_v28, %v1059_v30  ;;  %v1064_v49 = vmul.f32 %v1936_v14, %v1936_v14 }
 0x155   :  { %v1123_v35 = vadd.f32 %v1122_v34, %v1060_v22  ;;  %v990_v36 = vadd.f32 %v1916_v57, %v989_v31  ;;  %v1065_v57 = vmul.f32 %v1940_v21, %v1940_v21 }
 0x157   :  { %v991_v37 = vadd.f32 %v990_v36, %v1938_v16  ;;  %v1124_v38 = vadd.f32 %v1123_v35, %v1061_v29  ;;  %v1066_v16 = vmul.f32 %v1962_v47, %v1962_v47 }
 0x159   :  { %v1125_v39 = vadd.f32 %v1124_v38, %v1062_v52  ;;  %v992_v61 = vadd.f32 %v991_v37, %v1944_v27 }
 0x15b   :  { %v993_v42 = vadd.f32 %v1936_v14, %v992_v61  ;;  %v1126_v46 = vadd.f32 %v1125_v39, %v1063_v40  ;;  %v1068_v14 = vmul.f32 %v1960_v44, %v1960_v44 }
 0x15d   :  { %v1127_v48 = vadd.f32 %v1126_v46, %v1064_v49  ;;  %v994_v51 = vadd.f32 %v1940_v21, %v993_v42  ;;  %v1069_v21 = vmul.f32 %v1964_v55, %v1964_v55 }
 0x15f   :  { %v995_v43 = vadd.f32 %v994_v51, %v1962_v47  ;;  %v1128_v53 = vadd.f32 %v1127_v48, %v1065_v57  ;;  %v1070_v47 = vmul.f32 %v1986_v18, %v1986_v18 }
 0x161   :  { %v1129_v56 = vadd.f32 %v1128_v53, %v1066_v16  ;;  %v996_v27 = vadd.f32 %v995_v43, %v1968_v60 }
 0x163   :  { %v997_v50 = vadd.f32 %v1960_v44, %v996_v27  ;;  %v1130_v63 = vadd.f32 %v1129_v56, %v1067_v59  ;;  %v1072_v44 = vmul.f32 %v1984_v15, %v1984_v15 }
 0x165   :  { %v1131_v41 = vadd.f32 %v1130_v63, %v1068_v14  ;;  %v998_v1 = vadd.f32 %v1964_v55, %v997_v50  ;;  %v1073_v55 = vmul.f32 %v1988_v26, %v1988_v26 }
 0x167   :  { %v999_v2 = vadd.f32 %v998_v1, %v1986_v18  ;;  %v1132_v45 = vadd.f32 %v1131_v41, %v1069_v21  ;;  %v1074_v18 = vmul.f32 %v2010_v58, %v2010_v58 }
 0x169   :  { %v1133_v4 = vadd.f32 %v1132_v45, %v1070_v47  ;;  %v1000_v60 = vadd.f32 %v999_v2, %v1992_v32 }
 0x16b   :  { %v1001_v0 = vadd.f32 %v1984_v15, %v1000_v60  ;;  %v1134_v7 = vadd.f32 %v1133_v4, %v1071_v6  ;;  %v1076_v15 = vmul.f32 %v2008_v54, %v2008_v54 }
 0x16d   :  { %v1135_v10 = vadd.f32 %v1134_v7, %v1072_v44  ;;  %v1002_v11 = vadd.f32 %v1988_v26, %v1001_v0  ;;  %v1077_v26 = vmul.f32 %v2012_v3, %v2012_v3 }
 0x16f   :  { %v1003_v9 = vadd.f32 %v1002_v11, %v2010_v58  ;;  %v1136_v12 = vadd.f32 %v1135_v10, %v1073_v55 }
 0x171   :  { %v1137_v62 = vadd.f32 %v1136_v12, %v1074_v18  ;;  %v1004_v32 = vadd.f32 %v1003_v9, %v2016_v8 }
 0x173   :  { %v1005_v17 = vadd.f32 %v2008_v54, %v1004_v32  ;;  %v1138_v5 = vadd.f32 %v1137_v62, %v1075_v13 }
 0x175   :  { %v1006_v19 = vadd.f32 %v2012_v3, %v1005_v17  ;;  %v1139_v20 = vadd.f32 %v1138_v5, %v1076_v15 }
 0x177   :  { %v1007_v58 = vrot.slane %v1006_v19, 4  ;;  %v1140_v24 = vadd.f32 %v1139_v20, %v1077_v26 }
 0x179   :  { %v1008_v23 = vadd.f32 %v1007_v58, %v1006_v19  ;;  %v1141_v25 = vrot.slane %v1140_v24, 4 }
 0x17b   :  { %v1009_v28 = vrot.slane %v1008_v23, 2  ;;  %v1142_v33 = vadd.f32 %v1141_v25, %v1140_v24 }
 0x17d   :  { %v1010_v30 = vadd.f32 %v1009_v28, %v1008_v23  ;;  %v1143_v8 = vrot.slane %v1142_v33, 2 }
 0x17f   :  { %v1011_v22 = vrot.slane %v1010_v30, 1  ;;  %v1144_v31 = vadd.f32 %v1143_v8, %v1142_v33 }
 0x181   :  { %v1012_v34 = vadd.f32 %v1011_v22, %v1010_v30  ;;  %v1145_v29 = vrot.slane %v1144_v31, 1 }
 0x183   :  { %1013 = vst [vmem:[%s2137_s3] sm:$0x1] %v1012_v34  ;;  %v1146_v54 = vadd.f32 %v1145_v29, %v1144_v31 }
 0x185   :  { %1147 = vst [vmem:[%s2138_s4] sm:$0x1] %v1146_v54 }

// kernel: bottleneck_forward.6
= control target key start
LH: loop header
LB: loop body
LE: loop exit
PB: predicated region body
PF: predicated region fallthrough
CT: control target
= control target key end

     0   :  { %s2529_s3 = inlined_call_operand.vmem [shape: bf16[128,128], index: 3, kind: input, shape index: {}]   ;;  %s2530_s0 = inlined_call_operand.vmem [shape: bf16[512,128], index: 0, kind: input, shape index: {}]   ;;  %s2531_s1 = inlined_call_operand.vmem [shape: f32[1,128], index: 1, kind: input, shape index: {}]   ;;  %s2532_s2 = inlined_call_operand.vmem [shape: f32[1,128], index: 2, kind: input, shape index: {}]   ;;  %s2533_s4 = inlined_call_operand.vmem [shape: bf16[512,128], index: 4, kind: output, shape index: {0}]   ;;  %s2534_s5 = inlined_call_operand.vmem [shape: f32[1,1,128], index: 5, kind: output, shape index: {1}]   ;;  %s2535_s6 = inlined_call_operand.vmem [shape: f32[1,1,128], index: 6, kind: output, shape index: {2}]  }
   0x1   :  { %v1900_v0 = vld [vmem:[%s2529_s3] sm:$0xff]   ;;  %v1901_v1 = vld [vmem:[%s2529_s3 + $0x8] sm:$0xff]   ;;  %v1902_v2 = vld [vmem:[%s2529_s3 + $0x10] sm:$0xff]  }
   0x2   :  { %1804 = vmatprep.subr.bf16.mxu0 %v1900_v0  ;;  %1884 = vmatprep.subr.bf16.mxu1 %v1900_v0  ;;  %v1903_v3 = vld [vmem:[%s2529_s3 + $0x18] sm:$0xff]   ;;  %v1415_v4 = vld [vmem:[%s2530_s0] sm:$0xff]   ;;  %v1702_v8 = vld [vmem:[%s2530_s0 + $0x8] sm:$0xff]  }
   0x3   :  { %1805 = vmatpush3.bf16.msra.mxu0 %v1900_v0  ;;  %1892 = vmatpush3.bf16.msra.mxu1 %v1900_v0  ;;  %v1961_v5 = vld [vmem:[%s2531_s1] ss:$0 sm:$0xff]  ;;  %v1416_v6 = vunpack.c.l.bf16 %v1415_v4  ;;  %v1417_v7 = vunpack.c.h.bf16 %v1415_v4  ;;  %v1703_v9 = vld [vmem:[%s2530_s0 + $0x10] sm:$0xff]   ;;  %v1420_v14 = vunpack.c.l.bf16 %v1702_v8  ;;  %v1421_v15 = vunpack.c.h.bf16 %v1702_v8  ;;  %v1905_v22 = vld [vmem:[%s2529_s3 + $0x28] sm:$0xff]  }
   0x4   :  { %1806 = vmatprep.subr.bf16.mxu0 %v1901_v1  ;;  %1885 = vmatprep.subr.bf16.mxu1 %v1901_v1  ;;  %v1972_v10 = vld [vmem:[%s2532_s2] ss:$0 sm:$0xff]  ;;  %v1424_v16 = vunpack.c.l.bf16 %v1703_v9  ;;  %v1425_v19 = vunpack.c.h.bf16 %v1703_v9  ;;  %v1704_v26 = vld [vmem:[%s2530_s0 + $0x18] sm:$0xff]   ;;  %v1906_v31 = vld [vmem:[%s2529_s3 + $0x30] sm:$0xff]  }
   0x5   :  { %v156_v11 = vmul.f32 %v1416_v6, %v1961_v5  ;;  %v157_v12 = vmul.f32 %v1417_v7, %v1961_v5  ;;  %v1904_v13 = vld [vmem:[%s2529_s3 + $0x20] sm:$0xff]   ;;  %v158_v23 = vmul.f32 %v1420_v14, %v1961_v5  ;;  %v159_v24 = vmul.f32 %v1421_v15, %v1961_v5  ;;  %v1706_v38 = vld [vmem:[%s2530_s0 + $0x28] sm:$0xff]   ;;  %v1707_v41 = vld [vmem:[%s2530_s0 + $0x30] sm:$0xff]  }
   0x6   :  { %v160_v25 = vmul.f32 %v1424_v16, %v1961_v5  ;;  %v161_v28 = vmul.f32 %v1425_v19, %v1961_v5  ;;  %v1705_v29 = vld [vmem:[%s2530_s0 + $0x20] sm:$0xff]   ;;  %v1428_v30 = vunpack.c.l.bf16 %v1704_v26  ;;  %v1429_v35 = vunpack.c.h.bf16 %v1704_v26  ;;  %v1708_v42 = vld [vmem:[%s2530_s0 + $0x38] sm:$0xff]   ;;  %v1710_v63 = vld [vmem:[%s2530_s0 + $0x48] sm:$0xff]  }
   0x7   :  { %1807 = vmatpush3.bf16.msra.mxu0 %v1901_v1  ;;  %1893 = vmatpush3.bf16.msra.mxu1 %v1901_v1  ;;  %v227_v17 = vadd.f32 %v1972_v10, %v156_v11  ;;  %v228_v18 = vadd.f32 %v1972_v10, %v157_v12  ;;  %v229_v32 = vadd.f32 %v1972_v10, %v158_v23  ;;  %v1432_v37 = vunpack.c.l.bf16 %v1705_v29  ;;  %v1907_v43 = vld [vmem:[%s2529_s3 + $0x38] sm:$0xff]   ;;  %v1709_v48 = vld [vmem:[%s2530_s0 + $0x40] sm:$0xff]   ;;  %v1711_v4 = vld [vmem:[%s2530_s0 + $0x50] sm:$0xff]  }
   0x8   :  { %1808 = vmatprep.subr.bf16.mxu0 %v1902_v2  ;;  %1886 = vmatprep.subr.bf16.mxu1 %v1902_v2  ;;  %v230_v33 = vadd.f32 %v1972_v10, %v159_v24  ;;  %v231_v34 = vadd.f32 %v1972_v10, %v160_v25  ;;  %v232_v36 = vadd.f32 %v1972_v10, %v161_v28  ;;  %v1433_v40 = vunpack.c.h.bf16 %v1705_v29  ;;  %v1712_v23 = vld [vmem:[%s2530_s0 + $0x58] sm:$0xff]  }
   0x9   :  { %v291_v20 = vmax.f32 %v227_v17, 0.0  ;;  %v292_v21 = vmax.f32 %v228_v18, 0.0  ;;  %v162_v39 = vmul.f32 %v1428_v30, %v1961_v5  ;;  %v293_v44 = vmax.f32 %v229_v32, 0.0 }
   0xa   :  { %v294_v45 = vmax.f32 %v230_v33, 0.0  ;;  %v295_v46 = vmax.f32 %v231_v34, 0.0  ;;  %v163_v47 = vmul.f32 %v1429_v35, %v1961_v5  ;;  %v296_v49 = vmax.f32 %v232_v36, 0.0 }
   0xb   :  { %1809 = vmatpush3.bf16.msra.mxu0 %v1902_v2  ;;  %1894 = vmatpush3.bf16.msra.mxu1 %v1902_v2  ;;  %v355_v27 = vpack.c.bf16 %v292_v21, %v291_v20  ;;  %v164_v50 = vmul.f32 %v1432_v37, %v1961_v5  ;;  %v1436_v51 = vunpack.c.l.bf16 %v1706_v38  ;;  %v1437_v52 = vunpack.c.h.bf16 %v1706_v38 }
   0xc   :  { %1810 = vmatprep.subr.bf16.mxu0 %v1903_v3  ;;  %1887 = vmatprep.subr.bf16.mxu1 %v1903_v3  ;;  %v1440_v53 = vunpack.c.l.bf16 %v1707_v41  ;;  %v1441_v54 = vunpack.c.h.bf16 %v1707_v41  ;;  %v1444_v55 = vunpack.c.l.bf16 %v1708_v42  ;;  %v1445_v56 = vunpack.c.h.bf16 %v1708_v42 }
   0xd   :  { %1820 = vmatprep.mubr.bf16.mxu0 %v355_v27  ;;  %v165_v57 = vmul.f32 %v1433_v40, %v1961_v5  ;;  %v1448_v58 = vunpack.c.l.bf16 %v1709_v48  ;;  %v1449_v59 = vunpack.c.h.bf16 %v1709_v48  ;;  %v356_v60 = vpack.c.bf16 %v294_v45, %v293_v44  ;;  %v1717_v44 = vld [vmem:[%s2530_s0 + $0x80] sm:$0xff]  }
   0xe   :  { %v233_v61 = vadd.f32 %v1972_v10, %v162_v39  ;;  %v234_v62 = vadd.f32 %v1972_v10, %v163_v47  ;;  %v357_v0 = vpack.c.bf16 %v296_v49, %v295_v46  ;;  %v235_v1 = vadd.f32 %v1972_v10, %v164_v50 }
   0xf   :  { %1811 = vmatpush3.bf16.msra.mxu0 %v1903_v3  ;;  %1895 = vmatpush3.bf16.msra.mxu1 %v1903_v3  ;;  %v166_v2 = vmul.f32 %v1436_v51, %v1961_v5  ;;  %v167_v3 = vmul.f32 %v1437_v52, %v1961_v5  ;;  %v168_v6 = vmul.f32 %v1440_v53, %v1961_v5  ;;  %v1452_v14 = vunpack.c.l.bf16 %v1710_v63  ;;  %v2065_v52 = vld [vmem:[%s2530_s0 + $0x60] sm:$0xff]  }
  0x10   :  { %1812 = vmatprep.subr.bf16.mxu0 %v1904_v13  ;;  %1888 = vmatprep.subr.bf16.mxu1 %v1904_v13  ;;  %v169_v7 = vmul.f32 %v1441_v54, %v1961_v5  ;;  %v170_v8 = vmul.f32 %v1444_v55, %v1961_v5  ;;  %v171_v9 = vmul.f32 %v1445_v56, %v1961_v5  ;;  %v297_v15 = vmax.f32 %v233_v61, 0.0 }
  0x11   :  { %v236_v11 = vadd.f32 %v1972_v10, %v165_v57  ;;  %v172_v12 = vmul.f32 %v1448_v58, %v1961_v5  ;;  %v298_v16 = vmax.f32 %v234_v62, 0.0  ;;  %v1453_v17 = vunpack.c.h.bf16 %v1710_v63 }
  0x12   :  { %v1456_v18 = vunpack.c.l.bf16 %v1711_v4  ;;  %v299_v19 = vmax.f32 %v235_v1, 0.0  ;;  %v237_v20 = vadd.f32 %v1972_v10, %v166_v2  ;;  %v238_v21 = vadd.f32 %v1972_v10, %v167_v3 }
  0x13   :  { %1813 = vmatpush3.bf16.msra.mxu0 %v1904_v13  ;;  %1896 = vmatpush3.bf16.msra.mxu1 %v1904_v13  ;;  %v173_v13 = vmul.f32 %v1449_v59, %v1961_v5  ;;  %v239_v24 = vadd.f32 %v1972_v10, %v168_v6  ;;  %v240_v25 = vadd.f32 %v1972_v10, %v169_v7  ;;  %v300_v28 = vmax.f32 %v236_v11, 0.0  ;;  %v1718_v59 = vld [vmem:[%s2530_s0 + $0x88] sm:$0xff]   ;;  %v1720_v11 = vld [vmem:[%s2530_s0 + $0x98] sm:$0xff]  }
  0x14   :  { %1814 = vmatprep.subr.bf16.mxu0 %v1905_v22  ;;  %1889 = vmatprep.subr.bf16.mxu1 %v1905_v22  ;;  %v241_v26 = vadd.f32 %v1972_v10, %v170_v8  ;;  %v242_v27 = vadd.f32 %v1972_v10, %v171_v9  ;;  %v243_v29 = vadd.f32 %v1972_v10, %v172_v12  ;;  %v1460_v35 = vunpack.c.l.bf16 %v1712_v23 }
  0x15   :  { %v244_v30 = vadd.f32 %v1972_v10, %v173_v13  ;;  %v358_v32 = vpack.c.bf16 %v298_v16, %v297_v15  ;;  %v175_v33 = vmul.f32 %v1453_v17, %v1961_v5  ;;  %v176_v34 = vmul.f32 %v1456_v18, %v1961_v5 }
  0x16   :  { %v301_v36 = vmax.f32 %v237_v20, 0.0  ;;  %v302_v37 = vmax.f32 %v238_v21, 0.0  ;;  %v1461_v39 = vunpack.c.h.bf16 %v1712_v23  ;;  %v303_v40 = vmax.f32 %v239_v24, 0.0  ;;  %v1721_v24 = vld [vmem:[%s2530_s0 + $0xa0] sm:$0xff]  }
  0x17   :  { %1815 = vmatpush3.bf16.msra.mxu0 %v1905_v22  ;;  %1897 = vmatpush3.bf16.msra.mxu1 %v1905_v22  ;;  %v1457_v22 = vunpack.c.h.bf16 %v1711_v4  ;;  %v304_v41 = vmax.f32 %v240_v25, 0.0  ;;  %v305_v42 = vmax.f32 %v241_v26, 0.0  ;;  %v359_v45 = vpack.c.bf16 %v300_v28, %v299_v19 }
  0x18   :  { %1816 = vmatprep.subr.bf16.mxu0 %v1906_v31  ;;  %1890 = vmatprep.subr.bf16.mxu1 %v1906_v31  ;;  %v307_v46 = vmax.f32 %v243_v29, 0.0  ;;  %v308_v47 = vmax.f32 %v244_v30, 0.0  ;;  %v246_v49 = vadd.f32 %v1972_v10, %v175_v33  ;;  %v2059_v50 = vadd.f32 %v1972_v10, %v176_v34  ;;  %v1722_v33 = vld [vmem:[%s2530_s0 + $0xa8] sm:$0xff]  }
  0x19   :  { %v177_v38 = vmul.f32 %v1457_v22, %v1961_v5  ;;  %v178_v51 = vmul.f32 %v1460_v35, %v1961_v5  ;;  %v179_v54 = vmul.f32 %v1461_v39, %v1961_v5  ;;  %v1480_v55 = vunpack.c.l.bf16 %v1717_v44 }
  0x1a   :  { %v360_v56 = vpack.c.bf16 %v302_v37, %v301_v36  ;;  %v361_v57 = vpack.c.bf16 %v304_v41, %v303_v40  ;;  %v1464_v62 = vunpack.c.l.bf16 %v2065_v52  ;;  %v1481_v63 = vunpack.c.h.bf16 %v1717_v44 }
  0x1b   :  { %1817 = vmatpush3.bf16.msra.mxu0 %v1906_v31  ;;  %1898 = vmatpush3.bf16.msra.mxu1 %v1906_v31  ;;  %v174_v31 = vmul.f32 %v1452_v14, %v1961_v5  ;;  %v2068_v53 = vadd.f32 %v1972_v10, %v177_v38  ;;  %v310_v1 = vmax.f32 %v246_v49, 0.0  ;;  %v311_v2 = vmax.f32 %v2059_v50, 0.0 }
  0x1c   :  { %1818 = vmatprep.subr.bf16.mxu0 %v1907_v43  ;;  %1891 = vmatprep.subr.bf16.mxu1 %v1907_v43  ;;  %v2084_v3 = vadd.f32 %v1972_v10, %v178_v51  ;;  %v188_v4 = vmul.f32 %v1480_v55, %v1961_v5  ;;  %v2089_v7 = vadd.f32 %v1972_v10, %v179_v54  ;;  %v1484_v9 = vunpack.c.l.bf16 %v1718_v59 }
  0x1d   :  { %v245_v48 = vadd.f32 %v1972_v10, %v174_v31  ;;  %v312_v6 = vmax.f32 %v2068_v53, 0.0  ;;  %v189_v8 = vmul.f32 %v1481_v63, %v1961_v5  ;;  %v1465_v12 = vunpack.c.h.bf16 %v2065_v52 }
  0x1e   :  { %v259_v13 = vadd.f32 %v1972_v10, %v188_v4  ;;  %v1485_v14 = vunpack.c.h.bf16 %v1718_v59  ;;  %v2098_v16 = vmul.f32 %v1464_v62, %v1961_v5  ;;  %v190_v18 = vmul.f32 %v1484_v9, %v1961_v5 }
  0x1f   :  { %1819 = vmatpush3.bf16.msra.mxu0 %v1907_v43  ;;  %1899 = vmatpush3.bf16.msra.mxu1 %v1907_v43  ;;  %v306_v43 = vmax.f32 %v242_v27, 0.0  ;;  %v309_v61 = vmax.f32 %v245_v48, 0.0  ;;  %v260_v17 = vadd.f32 %v1972_v10, %v189_v8  ;;  %v1492_v23 = vunpack.c.l.bf16 %v1720_v11 }
  0x20   :  { %v323_v20 = vmax.f32 %v259_v13, 0.0  ;;  %v191_v21 = vmul.f32 %v1485_v14, %v1961_v5  ;;  %v261_v27 = vadd.f32 %v1972_v10, %v190_v18  ;;  %v1493_v31 = vunpack.c.h.bf16 %v1720_v11  ;;  %v1725_v18 = vld [vmem:[%s2530_s0 + $0xc0] sm:$0xff]  }
  0x21   :  { %v2071_v58 = vpack.c.bf16 %v306_v43, %v305_v42  ;;  %v2107_v25 = vpack.c.bf16 %v310_v1, %v309_v61  ;;  %v324_v26 = vmax.f32 %v260_v17, 0.0  ;;  %v1496_v37 = vunpack.c.l.bf16 %v1721_v24  ;;  %v1724_v1 = vld [vmem:[%s2530_s0 + $0xb8] sm:$0xff]  }
  0x22   :  { %1821 = vmatmul.mubr.bf16.vlgmr.msra.gmra.mrb[0].mxu0 %v356_v60  ;;  %v2076_v60 = vpack.c.bf16 %v308_v47, %v307_v46  ;;  %v262_v29 = vadd.f32 %v1972_v10, %v191_v21  ;;  %v325_v35 = vmax.f32 %v261_v27, 0.0  ;;  %v195_v40 = vmul.f32 %v1493_v31, %v1961_v5  ;;  %v1723_v46 = vld [vmem:[%s2530_s0 + $0xb0] sm:$0xff]   ;;  %v1714_v47 = vld [vmem:[%s2530_s0 + $0x68] sm:$0xff]  }
  0x23   :  { %1824 = vmatprep.mubr.bf16.mxu0 %v357_v0  ;;  %v1719_v0 = vld [vmem:[%s2530_s0 + $0x90] sm:$0xff]   ;;  %v371_v34 = vpack.c.bf16 %v324_v26, %v323_v20  ;;  %v1497_v43 = vunpack.c.h.bf16 %v1721_v24  ;;  %v196_v44 = vmul.f32 %v1496_v37, %v1961_v5  ;;  %v1501_v54 = vunpack.c.h.bf16 %v1722_v33 }
  0x24   :  { %v1488_v15 = vunpack.c.l.bf16 %v1719_v0  ;;  %v1489_v19 = vunpack.c.h.bf16 %v1719_v0  ;;  %v326_v38 = vmax.f32 %v262_v29, 0.0  ;;  %v266_v49 = vadd.f32 %v1972_v10, %v195_v40  ;;  %v1727_v40 = vld [vmem:[%s2530_s0 + $0xd0] sm:$0xff]  }
  0x25   :  { %1852 = vmatprep.mubr.bf16.mxu1 %v371_v34  ;;  %v199_v62 = vmul.f32 %v1501_v54, %v1961_v5  ;;  %v1504_v63 = vunpack.c.l.bf16 %v1723_v46  ;;  %v1505_v0 = vunpack.c.h.bf16 %v1723_v46  ;;  %v313_v4 = vmax.f32 %v2084_v3, 0.0 }
  0x26   :  { %v192_v22 = vmul.f32 %v1488_v15, %v1961_v5  ;;  %v193_v28 = vmul.f32 %v1489_v19, %v1961_v5  ;;  %v372_v48 = vpack.c.bf16 %v326_v38, %v325_v35  ;;  %v330_v61 = vmax.f32 %v266_v49, 0.0 }
  0x27   :  { %v1468_v8 = vunpack.c.l.bf16 %v1714_v47  ;;  %v314_v13 = vmax.f32 %v2089_v7, 0.0  ;;  %v1469_v14 = vunpack.c.h.bf16 %v1714_v47  ;;  %v200_v15 = vmul.f32 %v1504_v63, %v1961_v5 }
  0x28   :  { %v263_v30 = vadd.f32 %v1972_v10, %v192_v22  ;;  %v264_v36 = vadd.f32 %v1972_v10, %v193_v28  ;;  %1853 = vmatmul.mubr.bf16.vlgmr.msra.gmra.mrb[0].mxu1 %v372_v48  ;;  %v201_v17 = vmul.f32 %v1505_v0, %v1961_v5  ;;  %v181_v3 = vmul.f32 %v1465_v12, %v1961_v5 }
  0x29   :  { %v1508_v19 = vunpack.c.l.bf16 %v1724_v1  ;;  %v1509_v20 = vunpack.c.h.bf16 %v1724_v1  ;;  %v271_v24 = vadd.f32 %v1972_v10, %v200_v15  ;;  %v1512_v27 = vunpack.c.l.bf16 %v1725_v18  ;;  %v1728_v15 = vld [vmem:[%s2530_s0 + $0xd8] sm:$0xff]  }
  0x2a   :  { %1825 = vmatmul.mubr.bf16.gmra.mrb[4].mxu0 %v358_v32  ;;  %v194_v32 = vmul.f32 %v1492_v23, %v1961_v5  ;;  %v327_v39 = vmax.f32 %v263_v30, 0.0  ;;  %v328_v42 = vmax.f32 %v264_v36, 0.0  ;;  %v270_v23 = vadd.f32 %v1972_v10, %v199_v62 }
  0x2b   :  { %1828 = vmatprep.mubr.bf16.mxu0 %v359_v45  ;;  %v1500_v45 = vunpack.c.l.bf16 %v1722_v33  ;;  %v1513_v52 = vunpack.c.h.bf16 %v1725_v18  ;;  %v365_v12 = vpack.c.bf16 %v312_v6, %v311_v2  ;;  %v251_v28 = vadd.f32 %v1972_v10, %v2098_v16  ;;  %v1716_v33 = vld [vmem:[%s2530_s0 + $0x78] sm:$0xff]   ;;  %v1726_v16 = vld [vmem:[%s2530_s0 + $0xc8] sm:$0xff]  }
  0x2c   :  { %v265_v41 = vadd.f32 %v1972_v10, %v194_v32  ;;  %v373_v55 = vpack.c.bf16 %v328_v42, %v327_v39  ;;  %v252_v31 = vadd.f32 %v1972_v10, %v181_v3  ;;  %v182_v32 = vmul.f32 %v1468_v8, %v1961_v5 }
  0x2d   :  { %v198_v59 = vmul.f32 %v1500_v45, %v1961_v5  ;;  %v202_v34 = vmul.f32 %v1508_v19, %v1961_v5  ;;  %v203_v50 = vmul.f32 %v1509_v20, %v1961_v5  ;;  %v366_v35 = vpack.c.bf16 %v314_v13, %v313_v4 }
  0x2e   :  { %v329_v51 = vmax.f32 %v265_v41, 0.0  ;;  %1856 = vmatprep.mubr.bf16.mxu1 %v373_v55  ;;  %v183_v53 = vmul.f32 %v1469_v14, %v1961_v5  ;;  %v334_v6 = vmax.f32 %v270_v23, 0.0  ;;  %v335_v36 = vmax.f32 %v271_v24, 0.0 }
  0x2f   :  { %v269_v22 = vadd.f32 %v1972_v10, %v198_v59  ;;  %v204_v38 = vmul.f32 %v1512_v27, %v1961_v5  ;;  %v205_v39 = vmul.f32 %v1513_v52, %v1961_v5  ;;  %v315_v41 = vmax.f32 %v251_v28, 0.0 }
  0x30   :  { %v374_v21 = vpack.c.bf16 %v330_v61, %v329_v51  ;;  %v316_v45 = vmax.f32 %v252_v31, 0.0  ;;  %v273_v46 = vadd.f32 %v1972_v10, %v202_v34  ;;  %v274_v47 = vadd.f32 %v1972_v10, %v203_v50 }
  0x31   :  { %v333_v2 = vmax.f32 %v269_v22, 0.0  ;;  %v1516_v48 = vunpack.c.l.bf16 %v1726_v16  ;;  %v1517_v51 = vunpack.c.h.bf16 %v1726_v16  ;;  %v1520_v54 = vunpack.c.l.bf16 %v1727_v40 }
  0x32   :  { %1829 = vmatmul.mubr.bf16.gmra.mrb[8].mxu0 %v360_v56  ;;  %v197_v56 = vmul.f32 %v1497_v43, %v1961_v5  ;;  %1857 = vmatmul.mubr.bf16.gmra.mrb[4].mxu1 %v374_v21  ;;  %v1521_v55 = vunpack.c.h.bf16 %v1727_v40  ;;  %v276_v59 = vadd.f32 %v1972_v10, %v205_v39  ;;  %v254_v61 = vadd.f32 %v1972_v10, %v183_v53  ;;  %v1729_v21 = vld [vmem:[%s2530_s0 + $0xe0] sm:$0xff]  }
  0x33   :  { %1832 = vmatprep.mubr.bf16.mxu0 %v361_v57  ;;  %v267_v57 = vadd.f32 %v1972_v10, %v196_v44  ;;  %v1476_v44 = vunpack.c.l.bf16 %v1716_v33  ;;  %v376_v49 = vpack.c.bf16 %v334_v6, %v333_v2  ;;  %v1477_v0 = vunpack.c.h.bf16 %v1716_v33 }
  0x34   :  { %v268_v9 = vadd.f32 %v1972_v10, %v197_v56  ;;  %v253_v56 = vadd.f32 %v1972_v10, %v182_v32  ;;  %v367_v1 = vpack.c.bf16 %v316_v45, %v315_v41  ;;  %v337_v4 = vmax.f32 %v273_v46, 0.0  ;;  %v1731_v41 = vld [vmem:[%s2530_s0 + $0xf0] sm:$0xff]  }
  0x35   :  { %v331_v11 = vmax.f32 %v267_v57, 0.0  ;;  %v275_v57 = vadd.f32 %v1972_v10, %v204_v38  ;;  %v338_v8 = vmax.f32 %v274_v47, 0.0  ;;  %v208_v13 = vmul.f32 %v1520_v54, %v1961_v5 }
  0x36   :  { %v332_v7 = vmax.f32 %v268_v9, 0.0  ;;  %v206_v9 = vmul.f32 %v1516_v48, %v1961_v5  ;;  %v209_v14 = vmul.f32 %v1521_v55, %v1961_v5  ;;  %v340_v3 = vmax.f32 %v276_v59, 0.0 }
  0x37   :  { %v339_v18 = vmax.f32 %v275_v57, 0.0  ;;  %v187_v20 = vmul.f32 %v1477_v0, %v1961_v5  ;;  %v378_v23 = vpack.c.bf16 %v338_v8, %v337_v4  ;;  %v279_v27 = vadd.f32 %v1972_v10, %v208_v13 }
  0x38   :  { %v375_v26 = vpack.c.bf16 %v332_v7, %v331_v11  ;;  %v207_v11 = vmul.f32 %v1517_v51, %v1961_v5  ;;  %v318_v7 = vmax.f32 %v254_v61, 0.0  ;;  %v277_v24 = vadd.f32 %v1972_v10, %v206_v9 }
  0x39   :  { %v280_v52 = vadd.f32 %v1972_v10, %v209_v14  ;;  %v379_v28 = vpack.c.bf16 %v340_v3, %v339_v18  ;;  %v258_v33 = vadd.f32 %v1972_v10, %v187_v20  ;;  %v343_v2 = vmax.f32 %v279_v27, 0.0 }
  0x3a   :  { %1833 = vmatmul.mubr.bf16.gmra.mrb[12].mxu0 %v2071_v58  ;;  %v1715_v58 = vld [vmem:[%s2530_s0 + $0x70] sm:$0xff]   ;;  %1860 = vmatprep.mubr.bf16.mxu1 %v375_v26  ;;  %v1524_v26 = vunpack.c.l.bf16 %v1728_v15  ;;  %v341_v50 = vmax.f32 %v277_v24, 0.0  ;;  %v1536_v51 = vunpack.c.l.bf16 %v1731_v41  ;;  %v1537_v54 = vunpack.c.h.bf16 %v1731_v41 }
  0x3b   :  { %1836 = vmatprep.mubr.bf16.mxu0 %v2076_v60  ;;  %v272_v60 = vadd.f32 %v1972_v10, %v201_v17  ;;  %v1472_v29 = vunpack.c.l.bf16 %v1715_v58  ;;  %v1473_v30 = vunpack.c.h.bf16 %v1715_v58  ;;  %1861 = vmatmul.mubr.bf16.gmra.mrb[8].mxu1 %v376_v49  ;;  %v186_v17 = vmul.f32 %v1476_v44, %v1961_v5 }
  0x3c   :  { %v317_v58 = vmax.f32 %v253_v56, 0.0  ;;  %v344_v6 = vmax.f32 %v280_v52, 0.0  ;;  %v322_v40 = vmax.f32 %v258_v33, 0.0  ;;  %v217_v0 = vmul.f32 %v1537_v54, %v1961_v5 }
  0x3d   :  { %v336_v37 = vmax.f32 %v272_v60, 0.0  ;;  %v184_v42 = vmul.f32 %v1472_v29, %v1961_v5  ;;  %v185_v43 = vmul.f32 %v1473_v30, %v1961_v5  ;;  %v278_v60 = vadd.f32 %v1972_v10, %v207_v11 }
  0x3e   :  { %v1528_v29 = vunpack.c.l.bf16 %v1729_v21  ;;  %v1529_v30 = vunpack.c.h.bf16 %v1729_v21  ;;  %v368_v31 = vpack.c.bf16 %v318_v7, %v317_v58  ;;  %v257_v32 = vadd.f32 %v1972_v10, %v186_v17 }
  0x3f   :  { %v255_v62 = vadd.f32 %v1972_v10, %v184_v42  ;;  %v256_v63 = vadd.f32 %v1972_v10, %v185_v43  ;;  %v342_v53 = vmax.f32 %v278_v60, 0.0  ;;  %v381_v45 = vpack.c.bf16 %v344_v6, %v343_v2 }
  0x40   :  { %v213_v38 = vmul.f32 %v1529_v30, %v1961_v5  ;;  %v321_v39 = vmax.f32 %v257_v32, 0.0  ;;  %v288_v17 = vadd.f32 %v1972_v10, %v217_v0 }
  0x41   :  { %v319_v19 = vmax.f32 %v255_v62, 0.0  ;;  %v320_v22 = vmax.f32 %v256_v63, 0.0  ;;  %v380_v44 = vpack.c.bf16 %v342_v53, %v341_v50  ;;  %v216_v63 = vmul.f32 %v1536_v51, %v1961_v5 }
  0x42   :  { %1837 = vmatmul.mubr.bf16.gmra.mrb[16].mxu0 %v2107_v25  ;;  %v377_v25 = vpack.c.bf16 %v336_v37, %v335_v36  ;;  %v1730_v36 = vld [vmem:[%s2530_s0 + $0xe8] sm:$0xff]   ;;  %v212_v37 = vmul.f32 %v1528_v29, %v1961_v5  ;;  %v284_v49 = vadd.f32 %v1972_v10, %v213_v38  ;;  %v370_v55 = vpack.c.bf16 %v322_v40, %v321_v39 }
  0x43   :  { %1840 = vmatprep.mubr.bf16.mxu0 %v365_v12  ;;  %v1525_v12 = vunpack.c.h.bf16 %v1728_v15  ;;  %v369_v34 = vpack.c.bf16 %v320_v22, %v319_v19  ;;  %v1532_v43 = vunpack.c.l.bf16 %v1730_v36  ;;  %v1533_v47 = vunpack.c.h.bf16 %v1730_v36 }
  0x44   :  { %1864 = vmatprep.mubr.bf16.mxu1 %v377_v25  ;;  %v283_v48 = vadd.f32 %v1972_v10, %v212_v37  ;;  %v348_v62 = vmax.f32 %v284_v49, 0.0  ;;  %v287_v15 = vadd.f32 %v1972_v10, %v216_v63  ;;  %v352_v20 = vmax.f32 %v288_v17, 0.0 }
  0x45   :  { %1865 = vmatmul.mubr.bf16.gmra.mrb[12].mxu1 %v378_v23  ;;  %v211_v16 = vmul.f32 %v1525_v12, %v1961_v5  ;;  %v214_v56 = vmul.f32 %v1532_v43, %v1961_v5  ;;  %v215_v59 = vmul.f32 %v1533_v47, %v1961_v5 }
  0x46   :  { %1868 = vmatprep.mubr.bf16.mxu1 %v379_v28  ;;  %v347_v61 = vmax.f32 %v283_v48, 0.0  ;;  %v351_v19 = vmax.f32 %v287_v15, 0.0 }
  0x47   :  { %v282_v46 = vadd.f32 %v1972_v10, %v211_v16  ;;  %v285_v4 = vadd.f32 %v1972_v10, %v214_v56  ;;  %v286_v9 = vadd.f32 %v1972_v10, %v215_v59 }
  0x48   :  { %v383_v14 = vpack.c.bf16 %v348_v62, %v347_v61  ;;  %v385_v24 = vpack.c.bf16 %v352_v20, %v351_v19 }
  0x49   :  { %v346_v57 = vmax.f32 %v282_v46, 0.0  ;;  %v349_v18 = vmax.f32 %v285_v4, 0.0  ;;  %v350_v3 = vmax.f32 %v286_v9, 0.0 }
  0x4a   :  { %1841 = vmatmul.mubr.bf16.gmra.mrb[20].mxu0 %v366_v35  ;;  %v210_v35 = vmul.f32 %v1524_v26, %v1961_v5 }
  0x4b   :  { %1844 = vmatprep.mubr.bf16.mxu0 %v367_v1  ;;  %v1732_v1 = vld [vmem:[%s2530_s0 + $0xf8] sm:$0xff]   ;;  %v384_v21 = vpack.c.bf16 %v350_v3, %v349_v18 }
  0x4c   :  { %v281_v42 = vadd.f32 %v1972_v10, %v210_v35  ;;  %v1540_v11 = vunpack.c.l.bf16 %v1732_v1  ;;  %v1541_v13 = vunpack.c.h.bf16 %v1732_v1 }
  0x4d   :  { %1869 = vmatmul.mubr.bf16.gmra.mrb[16].mxu1 %v380_v44 }
  0x4e   :  { %v345_v25 = vmax.f32 %v281_v42, 0.0  ;;  %1872 = vmatprep.mubr.bf16.mxu1 %v381_v45  ;;  %v218_v58 = vmul.f32 %v1540_v11, %v1961_v5  ;;  %v219_v7 = vmul.f32 %v1541_v13, %v1961_v5 }
  0x50   :  { %v382_v8 = vpack.c.bf16 %v346_v57, %v345_v25  ;;  %v289_v22 = vadd.f32 %v1972_v10, %v218_v58  ;;  %v290_v23 = vadd.f32 %v1972_v10, %v219_v7 }
  0x52   :  { %1845 = vmatmul.mubr.bf16.gmra.mrb[24].mxu0 %v368_v31  ;;  %v353_v26 = vmax.f32 %v289_v22, 0.0  ;;  %v354_v60 = vmax.f32 %v290_v23, 0.0 }
  0x53   :  { %1848 = vmatprep.mubr.bf16.mxu0 %v369_v34 }
  0x54   :  { %v386_v27 = vpack.c.bf16 %v354_v60, %v353_v26 }
  0x55   :  { %1873 = vmatmul.mubr.bf16.gmra.mrb[20].mxu1 %v382_v8 }
  0x56   :  { %1876 = vmatprep.mubr.bf16.mxu1 %v383_v14 }
  0x5a   :  { %1849 = vmatmul.mubr.bf16.gmra.mrb[28].mxu0 %v370_v55 }
  0x5d   :  { %1877 = vmatmul.mubr.bf16.gmra.mrb[24].mxu1 %v384_v21 }
  0x5e   :  { %1880 = vmatprep.mubr.bf16.mxu1 %v385_v24 }
  0x65   :  { %1881 = vmatmul.mubr.bf16.gmra.mrb[28].mxu1 %v386_v27 }
  0xf5   :  { %v1822_v52 = vpop.f32.mrb[0].mxu0 }
  0xf6   :  { %v485_v12 = vpop.f32.mrb[1].mxu0  ;;  %v1132_v10 = vmul.f32 %v1822_v52, %v1822_v52 }
  0xf7   :  { %v1823_v28 = vpop.f32.mrb[2].mxu0  ;;  %v1130_v30 = vmul.f32 %v485_v12, %v485_v12 }
  0xf8   :  { %v1550_v29 = vpack.c.bf16 %v1823_v28, %v1822_v52  ;;  %v488_v5 = vpop.f32.mrb[3].mxu0  ;;  %v1133_v35 = vmul.f32 %v1823_v28, %v1823_v28 }
  0xf9   :  { %v1545_v31 = vpack.c.bf16 %v488_v5, %v485_v12  ;;  %v1060_v32 = vadd.f32 %v488_v5, %v485_v12  ;;  %v1131_v33 = vmul.f32 %v488_v5, %v488_v5 }
  0xfa   :  { %1733 = vst [vmem:[%s2533_s4 + $0x8] sm:$0xff] %v1550_v29  }
  0xfb   :  { %1546 = vst [vmem:[%s2533_s4] sm:$0xff] %v1545_v31   ;;  %v1061_v34 = vadd.f32 %v1822_v52, %v1060_v32  ;;  %v1194_v50 = vadd.f32 %v1131_v33, %v1130_v30  ;;  %v2253_v14 = vpop.f32.mrb[0].mxu1 }
  0xfc   :  { %v2255_v15 = vpop.f32.mrb[1].mxu1 }
  0xfd   :  { %v1195_v53 = vadd.f32 %v1194_v50, %v1132_v10  ;;  %v1826_v2 = vpop.f32.mrb[4].mxu0  ;;  %v1062_v6 = vadd.f32 %v1823_v28, %v1061_v34  ;;  %v2257_v7 = vpop.f32.mrb[2].mxu1 }
  0xfe   :  { %v501_v16 = vpop.f32.mrb[5].mxu0  ;;  %v1136_v46 = vmul.f32 %v1826_v2, %v1826_v2  ;;  %v1630_v20 = vpack.c.bf16 %v2257_v7, %v2253_v14  ;;  %v2261_v21 = vpop.f32.mrb[3].mxu1 }
  0xff   :  { %v1063_v36 = vadd.f32 %v1062_v6, %v501_v16  ;;  %v1134_v37 = vmul.f32 %v501_v16, %v501_v16  ;;  %v1196_v38 = vadd.f32 %v1195_v53, %v1133_v35  ;;  %v1827_v39 = vpop.f32.mrb[6].mxu0  ;;  %v1625_v60 = vpack.c.bf16 %v2261_v21, %v2255_v15 }
 0x100   :  { %v1560_v40 = vpack.c.bf16 %v1827_v39, %v1826_v2  ;;  %v504_v41 = vpop.f32.mrb[7].mxu0  ;;  %v1137_v49 = vmul.f32 %v1827_v39, %v1827_v39  ;;  %1749 = vst [vmem:[%s2533_s4 + $0x88] sm:$0xff] %v1630_v20  }
 0x101   :  { %v1197_v42 = vadd.f32 %v1196_v38, %v1134_v37  ;;  %v1555_v43 = vpack.c.bf16 %v504_v41, %v501_v16  ;;  %v1064_v44 = vadd.f32 %v1063_v36, %v504_v41  ;;  %v1135_v45 = vmul.f32 %v504_v41, %v504_v41  ;;  %1748 = vst [vmem:[%s2533_s4 + $0x80] sm:$0xff] %v1625_v60  }
 0x102   :  { %1735 = vst [vmem:[%s2533_s4 + $0x18] sm:$0xff] %v1560_v40  }
 0x103   :  { %1734 = vst [vmem:[%s2533_s4 + $0x10] sm:$0xff] %v1555_v43   ;;  %v1065_v47 = vadd.f32 %v1826_v2, %v1064_v44  ;;  %v1198_v48 = vadd.f32 %v1197_v42, %v1135_v45 }
 0x105   :  { %v1199_v51 = vadd.f32 %v1198_v48, %v1136_v46  ;;  %v1830_v54 = vpop.f32.mrb[8].mxu0  ;;  %v1066_v55 = vadd.f32 %v1827_v39, %v1065_v47  ;;  %v2277_v33 = vpop.f32.mrb[4].mxu1 }
 0x106   :  { %v517_v56 = vpop.f32.mrb[9].mxu0  ;;  %v1140_v9 = vmul.f32 %v1830_v54, %v1830_v54  ;;  %v2279_v10 = vpop.f32.mrb[5].mxu1 }
 0x107   :  { %v1067_v25 = vadd.f32 %v1066_v55, %v517_v56  ;;  %v1138_v57 = vmul.f32 %v517_v56, %v517_v56  ;;  %v1200_v59 = vadd.f32 %v1199_v51, %v1137_v49  ;;  %v1831_v61 = vpop.f32.mrb[10].mxu0  ;;  %v2281_v2 = vpop.f32.mrb[6].mxu1 }
 0x108   :  { %v1570_v62 = vpack.c.bf16 %v1831_v61, %v1830_v54  ;;  %v520_v63 = vpop.f32.mrb[11].mxu0  ;;  %v1141_v17 = vmul.f32 %v1831_v61, %v1831_v61  ;;  %v1640_v16 = vpack.c.bf16 %v2281_v2, %v2277_v33  ;;  %v2285_v36 = vpop.f32.mrb[7].mxu1 }
 0x109   :  { %v1201_v0 = vadd.f32 %v1200_v59, %v1138_v57  ;;  %v1565_v1 = vpack.c.bf16 %v520_v63, %v517_v56  ;;  %v1068_v4 = vadd.f32 %v1067_v25, %v520_v63  ;;  %v1139_v8 = vmul.f32 %v520_v63, %v520_v63 }
 0x10a   :  { %1737 = vst [vmem:[%s2533_s4 + $0x28] sm:$0xff] %v1570_v62   ;;  %v1635_v41 = vpack.c.bf16 %v2285_v36, %v2279_v10  ;;  %1751 = vst [vmem:[%s2533_s4 + $0x98] sm:$0xff] %v1640_v16  }
 0x10b   :  { %1736 = vst [vmem:[%s2533_s4 + $0x20] sm:$0xff] %v1565_v1   ;;  %v1069_v11 = vadd.f32 %v1830_v54, %v1068_v4  ;;  %v1202_v13 = vadd.f32 %v1201_v0, %v1139_v8 }
 0x10c   :  { %1750 = vst [vmem:[%s2533_s4 + $0x90] sm:$0xff] %v1635_v41  }
 0x10d   :  { %v1203_v18 = vadd.f32 %v1202_v13, %v1140_v9  ;;  %v1834_v3 = vpop.f32.mrb[12].mxu0  ;;  %v1070_v58 = vadd.f32 %v1831_v61, %v1069_v11 }
 0x10e   :  { %v533_v19 = vpop.f32.mrb[13].mxu0  ;;  %v1144_v30 = vmul.f32 %v1834_v3, %v1834_v3  ;;  %v2301_v54 = vpop.f32.mrb[8].mxu1 }
 0x10f   :  { %v1071_v22 = vadd.f32 %v1070_v58, %v533_v19  ;;  %v1142_v23 = vmul.f32 %v533_v19, %v533_v19  ;;  %v1204_v24 = vadd.f32 %v1203_v18, %v1141_v17  ;;  %v1835_v26 = vpop.f32.mrb[14].mxu0  ;;  %v2303_v55 = vpop.f32.mrb[9].mxu1 }
 0x110   :  { %v1580_v27 = vpack.c.bf16 %v1835_v26, %v1834_v3  ;;  %v536_v52 = vpop.f32.mrb[15].mxu0  ;;  %v1145_v34 = vmul.f32 %v1835_v26, %v1835_v26  ;;  %v2305_v61 = vpop.f32.mrb[10].mxu1 }
 0x111   :  { %v1205_v12 = vadd.f32 %v1204_v24, %v1142_v23  ;;  %v1575_v28 = vpack.c.bf16 %v536_v52, %v533_v19  ;;  %v1072_v29 = vadd.f32 %v1071_v22, %v536_v52  ;;  %v1143_v5 = vmul.f32 %v536_v52, %v536_v52  ;;  %v2309_v0 = vpop.f32.mrb[11].mxu1 }
 0x112   :  { %1739 = vst [vmem:[%s2533_s4 + $0x38] sm:$0xff] %v1580_v27   ;;  %v1650_v63 = vpack.c.bf16 %v2305_v61, %v2301_v54  ;;  %v1645_v11 = vpack.c.bf16 %v2309_v0, %v2303_v55 }
 0x113   :  { %1738 = vst [vmem:[%s2533_s4 + $0x30] sm:$0xff] %v1575_v28   ;;  %v1073_v31 = vadd.f32 %v1834_v3, %v1072_v29  ;;  %v1206_v32 = vadd.f32 %v1205_v12, %v1143_v5 }
 0x114   :  { %1753 = vst [vmem:[%s2533_s4 + $0xa8] sm:$0xff] %v1650_v63   ;;  %1752 = vst [vmem:[%s2533_s4 + $0xa0] sm:$0xff] %v1645_v11  }
 0x115   :  { %v1207_v50 = vadd.f32 %v1206_v32, %v1144_v30  ;;  %v1838_v35 = vpop.f32.mrb[16].mxu0  ;;  %v1074_v53 = vadd.f32 %v1835_v26, %v1073_v31 }
 0x116   :  { %v549_v6 = vpop.f32.mrb[17].mxu0  ;;  %v1148_v48 = vmul.f32 %v1838_v35, %v1838_v35 }
 0x117   :  { %v1075_v37 = vadd.f32 %v1074_v53, %v549_v6  ;;  %v1146_v38 = vmul.f32 %v549_v6, %v549_v6  ;;  %v1208_v39 = vadd.f32 %v1207_v50, %v1145_v34  ;;  %v1839_v40 = vpop.f32.mrb[18].mxu0 }
 0x118   :  { %v1590_v42 = vpack.c.bf16 %v1839_v40, %v1838_v35  ;;  %v552_v43 = vpop.f32.mrb[19].mxu0  ;;  %v1149_v56 = vmul.f32 %v1839_v40, %v1839_v40  ;;  %v2325_v24 = vpop.f32.mrb[12].mxu1 }
 0x119   :  { %v1209_v44 = vadd.f32 %v1208_v39, %v1146_v38  ;;  %v1585_v45 = vpack.c.bf16 %v552_v43, %v549_v6  ;;  %v1076_v46 = vadd.f32 %v1075_v37, %v552_v43  ;;  %v1147_v47 = vmul.f32 %v552_v43, %v552_v43  ;;  %v2327_v26 = vpop.f32.mrb[13].mxu1 }
 0x11a   :  { %1741 = vst [vmem:[%s2533_s4 + $0x48] sm:$0xff] %v1590_v42   ;;  %v2329_v28 = vpop.f32.mrb[14].mxu1 }
 0x11b   :  { %1740 = vst [vmem:[%s2533_s4 + $0x40] sm:$0xff] %v1585_v45   ;;  %v1077_v49 = vadd.f32 %v1838_v35, %v1076_v46  ;;  %v1210_v51 = vadd.f32 %v1209_v44, %v1147_v47  ;;  %v1660_v5 = vpack.c.bf16 %v2329_v28, %v2325_v24  ;;  %v2333_v30 = vpop.f32.mrb[15].mxu1 }
 0x11c   :  { %v1655_v35 = vpack.c.bf16 %v2333_v30, %v2327_v26 }
 0x11d   :  { %v1211_v25 = vadd.f32 %v1210_v51, %v1148_v48  ;;  %v1842_v57 = vpop.f32.mrb[20].mxu0  ;;  %v1078_v59 = vadd.f32 %v1839_v40, %v1077_v49  ;;  %1755 = vst [vmem:[%s2533_s4 + $0xb8] sm:$0xff] %v1660_v5  }
 0x11e   :  { %v565_v62 = vpop.f32.mrb[21].mxu0  ;;  %v1152_v20 = vmul.f32 %v1842_v57, %v1842_v57  ;;  %1754 = vst [vmem:[%s2533_s4 + $0xb0] sm:$0xff] %v1655_v35   ;;  %v1163_v35 = vmul.f32 %v2261_v21, %v2261_v21 }
 0x11f   :  { %v1079_v1 = vadd.f32 %v1078_v59, %v565_v62  ;;  %v1150_v4 = vmul.f32 %v565_v62, %v565_v62  ;;  %v1212_v8 = vadd.f32 %v1211_v25, %v1149_v56  ;;  %v1843_v9 = vpop.f32.mrb[22].mxu0 }
 0x120   :  { %v1600_v13 = vpack.c.bf16 %v1843_v9, %v1842_v57  ;;  %v568_v17 = vpop.f32.mrb[23].mxu0  ;;  %v1153_v60 = vmul.f32 %v1843_v9, %v1843_v9  ;;  %v2349_v43 = vpop.f32.mrb[16].mxu1 }
 0x121   :  { %v1213_v18 = vadd.f32 %v1212_v8, %v1150_v4  ;;  %v1595_v3 = vpack.c.bf16 %v568_v17, %v565_v62  ;;  %v1080_v58 = vadd.f32 %v1079_v1, %v568_v17  ;;  %v1151_v19 = vmul.f32 %v568_v17, %v568_v17  ;;  %v2351_v44 = vpop.f32.mrb[17].mxu1 }
 0x122   :  { %1743 = vst [vmem:[%s2533_s4 + $0x58] sm:$0xff] %v1600_v13   ;;  %v2353_v49 = vpop.f32.mrb[18].mxu1 }
 0x123   :  { %1742 = vst [vmem:[%s2533_s4 + $0x50] sm:$0xff] %v1595_v3   ;;  %v1081_v22 = vadd.f32 %v1842_v57, %v1080_v58  ;;  %v1214_v23 = vadd.f32 %v1213_v18, %v1151_v19  ;;  %v1670_v56 = vpack.c.bf16 %v2353_v49, %v2349_v43  ;;  %v2357_v25 = vpop.f32.mrb[19].mxu1 }
 0x124   :  { %v1665_v1 = vpack.c.bf16 %v2357_v25, %v2351_v44 }
 0x125   :  { %v1215_v27 = vadd.f32 %v1214_v23, %v1152_v20  ;;  %v1846_v52 = vpop.f32.mrb[24].mxu0  ;;  %v1082_v12 = vadd.f32 %v1843_v9, %v1081_v22  ;;  %1757 = vst [vmem:[%s2533_s4 + $0xc8] sm:$0xff] %v1670_v56  }
 0x126   :  { %v581_v29 = vpop.f32.mrb[25].mxu0  ;;  %v1156_v40 = vmul.f32 %v1846_v52, %v1846_v52  ;;  %1756 = vst [vmem:[%s2533_s4 + $0xc0] sm:$0xff] %v1665_v1  }
 0x127   :  { %v1083_v31 = vadd.f32 %v1082_v12, %v581_v29  ;;  %v1154_v32 = vmul.f32 %v581_v29, %v581_v29  ;;  %v1216_v34 = vadd.f32 %v1215_v27, %v1153_v60  ;;  %v1847_v50 = vpop.f32.mrb[26].mxu0  ;;  %v1162_v27 = vmul.f32 %v2255_v15, %v2255_v15 }
 0x128   :  { %v1610_v53 = vpack.c.bf16 %v1847_v50, %v1846_v52  ;;  %v584_v6 = vpop.f32.mrb[27].mxu0  ;;  %v1157_v45 = vmul.f32 %v1847_v50, %v1847_v50  ;;  %v2373_v19 = vpop.f32.mrb[20].mxu1 }
 0x129   :  { %v1217_v16 = vadd.f32 %v1216_v34, %v1154_v32  ;;  %v1605_v37 = vpack.c.bf16 %v584_v6, %v581_v29  ;;  %v1084_v38 = vadd.f32 %v1083_v31, %v584_v6  ;;  %v1155_v39 = vmul.f32 %v584_v6, %v584_v6  ;;  %v2375_v20 = vpop.f32.mrb[21].mxu1 }
 0x12a   :  { %1745 = vst [vmem:[%s2533_s4 + $0x68] sm:$0xff] %v1610_v53  }
 0x12b   :  { %1744 = vst [vmem:[%s2533_s4 + $0x60] sm:$0xff] %v1605_v37   ;;  %v1085_v41 = vadd.f32 %v1846_v52, %v1084_v38  ;;  %v1218_v42 = vadd.f32 %v1217_v16, %v1155_v39  ;;  %v2379_v52 = vpop.f32.mrb[22].mxu1  ;;  %v1165_v38 = vmul.f32 %v2257_v7, %v2257_v7 }
 0x12c   :  { %v1680_v12 = vpack.c.bf16 %v2379_v52, %v2373_v19  ;;  %v2383_v29 = vpop.f32.mrb[23].mxu1 }
 0x12d   :  { %v1219_v46 = vadd.f32 %v1218_v42, %v1156_v40  ;;  %v1850_v47 = vpop.f32.mrb[28].mxu0  ;;  %v1086_v48 = vadd.f32 %v1847_v50, %v1085_v41  ;;  %v1675_v32 = vpack.c.bf16 %v2383_v29, %v2375_v20  ;;  %v1166_v40 = vmul.f32 %v2279_v10, %v2279_v10 }
 0x12e   :  { %v597_v51 = vpop.f32.mrb[29].mxu0  ;;  %v1160_v18 = vmul.f32 %v1850_v47, %v1850_v47  ;;  %1759 = vst [vmem:[%s2533_s4 + $0xd8] sm:$0xff] %v1680_v12   ;;  %v1174_v12 = vmul.f32 %v2327_v26, %v2327_v26 }
 0x12f   :  { %v1087_v57 = vadd.f32 %v1086_v48, %v597_v51  ;;  %v1158_v59 = vmul.f32 %v597_v51, %v597_v51  ;;  %v1220_v62 = vadd.f32 %v1219_v46, %v1157_v45  ;;  %v1851_v63 = vpop.f32.mrb[30].mxu0  ;;  %1758 = vst [vmem:[%s2533_s4 + $0xd0] sm:$0xff] %v1675_v32  }
 0x130   :  { %v1620_v4 = vpack.c.bf16 %v1851_v63, %v1850_v47  ;;  %v600_v8 = vpop.f32.mrb[31].mxu0  ;;  %v1161_v22 = vmul.f32 %v1851_v63, %v1851_v63  ;;  %v2400_v16 = vpop.f32.mrb[24].mxu1 }
 0x131   :  { %v1221_v9 = vadd.f32 %v1220_v62, %v1158_v59  ;;  %v1615_v11 = vpack.c.bf16 %v600_v8, %v597_v51  ;;  %v1088_v13 = vadd.f32 %v1087_v57, %v600_v8  ;;  %v1159_v17 = vmul.f32 %v600_v8, %v600_v8  ;;  %v2402_v37 = vpop.f32.mrb[25].mxu1 }
 0x132   :  { %1747 = vst [vmem:[%s2533_s4 + $0x78] sm:$0xff] %v1620_v4   ;;  %v2409_v41 = vpop.f32.mrb[26].mxu1  ;;  %v1167_v51 = vmul.f32 %v2285_v36, %v2285_v36  ;;  %v1170_v4 = vmul.f32 %v2303_v55, %v2303_v55 }
 0x133   :  { %1746 = vst [vmem:[%s2533_s4 + $0x70] sm:$0xff] %v1615_v11   ;;  %v1089_v3 = vadd.f32 %v1850_v47, %v1088_v13  ;;  %v1222_v58 = vadd.f32 %v1221_v9, %v1159_v17  ;;  %v1690_v42 = vpack.c.bf16 %v2409_v41, %v2400_v16 }
 0x135   :  { %v1223_v23 = vadd.f32 %v1222_v58, %v1160_v18  ;;  %v1090_v60 = vadd.f32 %v1851_v63, %v1089_v3  ;;  %1761 = vst [vmem:[%s2533_s4 + $0xe8] sm:$0xff] %v1690_v42   ;;  %v1169_v63 = vmul.f32 %v2281_v2, %v2281_v2  ;;  %v1171_v3 = vmul.f32 %v2309_v0, %v2309_v0 }
 0x137   :  { %v1091_v5 = vadd.f32 %v1090_v60, %v2255_v15  ;;  %v1224_v31 = vadd.f32 %v1223_v23, %v1161_v22  ;;  %v1164_v15 = vmul.f32 %v2253_v14, %v2253_v14  ;;  %v1173_v23 = vmul.f32 %v2305_v61, %v2305_v61 }
 0x139   :  { %v1225_v34 = vadd.f32 %v1224_v31, %v1162_v27  ;;  %v1092_v50 = vadd.f32 %v1091_v5, %v2261_v21 }
 0x13b   :  { %v1093_v53 = vadd.f32 %v2253_v14, %v1092_v50  ;;  %v1226_v6 = vadd.f32 %v1225_v34, %v1163_v35  ;;  %v2413_v14 = vpop.f32.mrb[27].mxu1  ;;  %v1175_v34 = vmul.f32 %v2333_v30, %v2333_v30 }
 0x13c   :  { %v1685_v47 = vpack.c.bf16 %v2413_v14, %v2402_v37  ;;  %v2430_v59 = vpop.f32.mrb[28].mxu1 }
 0x13d   :  { %v1227_v39 = vadd.f32 %v1226_v6, %v1164_v15  ;;  %v1094_v21 = vadd.f32 %v2257_v7, %v1093_v53  ;;  %v2432_v62 = vpop.f32.mrb[29].mxu1 }
 0x13e   :  { %1760 = vst [vmem:[%s2533_s4 + $0xe0] sm:$0xff] %v1685_v47   ;;  %v2439_v8 = vpop.f32.mrb[30].mxu1 }
 0x13f   :  { %v1095_v45 = vadd.f32 %v1094_v21, %v2279_v10  ;;  %v1228_v46 = vadd.f32 %v1227_v39, %v1165_v38  ;;  %v1168_v10 = vmul.f32 %v2277_v33, %v2277_v33  ;;  %v1700_v9 = vpack.c.bf16 %v2439_v8, %v2430_v59 }
 0x140   :  { %v1179_v21 = vmul.f32 %v2357_v25, %v2357_v25 }
 0x141   :  { %v1229_v7 = vadd.f32 %v1228_v46, %v1166_v40  ;;  %v1096_v48 = vadd.f32 %v1095_v45, %v2285_v36  ;;  %1763 = vst [vmem:[%s2533_s4 + $0xf8] sm:$0xff] %v1700_v9   ;;  %v1187_v9 = vmul.f32 %v2413_v14, %v2413_v14 }
 0x143   :  { %v1097_v56 = vadd.f32 %v2277_v33, %v1096_v48  ;;  %v1230_v57 = vadd.f32 %v1229_v7, %v1167_v51  ;;  %v2443_v33 = vpop.f32.mrb[31].mxu1  ;;  %v1183_v51 = vmul.f32 %v2383_v29, %v2383_v29 }
 0x144   :  { %v1695_v17 = vpack.c.bf16 %v2443_v33, %v2432_v62 }
 0x145   :  { %v1231_v1 = vadd.f32 %v1230_v57, %v1168_v10  ;;  %v1098_v36 = vadd.f32 %v2281_v2, %v1097_v56 }
 0x146   :  { %1762 = vst [vmem:[%s2533_s4 + $0xf0] sm:$0xff] %v1695_v17  }
 0x147   :  { %v1099_v11 = vadd.f32 %v1098_v36, %v2303_v55  ;;  %v1232_v13 = vadd.f32 %v1231_v1, %v1169_v63  ;;  %v1172_v55 = vmul.f32 %v2301_v54, %v2301_v54 }
 0x149   :  { %v1233_v2 = vadd.f32 %v1232_v13, %v1170_v4  ;;  %v1100_v18 = vadd.f32 %v1099_v11, %v2309_v0 }
 0x14b   :  { %v1101_v58 = vadd.f32 %v2301_v54, %v1100_v18  ;;  %v1234_v22 = vadd.f32 %v1233_v2, %v1171_v3  ;;  %v1176_v54 = vmul.f32 %v2325_v24, %v2325_v24 }
 0x14d   :  { %v1235_v60 = vadd.f32 %v1234_v22, %v1172_v55  ;;  %v1102_v27 = vadd.f32 %v2305_v61, %v1101_v58  ;;  %v1177_v61 = vmul.f32 %v2329_v28, %v2329_v28  ;;  %v1191_v58 = vmul.f32 %v2443_v33, %v2443_v33 }
 0x14f   :  { %v1103_v0 = vadd.f32 %v1102_v27, %v2327_v26  ;;  %v1236_v5 = vadd.f32 %v1235_v60, %v1173_v23  ;;  %v1178_v26 = vmul.f32 %v2351_v44, %v2351_v44 }
 0x151   :  { %v1237_v31 = vadd.f32 %v1236_v5, %v1174_v12  ;;  %v1104_v32 = vadd.f32 %v1103_v0, %v2333_v30 }
 0x153   :  { %v1105_v50 = vadd.f32 %v2325_v24, %v1104_v32  ;;  %v1238_v35 = vadd.f32 %v1237_v31, %v1175_v34  ;;  %v1180_v24 = vmul.f32 %v2349_v43, %v2349_v43 }
 0x155   :  { %v1239_v15 = vadd.f32 %v1238_v35, %v1176_v54  ;;  %v1106_v53 = vadd.f32 %v2329_v28, %v1105_v50  ;;  %v1181_v28 = vmul.f32 %v2353_v49, %v2353_v49 }
 0x157   :  { %v1107_v6 = vadd.f32 %v1106_v53, %v2351_v44  ;;  %v1240_v38 = vadd.f32 %v1239_v15, %v1177_v61  ;;  %v1182_v44 = vmul.f32 %v2375_v20, %v2375_v20 }
 0x159   :  { %v1241_v39 = vadd.f32 %v1240_v38, %v1178_v26  ;;  %v1108_v30 = vadd.f32 %v1107_v6, %v2357_v25 }
 0x15b   :  { %v1109_v40 = vadd.f32 %v2349_v43, %v1108_v30  ;;  %v1242_v42 = vadd.f32 %v1241_v39, %v1179_v21  ;;  %v1184_v43 = vmul.f32 %v2373_v19, %v2373_v19 }
 0x15d   :  { %v1243_v45 = vadd.f32 %v1242_v42, %v1180_v24  ;;  %v1110_v46 = vadd.f32 %v2353_v49, %v1109_v40  ;;  %v1185_v49 = vmul.f32 %v2379_v52, %v2379_v52 }
 0x15f   :  { %v1111_v47 = vadd.f32 %v1110_v46, %v2375_v20  ;;  %v1244_v7 = vadd.f32 %v1243_v45, %v1181_v28  ;;  %v1186_v20 = vmul.f32 %v2402_v37, %v2402_v37 }
 0x161   :  { %v1245_v48 = vadd.f32 %v1244_v7, %v1182_v44  ;;  %v1112_v25 = vadd.f32 %v1111_v47, %v2383_v29 }
 0x163   :  { %v1113_v10 = vadd.f32 %v2373_v19, %v1112_v25  ;;  %v1246_v56 = vadd.f32 %v1245_v48, %v1183_v51  ;;  %v1188_v19 = vmul.f32 %v2400_v16, %v2400_v16 }
 0x165   :  { %v1247_v57 = vadd.f32 %v1246_v56, %v1184_v43  ;;  %v1114_v63 = vadd.f32 %v2379_v52, %v1113_v10  ;;  %v1189_v52 = vmul.f32 %v2409_v41, %v2409_v41 }
 0x167   :  { %v1115_v1 = vadd.f32 %v1114_v63, %v2402_v37  ;;  %v1248_v36 = vadd.f32 %v1247_v57, %v1185_v49  ;;  %v1190_v37 = vmul.f32 %v2432_v62, %v2432_v62 }
 0x169   :  { %v1249_v4 = vadd.f32 %v1248_v36, %v1186_v20  ;;  %v1116_v29 = vadd.f32 %v1115_v1, %v2413_v14 }
 0x16b   :  { %v1117_v11 = vadd.f32 %v2400_v16, %v1116_v29  ;;  %v1250_v13 = vadd.f32 %v1249_v4, %v1187_v9  ;;  %v1192_v16 = vmul.f32 %v2430_v59, %v2430_v59 }
 0x16d   :  { %v1251_v17 = vadd.f32 %v1250_v13, %v1188_v19  ;;  %v1118_v2 = vadd.f32 %v2409_v41, %v1117_v11  ;;  %v1193_v41 = vmul.f32 %v2439_v8, %v2439_v8 }
 0x16f   :  { %v1119_v18 = vadd.f32 %v1118_v2, %v2432_v62  ;;  %v1252_v3 = vadd.f32 %v1251_v17, %v1189_v52 }
 0x171   :  { %v1253_v55 = vadd.f32 %v1252_v3, %v1190_v37  ;;  %v1120_v14 = vadd.f32 %v1119_v18, %v2443_v33 }
 0x173   :  { %v1121_v22 = vadd.f32 %v2430_v59, %v1120_v14  ;;  %v1254_v23 = vadd.f32 %v1253_v55, %v1191_v58 }
 0x175   :  { %v1122_v60 = vadd.f32 %v2439_v8, %v1121_v22  ;;  %v1255_v27 = vadd.f32 %v1254_v23, %v1192_v16 }
 0x177   :  { %v1123_v62 = vrot.slane %v1122_v60, 4  ;;  %v1256_v12 = vadd.f32 %v1255_v27, %v1193_v41 }
 0x179   :  { %v1124_v0 = vadd.f32 %v1123_v62, %v1122_v60  ;;  %v1257_v5 = vrot.slane %v1256_v12, 4 }
 0x17b   :  { %v1125_v31 = vrot.slane %v1124_v0, 2  ;;  %v1258_v32 = vadd.f32 %v1257_v5, %v1256_v12 }
 0x17d   :  { %v1126_v34 = vadd.f32 %v1125_v31, %v1124_v0  ;;  %v1259_v33 = vrot.slane %v1258_v32, 2 }
 0x17f   :  { %v1127_v54 = vrot.slane %v1126_v34, 1  ;;  %v1260_v50 = vadd.f32 %v1259_v33, %v1258_v32 }
 0x181   :  { %v1128_v35 = vadd.f32 %v1127_v54, %v1126_v34  ;;  %v1261_v61 = vrot.slane %v1260_v50, 1 }
 0x183   :  { %1129 = vst [vmem:[%s2534_s5] sm:$0x1] %v1128_v35  ;;  %v1262_v59 = vadd.f32 %v1261_v61, %v1260_v50 }
 0x185   :  { %1263 = vst [vmem:[%s2535_s6] sm:$0x1] %v1262_v59 }

// kernel: bottleneck_forward.5
= control target key start
LH: loop header
LB: loop body
LE: loop exit
PB: predicated region body
PF: predicated region fallthrough
CT: control target
= control target key end

     0   :  { %s4526_s21 = smov 0   ;;  %s4528_s22 = smov 0   ;;  %s5691_s0 = inlined_call_operand.vmem [shape: bf16[512,128], index: 0, kind: input, shape index: {}]   ;;  %s5692_s1 = inlined_call_operand.vmem [shape: f32[1,128], index: 1, kind: input, shape index: {}]   ;;  %s5693_s2 = inlined_call_operand.vmem [shape: f32[1,128], index: 2, kind: input, shape index: {}]   ;;  %s5694_s3 = inlined_call_operand.vmem [shape: bf16[9,128,128], index: 3, kind: input, shape index: {}]   ;;  %s5695_s4 = inlined_call_operand.vmem [shape: bf16[512,128], index: 4, kind: output, shape index: {0}]   ;;  %s5696_s5 = inlined_call_operand.vmem [shape: f32[4,1,128], index: 5, kind: output, shape index: {1}]   ;;  %s5697_s6 = inlined_call_operand.vmem [shape: f32[4,1,128], index: 6, kind: output, shape index: {2}]  }
   0x1   :  { %s4530_s23 = smov 0   ;;  %s4532_s24 = smov 0  }
   0x2   :  { %s4534_s25 = smov 0  }
   0x3 LB: > { %s26_s26 = sadd.s32 1, %s4479_s23  ;;  %s29_s27 = sadd.s32 1, %s4483_s24  ;;  %s4487_s25 = sphi %s4534_s25, %s17_s25   ;;  %s4483_s24 = sphi %s4532_s24, %s5786_s24   ;;  %s4479_s23 = sphi %s4530_s23, %s5785_s23   ;;  %s4475_s22 = sphi %s4528_s22, %s5784_s22   ;;  %s4471_s21 = sphi %s4526_s21, %s5783_s21  }
   0x4   : > { %p27_p0 = scmp.ge.s32.totalorder %s26_s26, 2  ;;  %p3209_p1 = scmp.ge.s32.totalorder %s4487_s25, 1 }
   0x5   : > { %p242_p2 = scmp.lt.s32.totalorder %s4487_s25, 5 }
   0x6   : > { %s5788_s26 = smov (%p27_p0, %s26_s26), 0  ;;  %s5790_s27 = smov (!%p27_p0, %s29_s27), %s4483_s24 }
   0x7   : > { %p243_p3 = pnand %p3209_p1, %p242_p2  ;;  %p31_p4 = scmp.ge.s32.totalorder %s5790_s27, 2 }
   0x9   : > { %s5792_s27 = smov (%p31_p4, %s5790_s27), 0  ;;  %246 = sbr.rel (%p243_p3) target bundleno = 485 (0x1e5), region = 36 }
  0x10   : > { %s3210_s28 = sshll.u32 %s4475_s22, 5  ;;  %s3212_s29 = sshll.u32 %s4475_s22, 1 }
  0x11   : > { %p285_p5 = scmp.lt.s32.totalorder %s3210_s28, 63  ;;  %s291_s30 = sadd.s32 %s4471_s21, %s3212_s29 }
  0x12   : > { %s3213_s7 = sshll.u32 %s291_s30, 4  ;;  %p302_p7 = scmp.lt.s32.totalorder %s291_s30, 3 }
  0x13   : > { %s5794_s28 = smov (!%p285_p5, %s3210_s28), 63  ;;  %p293_p6 = scmp.lt.s32.totalorder %s3213_s7, 63 }
  0x14   : > { %s3211_s8 = sshll.u32 %s5794_s28, 2  ;;  %s5798_s30 = smov (!%p302_p7, %s291_s30), 3 }
  0x15   : > { %s4562_s11 = scalar_lea.vmem %s5691_s0, %s3211_s8  ;;  %s5796_s7 = smov (!%p293_p6, %s3213_s7), 63 }
  0x16   : > { %s3214_s12 = sshll.u32 %s5796_s7, 2  ;;  %s304_s18 = scalar_lea.vmem %s5696_s5, %s5798_s30 }
  0x17   : > { %s4569_s15 = scalar_lea.vmem %s5695_s4, %s3214_s12  ;;  %s311_s22 = scalar_lea.vmem %s5697_s6, %s5798_s30 }
  0x18   : > { %p3217_p8 = scmp.ne.s32.totalorder %s4471_s21, 0 }
  0x19   : > { %v3634_v0 = vld [vmem:[%s4562_s11] sm:$0xff] (!%p3217_p8)   ;;  %v4489_v2 = vmov (!%p3217_p8), 0.0   ;;  %v3737_v5 = vld [vmem:[%s4562_s11 + $0x8] sm:$0xff] (!%p3217_p8)   ;;  %v3738_v6 = vld [vmem:[%s4562_s11 + $0x10] sm:$0xff] (!%p3217_p8)  }
  0x1a   : > { %318 = sbr.rel (%p3217_p8) target bundleno = 61 (0x3d), region = 40  ;;  %v4584_v1 = vld [vmem:[%s5692_s1] ss:$0 sm:$0xff] (!%p3217_p8)  ;;  %493 = vst [vmem:[#allocation2] sm:$0xff] (!%p3217_p8), %v4489_v2  ;;  %494 = vst [vmem:[#allocation2 + $0x8] sm:$0xff] (!%p3217_p8), %v4489_v2  ;;  %v3635_v3 = vunpack.c.l.bf16 (!%p3217_p8), %v3634_v0  ;;  %v3636_v4 = vunpack.c.h.bf16 (!%p3217_p8), %v3634_v0  ;;  %v3739_v7 = vld [vmem:[%s4562_s11 + $0x18] sm:$0xff] (!%p3217_p8)   ;;  %v3639_v9 = vunpack.c.l.bf16 (!%p3217_p8), %v3737_v5  ;;  %v3640_v10 = vunpack.c.h.bf16 (!%p3217_p8), %v3737_v5 }
  0x1b   : > { %495 = vst [vmem:[#allocation2 + $0x110] sm:$0xff] (!%p3217_p8), %v4489_v2  ;;  %496 = vst [vmem:[#allocation2 + $0x118] sm:$0xff] (!%p3217_p8), %v4489_v2  ;;  %v4592_v8 = vld [vmem:[%s5693_s2] ss:$0 sm:$0xff] (!%p3217_p8)  ;;  %v3643_v11 = vunpack.c.l.bf16 (!%p3217_p8), %v3738_v6  ;;  %v3644_v12 = vunpack.c.h.bf16 (!%p3217_p8), %v3738_v6  ;;  %v3647_v15 = vunpack.c.l.bf16 (!%p3217_p8), %v3739_v7  ;;  %v3648_v16 = vunpack.c.h.bf16 (!%p3217_p8), %v3739_v7  ;;  %v3741_v34 = vld [vmem:[%s4562_s11 + $0x28] sm:$0xff] (!%p3217_p8)  }
  0x1c   : > { %v390_v13 = vmul.f32 (!%p3217_p8), %v3635_v3, %v4584_v1  ;;  %v391_v14 = vmul.f32 (!%p3217_p8), %v3636_v4, %v4584_v1  ;;  %v392_v17 = vmul.f32 (!%p3217_p8), %v3639_v9, %v4584_v1  ;;  %v393_v18 = vmul.f32 (!%p3217_p8), %v3640_v10, %v4584_v1  ;;  %v3740_v29 = vld [vmem:[%s4562_s11 + $0x20] sm:$0xff] (!%p3217_p8)   ;;  %v3742_v35 = vld [vmem:[%s4562_s11 + $0x30] sm:$0xff] (!%p3217_p8)   ;;  %v3743_v40 = vld [vmem:[%s4562_s11 + $0x38] sm:$0xff] (!%p3217_p8)  }
  0x1d   : > { %v394_v19 = vmul.f32 (!%p3217_p8), %v3643_v11, %v4584_v1  ;;  %v395_v20 = vmul.f32 (!%p3217_p8), %v3644_v12, %v4584_v1  ;;  %v396_v23 = vmul.f32 (!%p3217_p8), %v3647_v15, %v4584_v1  ;;  %v397_v24 = vmul.f32 (!%p3217_p8), %v3648_v16, %v4584_v1  ;;  %v3744_v2 = vld [vmem:[%s4562_s11 + $0x40] sm:$0xff] (!%p3217_p8)   ;;  %v3745_v7 = vld [vmem:[%s4562_s11 + $0x48] sm:$0xff] (!%p3217_p8)   ;;  %v3746_v9 = vld [vmem:[%s4562_s11 + $0x50] sm:$0xff] (!%p3217_p8)  }
  0x1e   : > { %v429_v21 = vadd.f32 (!%p3217_p8), %v4592_v8, %v390_v13  ;;  %v430_v22 = vadd.f32 (!%p3217_p8), %v4592_v8, %v391_v14  ;;  %v431_v25 = vadd.f32 (!%p3217_p8), %v4592_v8, %v392_v17  ;;  %v432_v26 = vadd.f32 (!%p3217_p8), %v4592_v8, %v393_v18  ;;  %v3747_v14 = vld [vmem:[%s4562_s11 + $0x58] sm:$0xff] (!%p3217_p8)  }
  0x1f   : > { %v433_v27 = vadd.f32 (!%p3217_p8), %v4592_v8, %v394_v19  ;;  %v434_v28 = vadd.f32 (!%p3217_p8), %v4592_v8, %v395_v20  ;;  %v435_v32 = vadd.f32 (!%p3217_p8), %v4592_v8, %v396_v23  ;;  %v436_v33 = vadd.f32 (!%p3217_p8), %v4592_v8, %v397_v24 }
  0x20   : > { %v461_v30 = vmax.f32 (!%p3217_p8), %v429_v21, 0.0  ;;  %v462_v31 = vmax.f32 (!%p3217_p8), %v430_v22, 0.0  ;;  %v463_v36 = vmax.f32 (!%p3217_p8), %v431_v25, 0.0  ;;  %v464_v37 = vmax.f32 (!%p3217_p8), %v432_v26, 0.0 }
  0x21   : > { %v465_v38 = vmax.f32 %v433_v27, 0.0  ;;  %v466_v39 = vmax.f32 %v434_v28, 0.0  ;;  %v467_v41 = vmax.f32 %v435_v32, 0.0  ;;  %v468_v42 = vmax.f32 %v436_v33, 0.0 }
  0x22   : > { %497 = vst [vmem:[#allocation2 + $0x10] sm:$0xff] %v461_v30  ;;  %498 = vst [vmem:[#allocation2 + $0x18] sm:$0xff] %v462_v31  ;;  %v3651_v43 = vunpack.c.l.bf16 %v3740_v29  ;;  %v3652_v44 = vunpack.c.h.bf16 %v3740_v29  ;;  %v3655_v45 = vunpack.c.l.bf16 %v3741_v34  ;;  %v3656_v46 = vunpack.c.h.bf16 %v3741_v34 }
  0x23   : > { %499 = vst [vmem:[#allocation2 + $0x20] sm:$0xff] %v463_v36  ;;  %500 = vst [vmem:[#allocation2 + $0x28] sm:$0xff] %v464_v37  ;;  %v3659_v47 = vunpack.c.l.bf16 %v3742_v35  ;;  %v3660_v48 = vunpack.c.h.bf16 %v3742_v35  ;;  %v3663_v51 = vunpack.c.l.bf16 %v3743_v40  ;;  %v3664_v52 = vunpack.c.h.bf16 %v3743_v40 }
  0x24   : > { %501 = vst [vmem:[#allocation2 + $0x30] sm:$0xff] %v465_v38  ;;  %502 = vst [vmem:[#allocation2 + $0x38] sm:$0xff] %v466_v39  ;;  %v398_v49 = vmul.f32 %v3651_v43, %v4584_v1  ;;  %v399_v50 = vmul.f32 %v3652_v44, %v4584_v1  ;;  %v400_v53 = vmul.f32 %v3655_v45, %v4584_v1  ;;  %v3667_v17 = vunpack.c.l.bf16 %v3744_v2  ;;  %v3748_v39 = vld [vmem:[%s4562_s11 + $0x60] sm:$0xff]   ;;  %v3749_v44 = vld [vmem:[%s4562_s11 + $0x68] sm:$0xff]  }
  0x25   : > { %503 = vst [vmem:[#allocation2 + $0x40] sm:$0xff] %v467_v41  ;;  %504 = vst [vmem:[#allocation2 + $0x48] sm:$0xff] %v468_v42  ;;  %v401_v54 = vmul.f32 %v3656_v46, %v4584_v1  ;;  %v402_v55 = vmul.f32 %v3659_v47, %v4584_v1  ;;  %v403_v56 = vmul.f32 %v3660_v48, %v4584_v1  ;;  %v3668_v18 = vunpack.c.h.bf16 %v3744_v2  ;;  %v3750_v45 = vld [vmem:[%s4562_s11 + $0x70] sm:$0xff]  }
  0x26   : > { %v437_v57 = vadd.f32 %v4592_v8, %v398_v49  ;;  %v438_v58 = vadd.f32 %v4592_v8, %v399_v50  ;;  %v404_v59 = vmul.f32 %v3663_v51, %v4584_v1  ;;  %v405_v60 = vmul.f32 %v3664_v52, %v4584_v1  ;;  %v3751_v50 = vld [vmem:[%s4562_s11 + $0x78] sm:$0xff]  }
  0x27   : > { %v439_v61 = vadd.f32 %v4592_v8, %v400_v53  ;;  %v440_v62 = vadd.f32 %v4592_v8, %v401_v54  ;;  %v441_v63 = vadd.f32 %v4592_v8, %v402_v55  ;;  %v442_v0 = vadd.f32 %v4592_v8, %v403_v56 }
  0x28   : > { %v469_v3 = vmax.f32 %v437_v57, 0.0  ;;  %v470_v4 = vmax.f32 %v438_v58, 0.0  ;;  %v443_v5 = vadd.f32 %v4592_v8, %v404_v59  ;;  %v444_v6 = vadd.f32 %v4592_v8, %v405_v60 }
  0x29   : > { %v471_v10 = vmax.f32 %v439_v61, 0.0  ;;  %v472_v11 = vmax.f32 %v440_v62, 0.0  ;;  %v473_v12 = vmax.f32 %v441_v63, 0.0  ;;  %v474_v13 = vmax.f32 %v442_v0, 0.0 }
  0x2a   : > { %505 = vst [vmem:[#allocation2 + $0x50] sm:$0xff] %v469_v3  ;;  %506 = vst [vmem:[#allocation2 + $0x58] sm:$0xff] %v470_v4  ;;  %v475_v15 = vmax.f32 %v443_v5, 0.0  ;;  %v476_v16 = vmax.f32 %v444_v6, 0.0  ;;  %v3671_v19 = vunpack.c.l.bf16 %v3745_v7  ;;  %v3672_v20 = vunpack.c.h.bf16 %v3745_v7 }
  0x2b   : > { %507 = vst [vmem:[#allocation2 + $0x60] sm:$0xff] %v471_v10  ;;  %508 = vst [vmem:[#allocation2 + $0x68] sm:$0xff] %v472_v11  ;;  %v3675_v21 = vunpack.c.l.bf16 %v3746_v9  ;;  %v3676_v22 = vunpack.c.h.bf16 %v3746_v9  ;;  %v406_v23 = vmul.f32 %v3667_v17, %v4584_v1  ;;  %v407_v24 = vmul.f32 %v3668_v18, %v4584_v1 }
  0x2c   : > { %509 = vst [vmem:[#allocation2 + $0x70] sm:$0xff] %v473_v12  ;;  %510 = vst [vmem:[#allocation2 + $0x78] sm:$0xff] %v474_v13  ;;  %v3679_v25 = vunpack.c.l.bf16 %v3747_v14  ;;  %v3680_v26 = vunpack.c.h.bf16 %v3747_v14  ;;  %v408_v27 = vmul.f32 %v3671_v19, %v4584_v1  ;;  %v409_v28 = vmul.f32 %v3672_v20, %v4584_v1 }
  0x2d   : > { %511 = vst [vmem:[#allocation2 + $0x80] sm:$0xff] %v475_v15  ;;  %512 = vst [vmem:[#allocation2 + $0x88] sm:$0xff] %v476_v16  ;;  %v410_v29 = vmul.f32 %v3675_v21, %v4584_v1  ;;  %v411_v30 = vmul.f32 %v3676_v22, %v4584_v1  ;;  %v445_v31 = vadd.f32 %v4592_v8, %v406_v23  ;;  %v3683_v53 = vunpack.c.l.bf16 %v3748_v39 }
  0x2e   : > { %v446_v32 = vadd.f32 %v4592_v8, %v407_v24  ;;  %v412_v33 = vmul.f32 %v3679_v25, %v4584_v1  ;;  %v413_v34 = vmul.f32 %v3680_v26, %v4584_v1  ;;  %v447_v35 = vadd.f32 %v4592_v8, %v408_v27 }
  0x2f   : > { %v448_v36 = vadd.f32 %v4592_v8, %v409_v28  ;;  %v449_v37 = vadd.f32 %v4592_v8, %v410_v29  ;;  %v450_v38 = vadd.f32 %v4592_v8, %v411_v30  ;;  %v477_v40 = vmax.f32 %v445_v31, 0.0 }
  0x30   : > { %v478_v41 = vmax.f32 %v446_v32, 0.0  ;;  %v451_v42 = vadd.f32 %v4592_v8, %v412_v33  ;;  %v452_v43 = vadd.f32 %v4592_v8, %v413_v34  ;;  %v479_v46 = vmax.f32 %v447_v35, 0.0 }
  0x31   : > { %v480_v47 = vmax.f32 %v448_v36, 0.0  ;;  %v481_v48 = vmax.f32 %v449_v37, 0.0  ;;  %v482_v49 = vmax.f32 %v450_v38, 0.0  ;;  %513 = vst [vmem:[#allocation2 + $0x90] sm:$0xff] %v477_v40  ;;  %v3684_v54 = vunpack.c.h.bf16 %v3748_v39 }
  0x32   : > { %514 = vst [vmem:[#allocation2 + $0x98] sm:$0xff] %v478_v41  ;;  %v483_v51 = vmax.f32 %v451_v42, 0.0  ;;  %v484_v52 = vmax.f32 %v452_v43, 0.0  ;;  %515 = vst [vmem:[#allocation2 + $0xa0] sm:$0xff] %v479_v46  ;;  %v3687_v55 = vunpack.c.l.bf16 %v3749_v44  ;;  %v3688_v56 = vunpack.c.h.bf16 %v3749_v44 }
  0x33   : > { %516 = vst [vmem:[#allocation2 + $0xa8] sm:$0xff] %v480_v47  ;;  %517 = vst [vmem:[#allocation2 + $0xb0] sm:$0xff] %v481_v48  ;;  %v3691_v57 = vunpack.c.l.bf16 %v3750_v45  ;;  %v3692_v58 = vunpack.c.h.bf16 %v3750_v45  ;;  %v414_v59 = vmul.f32 %v3683_v53, %v4584_v1  ;;  %v415_v60 = vmul.f32 %v3684_v54, %v4584_v1 }
  0x34   : > { %518 = vst [vmem:[#allocation2 + $0xb8] sm:$0xff] %v482_v49  ;;  %519 = vst [vmem:[#allocation2 + $0xc0] sm:$0xff] %v483_v51  ;;  %v3695_v61 = vunpack.c.l.bf16 %v3751_v50  ;;  %v3696_v62 = vunpack.c.h.bf16 %v3751_v50  ;;  %v416_v63 = vmul.f32 %v3687_v55, %v4584_v1  ;;  %v417_v0 = vmul.f32 %v3688_v56, %v4584_v1 }
  0x35   : > { %520 = vst [vmem:[#allocation2 + $0xc8] sm:$0xff] %v484_v52  ;;  %v418_v2 = vmul.f32 %v3691_v57, %v4584_v1  ;;  %v419_v3 = vmul.f32 %v3692_v58, %v4584_v1  ;;  %v453_v4 = vadd.f32 %v4592_v8, %v414_v59  ;;  %v454_v5 = vadd.f32 %v4592_v8, %v415_v60 }
  0x36   : > { %v420_v6 = vmul.f32 %v3695_v61, %v4584_v1  ;;  %v421_v7 = vmul.f32 %v3696_v62, %v4584_v1  ;;  %v455_v9 = vadd.f32 %v4592_v8, %v416_v63  ;;  %v456_v10 = vadd.f32 %v4592_v8, %v417_v0 }
  0x37   : > { %v457_v11 = vadd.f32 %v4592_v8, %v418_v2  ;;  %v458_v12 = vadd.f32 %v4592_v8, %v419_v3  ;;  %v485_v13 = vmax.f32 %v453_v4, 0.0  ;;  %v486_v14 = vmax.f32 %v454_v5, 0.0 }
  0x38   : > { %v459_v15 = vadd.f32 %v4592_v8, %v420_v6  ;;  %v460_v16 = vadd.f32 %v4592_v8, %v421_v7  ;;  %v487_v17 = vmax.f32 %v455_v9, 0.0  ;;  %v488_v18 = vmax.f32 %v456_v10, 0.0 }
  0x39   : > { %v489_v19 = vmax.f32 %v457_v11, 0.0  ;;  %v490_v20 = vmax.f32 %v458_v12, 0.0  ;;  %521 = vst [vmem:[#allocation2 + $0xd0] sm:$0xff] %v485_v13  ;;  %522 = vst [vmem:[#allocation2 + $0xd8] sm:$0xff] %v486_v14 }
  0x3a   : > { %v491_v1 = vmax.f32 %v459_v15, 0.0  ;;  %v492_v21 = vmax.f32 %v460_v16, 0.0  ;;  %523 = vst [vmem:[#allocation2 + $0xe0] sm:$0xff] %v487_v17  ;;  %524 = vst [vmem:[#allocation2 + $0xe8] sm:$0xff] %v488_v18 }
  0x3b   : > { %525 = vst [vmem:[#allocation2 + $0xf0] sm:$0xff] %v489_v19  ;;  %526 = vst [vmem:[#allocation2 + $0xf8] sm:$0xff] %v490_v20 }
  0x3c   : > { %527 = vst [vmem:[#allocation2 + $0x100] sm:$0xff] %v491_v1  ;;  %528 = vst [vmem:[#allocation2 + $0x108] sm:$0xff] %v492_v21 }
  0x3d PF: > { %v4377_v22 = vld [vmem:[%s5694_s3 + $0x40] sm:$0xff]   ;;  %v4379_v23 = vld [vmem:[%s5694_s3 + $0x48] sm:$0xff]   ;;  %v4381_v25 = vld [vmem:[%s5694_s3 + $0x50] sm:$0xff]   ;;  %s3220_s11 = sshll.u32 %s4471_s21, 7  ;;  %v529_v29 = vlaneseq  ;;  %vm4490_vm7 = vmmov 1  }
  0x3e   : > { %v4378_v8 = vld [vmem:[%s5694_s3 + $0x100] sm:$0xff]   ;;  %3903 = vmatprep.subr.bf16.mxu1 %v4377_v22  ;;  %v4380_v24 = vld [vmem:[%s5694_s3 + $0x108] sm:$0xff]   ;;  %v4382_v26 = vld [vmem:[%s5694_s3 + $0x110] sm:$0xff]   ;;  %s4706_s21 = scalar_lea.vmem [#allocation2], %s3220_s11 }
  0x3f   : > { %4031 = vmatprep.subr.bf16.mxu0 %v4378_v8  ;;  %3904 = vmatpush3.bf16.msra.mxu1 %v4377_v22  ;;  %v4383_v27 = vld [vmem:[%s5694_s3 + $0x58] sm:$0xff]   ;;  %v4385_v30 = vld [vmem:[%s5694_s3 + $0x60] sm:$0xff]   ;;  %v4701_v32 = vshrl.u32 %v529_v29, 7  ;;  %v4387_v33 = vld [vmem:[%s5694_s3 + $0x68] sm:$0xff]  }
  0x40   : > { %4032 = vmatpush3.bf16.msra.mxu0 %v4378_v8  ;;  %3905 = vmatprep.subr.bf16.mxu1 %v4379_v23  ;;  %v4384_v28 = vld [vmem:[%s5694_s3 + $0x118] sm:$0xff]   ;;  %v4386_v31 = vld [vmem:[%s5694_s3 + $0x120] sm:$0xff]   ;;  %v4388_v37 = vld [vmem:[%s5694_s3 + $0x128] sm:$0xff]  }
  0x41   : > { %4033 = vmatprep.subr.bf16.mxu0 %v4380_v24  ;;  %v531_v41 = vadd.s32 8, %v4701_v32  ;;  %v4389_v42 = vld [vmem:[%s5694_s3 + $0x70] sm:$0xff]   ;;  %v532_v43 = vadd.s32 16, %v4701_v32  ;;  %v550_v45 = vand.u32 15, %v4701_v32  ;;  %v4391_v47 = vld [vmem:[%s5694_s3 + $0x78] sm:$0xff]   ;;  %vm5701_vm0 = vcmp.lt.s32.totalorder %v4701_v32, 1 }
  0x42   : > { %v4390_v44 = vld [vmem:[%s5694_s3 + $0x130] sm:$0xff]   ;;  %v4392_v49 = vld [vmem:[%s5694_s3 + $0x138] sm:$0xff]   ;;  %v4393_v52 = vld [vmem:[%s5694_s3] sm:$0xff]   ;;  %v4748_v53 = vadd.s32 24, %v4701_v32  ;;  %v4757_v57 = vadd.s32 32, %v4701_v32  ;;  %v4765_v61 = vadd.s32 40, %v4701_v32 }
  0x43   : > { %3906 = vmatpush3.bf16.msra.mxu1 %v4379_v23  ;;  %v4709_v34 = vld [vmem:[%s4706_s21] sm:$0xff]  ;;  %v4712_v35 = vld [vmem:[%s4706_s21 + $0x8] sm:$0xff]  ;;  %v3326_v36 = vld [vmem:[%s4706_s21 + $0x10] sm:$0xff]  ;;  %v557_v46 = vand.u32 15, %v531_v41  ;;  %v564_v48 = vand.u32 15, %v532_v43  ;;  %v4739_v50 = vadd.s32 4294967295, %v550_v45 }
  0x44   : > { %4034 = vmatpush3.bf16.msra.mxu0 %v4380_v24  ;;  %3907 = vmatprep.subr.bf16.mxu1 %v4381_v25  ;;  %v925_v38 = vpack.c.bf16 %v4712_v35, %v4709_v34  ;;  %v4721_v39 = vld [vmem:[%s4706_s21 + $0x18] sm:$0xff]  ;;  %v3328_v54 = vld [vmem:[%s4706_s21 + $0x20] sm:$0xff]  ;;  %v4752_v55 = vld [vmem:[%s4706_s21 + $0x28] sm:$0xff]  ;;  %v756_v58 = vrot.slane %v4709_v34, 7  ;;  %v757_v59 = vrot.slane %v4712_v35, 7  ;;  %v5698_v62 = vrot.slane %v4709_v34, 1 }
  0x45   : > { %4035 = vmatprep.subr.bf16.mxu0 %v4382_v26  ;;  %v1823_v40 = vpack.c.bf16 %v4721_v39, %v3326_v36  ;;  %v4741_v51 = vadd.s32 1, %v557_v46  ;;  %v4754_v56 = vadd.s32 4294967295, %v564_v48  ;;  %v4394_v60 = vld [vmem:[%s5694_s3 + $0x140] sm:$0xff]   ;;  %v1241_v63 = vrot.slane %v4712_v35, 1  ;;  %v4395_v2 = vld [vmem:[%s5694_s3 + $0x8] sm:$0xff]   ;;  %v4782_v6 = vld [vmem:[%s4706_s21 + $0x30] sm:$0xff] }
  0x46   : > { %3919 = vmatprep.mubr.bf16.mxu1 %v925_v38  ;;  %v4769_v0 = vrot.slane %v3326_v36, 7  ;;  %vm5705_vm1 = vcmp.lt.s32.totalorder %v4701_v32, 7  ;;  %v1590_v3 = vrot.slane %v4721_v39, 7  ;;  %v4776_v4 = vrot.slane %v3326_v36, 1  ;;  %v4785_v7 = vld [vmem:[%s4706_s21 + $0x38] sm:$0xff]  ;;  %v4396_v10 = vld [vmem:[%s5694_s3 + $0x148] sm:$0xff]  }
  0x47   : > { %3908 = vmatpush3.bf16.msra.mxu1 %v4381_v25  ;;  %4047 = vmatprep.mubr.bf16.mxu0 %v1823_v40  ;;  %v4779_v5 = vpack.c.bf16 %v4752_v55, %v3328_v54  ;;  %v2010_v9 = vrot.slane %v4721_v39, 1  ;;  %v4791_v11 = vrot.slane %v3328_v54, 7  ;;  %v1592_v12 = vrot.slane %v4752_v55, 7  ;;  %v4397_v18 = vld [vmem:[%s5694_s3 + $0x10] sm:$0xff]   ;;  %v4810_v1 = vld [vmem:[%s4706_s21 + $0x40] sm:$0xff]  ;;  %v4813_v21 = vld [vmem:[%s4706_s21 + $0x48] sm:$0xff] }
  0x48   : > { %4036 = vmatpush3.bf16.msra.mxu0 %v4382_v26  ;;  %3909 = vmatprep.subr.bf16.mxu1 %v4383_v27  ;;  %v4794_v13 = vrot.slane %v3328_v54, 1  ;;  %v4798_v14 = vpack.c.bf16 %v4785_v7, %v4782_v6  ;;  %v2012_v15 = vrot.slane %v4752_v55, 1  ;;  %v1593_v16 = vrot.slane %v4782_v6, 7  ;;  %v4398_v23 = vld [vmem:[%s5694_s3 + $0x150] sm:$0xff]   ;;  %v4399_v36 = vld [vmem:[%s5694_s3 + $0x18] sm:$0xff]   ;;  %v4998_v55 = vld [vmem:[%s4706_s21 + $0x80] sm:$0xff] }
  0x49   : > { %4037 = vmatprep.subr.bf16.mxu0 %v4384_v28  ;;  %v2013_v17 = vrot.slane %v4782_v6, 1  ;;  %v1594_v19 = vrot.slane %v4785_v7, 7  ;;  %v2014_v20 = vrot.slane %v4785_v7, 1  ;;  %v1595_v22 = vrot.slane %v4810_v1, 7  ;;  %v4822_v24 = vld [vmem:[%s4706_s21 + $0x50] sm:$0xff]  ;;  %v4400_v41 = vld [vmem:[%s5694_s3 + $0x158] sm:$0xff]  }
  0x4a   : > { %v5699_v8 = vrot.slane %v4813_v21, 7  ;;  %v4827_v25 = vsel %vm5701_vm0, %v4769_v0, %v1590_v3  ;;  %v4832_v26 = vsel %vm5701_vm0, %v757_v59, %v4769_v0  ;;  %v4841_v29 = vpack.c.bf16 %v4813_v21, %v4810_v1  ;;  %v3341_v43 = vld [vmem:[%s4706_s21 + $0x88] sm:$0xff] }
  0x4b   : > { %3910 = vmatpush3.bf16.msra.mxu1 %v4383_v27  ;;  %v2015_v27 = vrot.slane %v4810_v1, 1  ;;  %v2037_v39 = vsel %vm5705_vm1, %v4794_v13, %v2012_v15  ;;  %v2039_v45 = vsel %vm5705_vm1, %v4776_v4, %v2010_v9  ;;  %v578_v46 = vand.u32 15, %v4757_v57 }
  0x4c   : > { %4038 = vmatpush3.bf16.msra.mxu0 %v4384_v28  ;;  %3911 = vmatprep.subr.bf16.mxu1 %v4385_v30  ;;  %v4837_v28 = vld [vmem:[%s4706_s21 + $0x58] sm:$0xff]  ;;  %v2017_v48 = vrot.slane %v4822_v24, 1  ;;  %v781_v35 = vsel %vm5701_vm0, %v1593_v16, %v1594_v19  ;;  %vm805_vm2 = vcmp.ge.s32.totalorder %v4739_v50, 0  ;;  %vm1306_vm3 = vcmp.lt.s32.totalorder %v4741_v51, 16  ;;  %v4410_v51 = vld [vmem:[%s5694_s3 + $0x180] sm:$0xff]  }
  0x4d   : > { %4039 = vmatprep.subr.bf16.mxu0 %v4386_v31  ;;  %vm807_vm4 = vcmp.ge.s32.totalorder %v4754_v56, 0  ;;  %v540_v7 = vadd.s32 80, %v4701_v32  ;;  %vm5085_vm8 = vmpackc.low %vm4490_vm7, %vm805_vm2 }
  0x4e   : > { %vm5096_vm10 = vmpackc.low %vm1306_vm3, %vm4490_vm7 }
  0x4f   : > { %3912 = vmatpush3.bf16.msra.mxu1 %v4385_v30  ;;  %v4848_v30 = vsel %vm5701_vm0, %v4791_v11, %v1592_v12  ;;  %vm5122_vm14 = vmpackc.low %vm4490_vm7, %vm807_vm4 }
  0x50   : > { %4040 = vmatpush3.bf16.msra.mxu0 %v4386_v31  ;;  %3913 = vmatprep.subr.bf16.mxu1 %v4387_v33  ;;  %v1618_v31 = vsel %vm5701_vm0, %v1590_v3, %v4791_v11  ;;  %v2035_v3 = vsel %vm5705_vm1, %v2013_v17, %v2014_v20 }
  0x51   : > { %4041 = vmatprep.subr.bf16.mxu0 %v4388_v37 }
  0x53   : > { %3914 = vmatpush3.bf16.msra.mxu1 %v4387_v33  ;;  %v2016_v33 = vrot.slane %v4813_v21, 1 }
  0x54   : > { %4042 = vmatpush3.bf16.msra.mxu0 %v4388_v37  ;;  %3915 = vmatprep.subr.bf16.mxu1 %v4389_v42  ;;  %v4861_v37 = vsel %vm5701_vm0, %v756_v58, %v757_v59  ;;  %v2018_v59 = vrot.slane %v4837_v28, 1 }
  0x55   : > { %4043 = vmatprep.subr.bf16.mxu0 %v4390_v44 }
  0x57   : > { %3916 = vmatpush3.bf16.msra.mxu1 %v4389_v42  ;;  %v571_v42 = vand.u32 15, %v4748_v53  ;;  %v4900_v53 = vsel %vm5705_vm1, %v1241_v63, %v4776_v4 }
  0x58   : > { %4044 = vmatpush3.bf16.msra.mxu0 %v4390_v44  ;;  %3917 = vmatprep.subr.bf16.mxu1 %v4391_v47  ;;  %v4878_v44 = vpack.c.bf16 %v4837_v28, %v4822_v24 }
  0x59   : > { %4045 = vmatprep.subr.bf16.mxu0 %v4392_v49 }
  0x5b   : > { %3918 = vmatpush3.bf16.msra.mxu1 %v4391_v47  ;;  %v4885_v47 = vpack.c.bf16 %v4848_v30, %v1618_v31  ;;  %v4403_v31 = vld [vmem:[%s5694_s3 + $0x28] sm:$0xff]  }
  0x5c   : > { %4046 = vmatpush3.bf16.msra.mxu0 %v4392_v49  ;;  %3935 = vmatprep.subr.bf16.mxu1 %v4393_v52  ;;  %v4401_v49 = vld [vmem:[%s5694_s3 + $0x20] sm:$0xff]  }
  0x5d   : > { %4063 = vmatprep.subr.bf16.mxu0 %v4394_v60 }
  0x5e   : > { %3920 = vmatmul.mubr.bf16.vlgmr.msra.gmra.mrb[0].mxu1 %v1823_v40  ;;  %v2036_v40 = vsel %vm5705_vm1, %v2012_v15, %v2013_v17  ;;  %v4929_v17 = vsel %vm5705_vm1, %v5698_v62, %v1241_v63  ;;  %v782_v63 = vsel %vm5701_vm0, %v1592_v12, %v1593_v16  ;;  %v537_v12 = vadd.s32 56, %v4701_v32 }
  0x5f   : > { %4048 = vmatmul.mubr.bf16.vlgmr.msra.gmra.mrb[0].mxu0 %v4779_v5  ;;  %3936 = vmatpush3.bf16.msra.mxu1 %v4393_v52  ;;  %v2038_v52 = vsel %vm5705_vm1, %v2010_v9, %v4794_v13  ;;  %v4902_v54 = vpack.c.bf16 %v2036_v40, %v2037_v39  ;;  %v4937_v39 = vld [vmem:[%s4706_s21 + $0x70] sm:$0xff]  ;;  %v4973_v9 = vadd.s32 1, %v571_v42  ;;  %v538_v16 = vadd.s32 64, %v4701_v32 }
  0x60   : > { %4064 = vmatpush3.bf16.msra.mxu0 %v4394_v60  ;;  %3937 = vmatprep.subr.bf16.mxu1 %v4395_v2  ;;  %v4907_v60 = vld [vmem:[%s4706_s21 + $0x60] sm:$0xff]  ;;  %v4939_v40 = vpack.c.bf16 %v2038_v52, %v2039_v45  ;;  %v4404_v45 = vld [vmem:[%s5694_s3 + $0x168] sm:$0xff]   ;;  %v3339_v52 = vld [vmem:[%s4706_s21 + $0x78] sm:$0xff]  ;;  %v4994_v38 = vpack.c.bf16 %v781_v35, %v782_v63  ;;  %v5016_v35 = vrot.slane %v3341_v43, 7  ;;  %v779_v63 = vsel %vm5701_vm0, %v1595_v22, %v5699_v8 }
  0x61   : > { %4065 = vmatprep.subr.bf16.mxu0 %v4396_v10  ;;  %3923 = vmatprep.mubr.bf16.mxu1 %v4779_v5  ;;  %v5700_v15 = vrot.slane %v4907_v60, 1  ;;  %v4978_v6 = vrot.slane %v3339_v52, 7  ;;  %v4987_v42 = vrot.slane %v3339_v52, 1  ;;  %vm1308_vm5 = vcmp.lt.s32.totalorder %v4973_v9, 16  ;;  %v4412_v9 = vld [vmem:[%s5694_s3 + $0x188] sm:$0xff]  }
  0x62   : > { %4051 = vmatprep.mubr.bf16.mxu0 %v4798_v14  ;;  %v606_v1 = vand.u32 15, %v538_v16  ;;  %v541_v8 = vadd.s32 88, %v4701_v32  ;;  %vm5137_vm15 = vmpackc.low %vm1308_vm5, %vm4490_vm7 }
  0x63   : > { %3938 = vmatpush3.bf16.msra.mxu1 %v4395_v2  ;;  %v4910_v2 = vld [vmem:[%s4706_s21 + $0x68] sm:$0xff] }
  0x64   : > { %4066 = vmatpush3.bf16.msra.mxu0 %v4396_v10  ;;  %3939 = vmatprep.subr.bf16.mxu1 %v4397_v18  ;;  %v4951_v62 = vpack.c.bf16 %v4910_v2, %v4907_v60  ;;  %v4975_v10 = vadd.s32 4294967295, %v578_v46 }
  0x65   : > { %4067 = vmatprep.subr.bf16.mxu0 %v4398_v23 }
  0x66   : > { %3924 = vmatmul.mubr.bf16.gmra.mrb[4].mxu1 %v4798_v14  ;;  %vm809_vm6 = vcmp.ge.s32.totalorder %v4975_v10, 0 }
  0x67   : > { %4052 = vmatmul.mubr.bf16.gmra.mrb[4].mxu0 %v4841_v29  ;;  %3940 = vmatpush3.bf16.msra.mxu1 %v4397_v18  ;;  %v4402_v18 = vld [vmem:[%s5694_s3 + $0x160] sm:$0xff]   ;;  %vm5165_vm3 = vmpackc.low %vm4490_vm7, %vm809_vm6 }
  0x68   : > { %4068 = vmatpush3.bf16.msra.mxu0 %v4398_v23  ;;  %3941 = vmatprep.subr.bf16.mxu1 %v4399_v36  ;;  %v2034_v23 = vsel %vm5705_vm1, %v2014_v20, %v2015_v27  ;;  %v585_v20 = vand.u32 15, %v4765_v61  ;;  %v4405_v61 = vld [vmem:[%s5694_s3 + $0x30] sm:$0xff]  }
  0x69   : > { %4069 = vmatprep.subr.bf16.mxu0 %v4400_v41  ;;  %3927 = vmatprep.mubr.bf16.mxu1 %v4841_v29  ;;  %v4992_v46 = vpack.c.bf16 %v2034_v23, %v2035_v3  ;;  %v539_v3 = vadd.s32 72, %v4701_v32  ;;  %v2030_v23 = vsel %vm5705_vm1, %v2018_v59, %v5700_v15 }
  0x6a   : > { %4055 = vmatprep.mubr.bf16.mxu0 %v4878_v44 }
  0x6b   : > { %3942 = vmatpush3.bf16.msra.mxu1 %v4399_v36  ;;  %v536_v36 = vadd.s32 48, %v4701_v32  ;;  %v613_v16 = vand.u32 15, %v539_v3 }
  0x6c   : > { %4070 = vmatpush3.bf16.msra.mxu0 %v4400_v41  ;;  %3943 = vmatprep.subr.bf16.mxu1 %v4401_v49  ;;  %v4985_v41 = vpack.c.bf16 %v3339_v52, %v4937_v39  ;;  %v2032_v52 = vsel %vm5705_vm1, %v2016_v33, %v2017_v48 }
  0x6d   : > { %4071 = vmatprep.subr.bf16.mxu0 %v4402_v18  ;;  %v592_v57 = vand.u32 15, %v536_v36  ;;  %v599_v36 = vand.u32 15, %v537_v12  ;;  %v5101_v50 = vadd.s32 1, %v613_v16 }
  0x6e   : > { %3928 = vmatmul.mubr.bf16.gmra.mrb[8].mxu1 %v4878_v44 }
  0x6f   : > { %4056 = vmatmul.mubr.bf16.gmra.mrb[8].mxu0 %v4951_v62  ;;  %3944 = vmatpush3.bf16.msra.mxu1 %v4401_v49  ;;  %v2033_v49 = vsel %vm5705_vm1, %v2015_v27, %v2016_v33  ;;  %v780_v27 = vsel %vm5701_vm0, %v1594_v19, %v1595_v22  ;;  %v4406_v33 = vld [vmem:[%s5694_s3 + $0x170] sm:$0xff]   ;;  %v5042_v19 = vadd.s32 1, %v585_v20  ;;  %v5056_v12 = vadd.s32 4294967295, %v592_v57  ;;  %v4408_v57 = vld [vmem:[%s5694_s3 + $0x178] sm:$0xff]  }
  0x70   : > { %4072 = vmatpush3.bf16.msra.mxu0 %v4402_v18  ;;  %3945 = vmatprep.subr.bf16.mxu1 %v4403_v31  ;;  %v788_v18 = vsel %vm5701_vm0, %v4978_v6, %v756_v58  ;;  %v5044_v22 = vpack.c.bf16 %v2032_v52, %v2033_v49  ;;  %v5054_v58 = vpack.c.bf16 %v3341_v43, %v4998_v55  ;;  %v5065_v49 = vrot.slane %v3341_v43, 1 }
  0x71   : > { %4073 = vmatprep.subr.bf16.mxu0 %v4404_v45  ;;  %3931 = vmatprep.mubr.bf16.mxu1 %v4951_v62  ;;  %v2031_v20 = vsel %vm5705_vm1, %v2017_v48, %v2018_v59  ;;  %v3254_v3 = vpack.c.bf16 %v4861_v37, %v788_v18  ;;  %v5074_v15 = vpack.c.bf16 %v779_v63, %v780_v27  ;;  %v5077_v48 = vadd.s32 1, %v599_v36 }
  0x72   : > { %4059 = vmatprep.mubr.bf16.mxu0 %v4985_v41  ;;  %5714 = vst [vmem:[#allocation3_spill] sm:$0xff] %v5054_v58  ;;  %v5079_v59 = vadd.s32 4294967295, %v606_v1  ;;  %v620_v43 = vand.u32 15, %v540_v7  ;;  %vm1310_vm9 = vcmp.lt.s32.totalorder %v5042_v19, 16  ;;  %v5090_v37 = vpack.c.bf16 %v2030_v23, %v2031_v20 }
  0x73   : > { %3946 = vmatpush3.bf16.msra.mxu1 %v4403_v31  ;;  %v4407_v31 = vld [vmem:[%s5694_s3 + $0x38] sm:$0xff]   ;;  %v627_v63 = vand.u32 15, %v541_v8  ;;  %vm811_vm11 = vcmp.ge.s32.totalorder %v5056_v12, 0  ;;  %v4409_v8 = vld [vmem:[%s5694_s3 + $0x80] sm:$0xff]   ;;  %v542_v23 = vadd.s32 96, %v4701_v32  ;;  %vm1312_vm12 = vcmp.lt.s32.totalorder %v5077_v48, 16  ;;  %vm5214_vm4 = vmpackc.low %vm1310_vm9, %vm4490_vm7 }
  0x74   : > { %4074 = vmatpush3.bf16.msra.mxu0 %v4404_v45  ;;  %3947 = vmatprep.subr.bf16.mxu1 %v4405_v61  ;;  %vm813_vm13 = vcmp.ge.s32.totalorder %v5079_v59, 0  ;;  %v5721_v36 = vrot.slane %v4837_v28, 7  ;;  %v5722_v1 = vrot.slane %v4822_v24, 7  ;;  %vm1314_vm2 = vcmp.lt.s32.totalorder %v5101_v50, 16  ;;  %vm5242_vm9 = vmpackc.low %vm4490_vm7, %vm811_vm11  ;;  %v4416_v12 = vld [vmem:[%s5694_s3 + $0x198] sm:$0xff]  }
  0x75   : > { %4075 = vmatprep.subr.bf16.mxu0 %v4406_v33  ;;  %v5126_v18 = vadd.s32 1, %v627_v63  ;;  %v5726_v20 = vrot.slane %v4813_v21, 7  ;;  %v5727_v24 = vrot.slane %v4910_v2, 7  ;;  %v5728_v21 = vrot.slane %v4907_v60, 7  ;;  %vm5263_vm11 = vmpackc.low %vm4490_vm7, %vm813_vm13  ;;  %v5299_v50 = vld [vmem:[%s4706_s21 + $0x98] sm:$0xff] }
  0x76   : > { %3932 = vmatmul.mubr.bf16.gmra.mrb[12].mxu1 %v4985_v41  ;;  %v1611_v7 = vsel %vm5701_vm0, %v5722_v1, %v5721_v36  ;;  %v5725_v16 = vmov %v5722_v1  ;;  %v5741_v19 = vrot.slane %v4937_v39, 1 }
  0x77   : > { %4060 = vmatmul.mubr.bf16.gmra.mrb[12].mxu0 %v5054_v58  ;;  %3948 = vmatpush3.bf16.msra.mxu1 %v4405_v61  ;;  %v5114_v61 = vadd.s32 4294967295, %v620_v43  ;;  %v634_v43 = vand.u32 15, %v542_v23  ;;  %v1609_v36 = vsel %vm5701_vm0, %v5728_v21, %v5727_v24  ;;  %v5731_v1 = vmov %v5728_v21 }
  0x78   : > { %4076 = vmatpush3.bf16.msra.mxu0 %v4406_v33  ;;  %3949 = vmatprep.subr.bf16.mxu1 %v4407_v31  ;;  %v5732_v23 = vrot.slane %v4837_v28, 7  ;;  %v5736_v21 = vrot.slane %v4998_v55, 7  ;;  %vm1316_vm6 = vcmp.lt.s32.totalorder %v5126_v18, 16  ;;  %v5754_v58 = vrot.slane %v4937_v39, 1  ;;  %v4420_v18 = vld [vmem:[%s5694_s3 + $0x1a8] sm:$0xff]  }
  0x79   : > { %4077 = vmatprep.subr.bf16.mxu0 %v4408_v57  ;;  %3951 = vmatprep.mubr.msk.bf16.mxu1 %vm5085_vm8, %v3254_v3  ;;  %v1612_v3 = vsel %vm5701_vm0, %v5726_v20, %v5725_v16  ;;  %v5733_v16 = vrot.slane %v4937_v39, 7  ;;  %vm815_vm5 = vcmp.ge.s32.totalorder %v5114_v61, 0  ;;  %v5310_v39 = vld [vmem:[%s4706_s21 + $0x90] sm:$0xff] }
  0x7a   : > { %4079 = vmatprep.mubr.msk.bf16.mxu0 %vm5096_vm10, %v4939_v40  ;;  %v5154_v63 = vpack.c.bf16 %v1611_v7, %v1612_v3  ;;  %v1610_v7 = vsel %vm5701_vm0, %v5732_v23, %v5731_v1  ;;  %v5735_v3 = vmov %v5727_v24  ;;  %v1605_v28 = vsel %vm5701_vm0, %v5736_v21, %v5016_v35  ;;  %v4413_v23 = vld [vmem:[%s5694_s3 + $0x90] sm:$0xff]   ;;  %vm5338_vm13 = vmpackc.low %vm4490_vm7, %vm815_vm5 }
  0x7b   : > { %3950 = vmatpush3.bf16.msra.mxu1 %v4407_v31  ;;  %v4411_v31 = vld [vmem:[%s5694_s3 + $0x88] sm:$0xff]   ;;  %v1607_v20 = vsel %vm5701_vm0, %v5733_v16, %v4978_v6  ;;  %v5734_v10 = vmov %v5733_v16  ;;  %v5737_v1 = vpack.c.bf16 %v4827_v25, %v4832_v26  ;;  %v5199_v16 = vpack.c.bf16 %v1609_v36, %v1610_v7  ;;  %v4414_v36 = vld [vmem:[%s5694_s3 + $0x190] sm:$0xff]  }
  0x7c   : > { %4078 = vmatpush3.bf16.msra.mxu0 %v4408_v57  ;;  %3967 = vmatprep.subr.bf16.mxu1 %v4409_v8  ;;  %v1608_v24 = vsel %vm5701_vm0, %v5735_v3, %v5734_v10  ;;  %v5738_v10 = vmov %v5736_v21  ;;  %v5739_v26 = vmov 0  ;;  %v543_v7 = vadd.s32 104, %v4701_v32 }
  0x7d   : > { %4095 = vmatprep.subr.bf16.mxu0 %v4410_v51  ;;  %v5201_v52 = vpack.c.bf16 %v1607_v20, %v1608_v24  ;;  %v1606_v3 = vsel %vm5701_vm0, %v4978_v6, %v5738_v10  ;;  %v5740_v26 = vsel %vm5214_vm4, 4294967295, %v5739_v26  ;;  %v544_v6 = vadd.s32 112, %v4701_v32  ;;  %vm5252_vm0 = vmpackc.low %vm1312_vm12, %vm4490_vm7 }
  0x7e   : > { %3952 = vmatmul.mubr.msk.bf16.vlgmr.msra.gmra.mrb[0].mxu1 %vm5122_vm14, %v5737_v1  ;;  %v5222_v20 = vpack.c.bf16 %v1605_v28, %v1606_v3  ;;  %v4415_v28 = vld [vmem:[%s5694_s3 + $0x98] sm:$0xff]   ;;  %v545_v1 = vadd.s32 120, %v4701_v32  ;;  %v641_v48 = vand.u32 15, %v543_v7  ;;  %v5749_v10 = vrot.slane %v4998_v55, 1  ;;  %vm5281_vm12 = vmpackc.low %vm1314_vm2, %vm4490_vm7 }
  0x7f   : > { %4080 = vmatmul.mubr.msk.bf16.vlgmr.msra.gmra.mrb[0].mxu0 %vm5137_vm15, %v4902_v54  ;;  %3968 = vmatpush3.bf16.msra.mxu1 %v4409_v8  ;;  %v5742_v8 = vrot.slane %v4910_v2, 1  ;;  %v648_v7 = vand.u32 15, %v544_v6  ;;  %v5290_v2 = vsel %vm5705_vm1, %v5754_v58, %v4987_v42  ;;  %v4418_v58 = vld [vmem:[%s5694_s3 + $0x1a0] sm:$0xff]  }
  0x80   : > { %4096 = vmatpush3.bf16.msra.mxu0 %v4410_v51  ;;  %3969 = vmatprep.subr.bf16.mxu1 %v4411_v31  ;;  %v801_v51 = vadd.s32 4294967295, %v634_v43  ;;  %v5745_v43 = vmov 0  ;;  %v2026_v3 = vsel %vm5705_vm1, %v4987_v42, %v5749_v10 }
  0x81   : > { %4097 = vmatprep.subr.bf16.mxu0 %v4412_v9  ;;  %3955 = vmatprep.mubr.msk.bf16.mxu1 %vm5165_vm3, %v4885_v47  ;;  %v2028_v24 = vsel %vm5705_vm1, %v5742_v8, %v5741_v19  ;;  %v5746_v43 = vsel %vm5252_vm0, 4294967295, %v5745_v43  ;;  %v5750_v19 = vmov %v5742_v8  ;;  %v5304_v6 = vpack.c.bf16 %v2026_v3, %v5290_v2 }
  0x82   : > { %4083 = vmatprep.mubr.msk.bf16.mxu0 %vm5214_vm4, %v4992_v46  ;;  %v5755_v3 = vrot.slane %v4998_v55, 1  ;;  %v4419_v55 = vld [vmem:[%s5694_s3 + $0xa8] sm:$0xff]   ;;  %vm817_vm2 = vcmp.ge.s32.totalorder %v801_v51, 0  ;;  %v4421_v51 = vld [vmem:[%s5694_s3 + $0xb0] sm:$0xff]  }
  0x83   : > { %3970 = vmatpush3.bf16.msra.mxu1 %v4411_v31  ;;  %v5747_v31 = vmov 0 }
  0x84   : > { %4098 = vmatpush3.bf16.msra.mxu0 %v4412_v9  ;;  %3971 = vmatprep.subr.bf16.mxu1 %v4413_v23  ;;  %v5748_v31 = vsel %vm5263_vm11, 4294967295, %v5747_v31  ;;  %v5751_v9 = vrot.slane %v4907_v60, 1  ;;  %v4417_v60 = vld [vmem:[%s5694_s3 + $0xa0] sm:$0xff]  }
  0x85   : > { %4099 = vmatprep.subr.bf16.mxu0 %v4414_v36 }
  0x86   : > { %v2703_v59 = vsel %vm5705_vm1, %v5751_v9, %v5750_v19  ;;  %3956 = vmatmul.mubr.msk.bf16.gmra.mrb[4].mxu1 %vm5242_vm9, %v4994_v38  ;;  %v1286_v19 = vadd.s32 1, %v641_v48  ;;  %v5322_v9 = vsel %vm5705_vm1, %v5755_v3, %v5065_v49  ;;  %v2696_v48 = vrot.slane %v5299_v50, 1 }
  0x87   : > { %v5301_v10 = vpack.c.bf16 %v2028_v24, %v2703_v59  ;;  %4084 = vmatmul.mubr.msk.bf16.gmra.mrb[4].mxu0 %vm5252_vm0, %v5044_v22  ;;  %3972 = vmatpush3.bf16.msra.mxu1 %v4413_v23  ;;  %v655_v23 = vand.u32 15, %v545_v1  ;;  %v5756_v59 = vmov 0  ;;  %v803_v1 = vadd.s32 4294967295, %v648_v7 }
  0x88   : > { %4100 = vmatpush3.bf16.msra.mxu0 %v4414_v36  ;;  %3973 = vmatprep.subr.bf16.mxu1 %v4415_v28  ;;  %v2695_v36 = vrot.slane %v5310_v39, 1  ;;  %v5757_v59 = vsel %vm5338_vm13, 4294967295, %v5756_v59  ;;  %vm1318_vm5 = vcmp.lt.s32.totalorder %v1286_v19, 16 }
  0x89   : > { %4101 = vmatprep.subr.bf16.mxu0 %v4416_v12  ;;  %3959 = vmatprep.mubr.msk.bf16.mxu1 %vm5263_vm11, %v5074_v15  ;;  %vm5350_vm11 = vmpackc.low %vm1316_vm6, %vm4490_vm7  ;;  %v1288_v24 = vadd.s32 1, %v655_v23  ;;  %v2276_v23 = vrot.slane %v5299_v50, 7 }
  0x8a   : > { %4087 = vmatprep.mubr.msk.bf16.mxu0 %vm5281_vm12, %v5090_v37  ;;  %v5345_v3 = vsel %vm5705_vm1, %v5065_v49, %v2695_v36  ;;  %v5358_v7 = vsel %vm5705_vm1, %v2695_v36, %v2696_v48  ;;  %vm5375_vm6 = vmpackc.low %vm4490_vm7, %vm817_vm2  ;;  %v5760_v36 = vmov 0  ;;  %vm5764_vm2 = vcmp.lt.s32.totalorder %v4701_v32, 7 }
  0x8b   : > { %3974 = vmatpush3.bf16.msra.mxu1 %v4415_v28  ;;  %v5758_v28 = vmov 0  ;;  %v3594_v61 = vpack.c.bf16 %v5345_v3, %v5322_v9  ;;  %v5761_v36 = vsel %vm5375_vm6, 4294967295, %v5760_v36 }
  0x8c   : > { %4102 = vmatpush3.bf16.msra.mxu0 %v4416_v12  ;;  %3975 = vmatprep.subr.bf16.mxu1 %v4417_v60  ;;  %v5759_v28 = vsel %vm5350_vm11, 4294967295, %v5758_v28  ;;  %v5363_v12 = vsel %vm5705_vm1, %v2696_v48, %v4794_v13  ;;  %vm5383_vm1 = vmpackc.low %vm1318_vm5, %vm4490_vm7  ;;  %v2040_v48 = vsel %vm5764_vm2, %v5065_v49, %v4776_v4  ;;  %vm1320_vm5 = vcmp.lt.s32.totalorder %v1288_v24, 16 }
  0x8d   : > { %4103 = vmatprep.subr.bf16.mxu0 %v4418_v58  ;;  %v3597_v19 = vpack.c.bf16 %v5363_v12, %v5358_v7  ;;  %v3460_v4 = vpack.c.bf16 %v2040_v48, %v5322_v9  ;;  %vm5767_vm2 = vcmp.lt.s32.totalorder %v4701_v32, 1  ;;  %v5770_v48 = vpack.c.bf16 %v4900_v53, %v4929_v17  ;;  %v4428_v53 = vld [vmem:[%s5694_s3 + $0x1c8] sm:$0xff]   ;;  %v4429_v17 = vld [vmem:[%s5694_s3 + $0xd0] sm:$0xff]  }
  0x8e   : > { %3960 = vmatmul.mubr.msk.bf16.gmra.mrb[8].mxu1 %vm5338_vm13, %v5154_v63  ;;  %vm819_vm13 = vcmp.ge.s32.totalorder %v803_v1, 0  ;;  %v2292_v49 = vsel %vm5767_vm2, %v2276_v23, %v4791_v11  ;;  %v4424_v1 = vld [vmem:[%s5694_s3 + $0x1b8] sm:$0xff]   ;;  %vm5775_vm2 = vcmp.lt.s32.totalorder %v4701_v32, 7 }
  0x8f   : > { %4088 = vmatmul.mubr.msk.bf16.gmra.mrb[8].mxu0 %vm5350_vm11, %v5301_v10  ;;  %3976 = vmatpush3.bf16.msra.mxu1 %v4417_v60  ;;  %v4422_v60 = vld [vmem:[%s5694_s3 + $0x1b0] sm:$0xff]   ;;  %vm5405_vm11 = vmpackc.low %vm4490_vm7, %vm819_vm13  ;;  %v3504_v11 = vpack.c.bf16 %v4848_v30, %v2292_v49  ;;  %v4426_v30 = vld [vmem:[%s5694_s3 + $0x1c0] sm:$0xff]   ;;  %vm5772_vm13 = vnez %v5759_v28 }
  0x90   : > { %4104 = vmatpush3.bf16.msra.mxu0 %v4418_v58  ;;  %3977 = vmatprep.subr.bf16.mxu1 %v4419_v55  ;;  %v4433_v49 = vld [vmem:[%s5694_s3 + $0xe0] sm:$0xff]  }
  0x91   : > { %4105 = vmatprep.subr.bf16.mxu0 %v4420_v18  ;;  %3963 = vmatprep.mubr.msk.bf16.mxu1 %vm5375_vm6, %v5199_v16  ;;  %vm5416_vm6 = vmpackc.low %vm1320_vm5, %vm4490_vm7  ;;  %vm5771_vm7 = vnez %v5748_v31  ;;  %vm5773_vm5 = vnez %v5757_v59 }
  0x92   : > { %4091 = vmatprep.mubr.msk.bf16.mxu0 %vm5383_vm1, %v5304_v6 }
  0x93   : > { %3978 = vmatpush3.bf16.msra.mxu1 %v4419_v55  ;;  %v4423_v55 = vld [vmem:[%s5694_s3 + $0xb8] sm:$0xff]  }
  0x94   : > { %4106 = vmatpush3.bf16.msra.mxu0 %v4420_v18  ;;  %3979 = vmatprep.subr.bf16.mxu1 %v4421_v51  ;;  %v4425_v18 = vld [vmem:[%s5694_s3 + $0xc0] sm:$0xff]  }
  0x95   : > { %4107 = vmatprep.subr.bf16.mxu0 %v4422_v60 }
  0x96   : > { %3964 = vmatmul.mubr.msk.bf16.gmra.mrb[12].mxu1 %vm5405_vm11, %v5201_v52 }
  0x97   : > { %4092 = vmatmul.mubr.msk.bf16.gmra.mrb[12].mxu0 %vm5416_vm6, %v3460_v4  ;;  %3980 = vmatpush3.bf16.msra.mxu1 %v4421_v51  ;;  %v4427_v51 = vld [vmem:[%s5694_s3 + $0xc8] sm:$0xff]   ;;  %v4432_v4 = vld [vmem:[%s5694_s3 + $0x1d8] sm:$0xff]  }
  0x98   : > { %4108 = vmatpush3.bf16.msra.mxu0 %v4422_v60  ;;  %3981 = vmatprep.subr.bf16.mxu1 %v4423_v55  ;;  %v4431_v60 = vld [vmem:[%s5694_s3 + $0xd8] sm:$0xff]  }
  0x99   : > { %4109 = vmatprep.subr.bf16.mxu0 %v4424_v1  ;;  %3983 = vmatprep.mubr.msk.bf16.mxu1 %vm5096_vm10, %v5770_v48  ;;  %v5774_v48 = vrot.slane %v4709_v34, 1  ;;  %v4438_v34 = vld [vmem:[%s5694_s3 + $0x1f0] sm:$0xff]  }
  0x9a   : > { %4111 = vmatprep.mubr.msk.bf16.mxu0 %vm5085_vm8, %v3504_v11  ;;  %v2275_v11 = vrot.slane %v5310_v39, 7 }
  0x9b   : > { %3982 = vmatpush3.bf16.msra.mxu1 %v4423_v55  ;;  %v4434_v55 = vld [vmem:[%s5694_s3 + $0x1e0] sm:$0xff]  }
  0x9c   : > { %4110 = vmatpush3.bf16.msra.mxu0 %v4424_v1  ;;  %3999 = vmatprep.subr.bf16.mxu1 %v4425_v18  ;;  %v4435_v1 = vld [vmem:[%s5694_s3 + $0xe8] sm:$0xff]  }
  0x9d   : > { %4127 = vmatprep.subr.bf16.mxu0 %v4426_v30 }
  0x9e   : > { %3984 = vmatmul.mubr.msk.bf16.vlgmr.msra.gmra.mrb[0].mxu1 %vm5137_vm15, %v4939_v40  ;;  %v4430_v40 = vld [vmem:[%s5694_s3 + $0x1d0] sm:$0xff]  }
  0x9f   : > { %4112 = vmatmul.mubr.msk.bf16.vlgmr.msra.gmra.mrb[0].mxu0 %vm5122_vm14, %v4994_v38  ;;  %4000 = vmatpush3.bf16.msra.mxu1 %v4425_v18  ;;  %v4436_v18 = vld [vmem:[%s5694_s3 + $0x1e8] sm:$0xff]  }
  0xa0   : > { %4128 = vmatpush3.bf16.msra.mxu0 %v4426_v30  ;;  %4001 = vmatprep.subr.bf16.mxu1 %v4427_v51  ;;  %v1272_v30 = vsel %vm5775_vm2, %v4987_v42, %v5774_v48  ;;  %vm5778_vm2 = vnez %v5761_v36 }
  0xa1   : > { %4129 = vmatprep.subr.bf16.mxu0 %v4428_v53  ;;  %3987 = vmatprep.mubr.msk.bf16.mxu1 %vm5214_vm4, %v4902_v54  ;;  %v3323_v42 = vpack.c.bf16 %v1272_v30, %v5290_v2 }
  0xa2   : > { %4115 = vmatprep.mubr.msk.bf16.mxu0 %vm5165_vm3, %v5074_v15 }
  0xa3   : > { %4002 = vmatpush3.bf16.msra.mxu1 %v4427_v51  ;;  %v4437_v51 = vld [vmem:[%s5694_s3 + $0xf0] sm:$0xff]  }
  0xa4   : > { %4130 = vmatpush3.bf16.msra.mxu0 %v4428_v53  ;;  %4003 = vmatprep.subr.bf16.mxu1 %v4429_v17 }
  0xa5   : > { %4131 = vmatprep.subr.bf16.mxu0 %v4430_v40 }
  0xa6   : > { %3988 = vmatmul.mubr.msk.bf16.gmra.mrb[4].mxu1 %vm5252_vm0, %v4992_v46  ;;  %vm5776_vm0 = vcmp.lt.s32.totalorder %v4701_v32, 1  ;;  %v4441_v32 = vld [vmem:[%s5694_s3 + $0x200] sm:$0xff]  }
  0xa7   : > { %4116 = vmatmul.mubr.msk.bf16.gmra.mrb[4].mxu0 %vm5242_vm9, %v5154_v63  ;;  %4004 = vmatpush3.bf16.msra.mxu1 %v4429_v17  ;;  %v2277_v53 = vsel %vm5776_vm0, %v2275_v11, %v2276_v23  ;;  %vm5777_vm4 = vmmov %vm5776_vm0  ;;  %v1620_v23 = vsel %vm5776_vm0, %v5016_v35, %v4769_v0  ;;  %v4442_v0 = vld [vmem:[%s5694_s3 + $0x208] sm:$0xff]  }
  0xa8   : > { %4132 = vmatpush3.bf16.msra.mxu0 %v4430_v40  ;;  %4005 = vmatprep.subr.bf16.mxu1 %v4431_v60  ;;  %v2278_v17 = vsel %vm5777_vm4, %v5016_v35, %v2275_v11  ;;  %v3367_v2 = vpack.c.bf16 %v4827_v25, %v1620_v23  ;;  %v4445_v25 = vld [vmem:[%s5694_s3 + $0x220] sm:$0xff]  }
  0xa9   : > { %4133 = vmatprep.subr.bf16.mxu0 %v4432_v4  ;;  %3991 = vmatprep.mubr.msk.bf16.mxu1 %vm5281_vm12, %v5044_v22  ;;  %v3525_v40 = vpack.c.bf16 %v2277_v53, %v2278_v17 }
  0xaa   : > { %4119 = vmatprep.mubr.msk.bf16.mxu0 %vm5771_vm7, %v5199_v16 }
  0xab   : > { %4006 = vmatpush3.bf16.msra.mxu1 %v4431_v60  ;;  %v4439_v60 = vld [vmem:[%s5694_s3 + $0xf8] sm:$0xff]  }
  0xac   : > { %4134 = vmatpush3.bf16.msra.mxu0 %v4432_v4  ;;  %4007 = vmatprep.subr.bf16.mxu1 %v4433_v49  ;;  %v4440_v4 = vld [vmem:[%s5694_s3 + $0x1f8] sm:$0xff]  }
  0xad   : > { %4135 = vmatprep.subr.bf16.mxu0 %v4434_v55 }
  0xae   : > { %3992 = vmatmul.mubr.msk.bf16.gmra.mrb[8].mxu1 %vm5772_vm13, %v5090_v37 }
  0xaf   : > { %4120 = vmatmul.mubr.msk.bf16.gmra.mrb[8].mxu0 %vm5773_vm5, %v5201_v52  ;;  %4008 = vmatpush3.bf16.msra.mxu1 %v4433_v49 }
  0xb0   : > { %4136 = vmatpush3.bf16.msra.mxu0 %v4434_v55  ;;  %4009 = vmatprep.subr.bf16.mxu1 %v4435_v1 }
  0xb1   : > { %4137 = vmatprep.subr.bf16.mxu0 %v4436_v18  ;;  %3995 = vmatprep.mubr.msk.bf16.mxu1 %vm5383_vm1, %v5301_v10 }
  0xb2   : > { %4123 = vmatprep.mubr.msk.bf16.mxu0 %vm5778_vm2, %v5222_v20 }
  0xb3   : > { %4010 = vmatpush3.bf16.msra.mxu1 %v4435_v1 }
  0xb4   : > { %4138 = vmatpush3.bf16.msra.mxu0 %v4436_v18  ;;  %4011 = vmatprep.subr.bf16.mxu1 %v4437_v51 }
  0xb5   : > { %4139 = vmatprep.subr.bf16.mxu0 %v4438_v34 }
  0xb6   : > { %3996 = vmatmul.mubr.msk.bf16.gmra.mrb[12].mxu1 %vm5416_vm6, %v3323_v42 }
  0xb7   : > { %4124 = vmatmul.mubr.msk.bf16.gmra.mrb[12].mxu0 %vm5405_vm11, %v3525_v40  ;;  %4012 = vmatpush3.bf16.msra.mxu1 %v4437_v51 }
  0xb8   : > { %4140 = vmatpush3.bf16.msra.mxu0 %v4438_v34  ;;  %4013 = vmatprep.subr.bf16.mxu1 %v4439_v60 }
  0xb9   : > { %4141 = vmatprep.subr.bf16.mxu0 %v4440_v4  ;;  %4015 = vmatprep.mubr.msk.bf16.mxu1 %vm5085_vm8, %v3367_v2  ;;  %vm5781_vm8 = vnez %v5740_v26 }
  0xba   : > { %4143 = vmatprep.mubr.bf16.mxu0 %v4779_v5  ;;  %v4443_v5 = vld [vmem:[%s5694_s3 + $0x210] sm:$0xff]  }
  0xbb   : > { %4014 = vmatpush3.bf16.msra.mxu1 %v4439_v60 }
  0xbc   : > { %4142 = vmatpush3.bf16.msra.mxu0 %v4440_v4  ;;  %4191 = vmatprep.subr.bf16.mxu1 %v4441_v32 }
  0xbd   : > { %4159 = vmatprep.subr.bf16.mxu0 %v4441_v32 }
  0xbe   : > { %4016 = vmatmul.mubr.msk.bf16.vlgmr.msra.gmra.mrb[0].mxu1 %vm5122_vm14, %v4885_v47  ;;  %v5780_v47 = vpack.c.bf16 %v5299_v50, %v5310_v39 }
  0xbf   : > { %4144 = vmatmul.mubr.bf16.vlgmr.msra.gmra.mrb[0].mxu0 %v4798_v14  ;;  %4199 = vmatpush3.bf16.msra.mxu1 %v4441_v32  ;;  %v4444_v14 = vld [vmem:[%s5694_s3 + $0x218] sm:$0xff]  }
  0xc0   : > { %4160 = vmatpush3.bf16.msra.mxu0 %v4441_v32  ;;  %4192 = vmatprep.subr.bf16.mxu1 %v4442_v0 }
  0xc1   : > { %4161 = vmatprep.subr.bf16.mxu0 %v4442_v0  ;;  %4019 = vmatprep.mubr.msk.bf16.mxu1 %vm5165_vm3, %v4994_v38  ;;  %v5779_v38 = vld [vmem:[#allocation3_spill] sm:$0xff] }
  0xc2   : > { %4147 = vmatprep.mubr.bf16.mxu0 %v4841_v29  ;;  %v4446_v29 = vld [vmem:[%s5694_s3 + $0x228] sm:$0xff]  }
  0xc3   : > { %4200 = vmatpush3.bf16.msra.mxu1 %v4442_v0 }
  0xc4   : > { %4162 = vmatpush3.bf16.msra.mxu0 %v4442_v0  ;;  %4193 = vmatprep.subr.bf16.mxu1 %v4443_v5 }
  0xc5   : > { %4163 = vmatprep.subr.bf16.mxu0 %v4443_v5 }
  0xc6   : > { %4020 = vmatmul.mubr.msk.bf16.gmra.mrb[4].mxu1 %vm5242_vm9, %v5074_v15 }
  0xc7   : > { %4148 = vmatmul.mubr.bf16.gmra.mrb[4].mxu0 %v4878_v44  ;;  %4201 = vmatpush3.bf16.msra.mxu1 %v4443_v5  ;;  %v4448_v44 = vld [vmem:[%s5694_s3 + $0x238] sm:$0xff]  }
  0xc8   : > { %4164 = vmatpush3.bf16.msra.mxu0 %v4443_v5  ;;  %4194 = vmatprep.subr.bf16.mxu1 %v4444_v14 }
  0xc9   : > { %4165 = vmatprep.subr.bf16.mxu0 %v4444_v14  ;;  %4023 = vmatprep.mubr.msk.bf16.mxu1 %vm5771_vm7, %v5154_v63 }
  0xca   : > { %4151 = vmatprep.mubr.bf16.mxu0 %v4951_v62  ;;  %v4447_v62 = vld [vmem:[%s5694_s3 + $0x230] sm:$0xff]  }
  0xcb   : > { %4202 = vmatpush3.bf16.msra.mxu1 %v4444_v14 }
  0xcc   : > { %4166 = vmatpush3.bf16.msra.mxu0 %v4444_v14  ;;  %4195 = vmatprep.subr.bf16.mxu1 %v4445_v25 }
  0xcd   : > { %4167 = vmatprep.subr.bf16.mxu0 %v4445_v25 }
  0xce   : > { %4024 = vmatmul.mubr.msk.bf16.gmra.mrb[8].mxu1 %vm5773_vm5, %v5199_v16 }
  0xcf   : > { %4152 = vmatmul.mubr.bf16.gmra.mrb[8].mxu0 %v4985_v41  ;;  %4203 = vmatpush3.bf16.msra.mxu1 %v4445_v25 }
  0xd0   : > { %4168 = vmatpush3.bf16.msra.mxu0 %v4445_v25  ;;  %4196 = vmatprep.subr.bf16.mxu1 %v4446_v29 }
  0xd1   : > { %4169 = vmatprep.subr.bf16.mxu0 %v4446_v29  ;;  %4027 = vmatprep.mubr.msk.bf16.mxu1 %vm5778_vm2, %v5201_v52 }
  0xd2   : > { %4155 = vmatprep.mubr.bf16.mxu0 %v5779_v38 }
  0xd3   : > { %4204 = vmatpush3.bf16.msra.mxu1 %v4446_v29 }
  0xd4   : > { %4170 = vmatpush3.bf16.msra.mxu0 %v4446_v29  ;;  %4197 = vmatprep.subr.bf16.mxu1 %v4447_v62 }
  0xd5   : > { %4171 = vmatprep.subr.bf16.mxu0 %v4447_v62 }
  0xd6   : > { %4028 = vmatmul.mubr.msk.bf16.gmra.mrb[12].mxu1 %vm5405_vm11, %v5222_v20 }
  0xd7   : > { %4156 = vmatmul.mubr.bf16.gmra.mrb[12].mxu0 %v5780_v47  ;;  %4205 = vmatpush3.bf16.msra.mxu1 %v4447_v62 }
  0xd8   : > { %4172 = vmatpush3.bf16.msra.mxu0 %v4447_v62  ;;  %4198 = vmatprep.subr.bf16.mxu1 %v4448_v44 }
  0xd9   : > { %4173 = vmatprep.subr.bf16.mxu0 %v4448_v44  ;;  %4175 = vmatprep.mubr.msk.bf16.mxu0 %vm5096_vm10, %v4902_v54  ;;  %vm5782_vm10 = vnez %v5746_v43 }
  0xda   : > { %4183 = vmatprep.mubr.msk.bf16.mxu1 %vm5281_vm12, %v5301_v10 }
  0xdb   : > { %4206 = vmatpush3.bf16.msra.mxu1 %v4448_v44 }
  0xdc   : > { %4174 = vmatpush3.bf16.msra.mxu0 %v4448_v44 }
  0xde   : > { %4184 = vmatmul.mubr.msk.bf16.vlgmr.msra.gmra.mrb[16].mxu1 %vm5772_vm13, %v5304_v6 }
  0xdf   : > { %4176 = vmatmul.mubr.msk.bf16.vlgmr.msra.gmra.mrb[0].mxu0 %vm5137_vm15, %v4992_v46  ;;  %4187 = vmatprep.mubr.msk.bf16.mxu1 %vm5383_vm1, %v3594_v61 }
  0xe0   : > { %4179 = vmatprep.mubr.msk.bf16.mxu0 %vm5781_vm8, %v5044_v22 }
  0xe6   : > { %4188 = vmatmul.mubr.msk.bf16.gmra.mrb[20].mxu1 %vm5416_vm6, %v3597_v19 }
  0xe7   : > { %4180 = vmatmul.mubr.msk.bf16.gmra.mrb[4].mxu0 %vm5782_vm10, %v5090_v37 }
 0x191   : > { %v4017_v54 = vpop.f32.mrb[0].mxu1 }
 0x192   : > { %v1744_v15 = vpop.f32.mrb[1].mxu1 }
 0x193   : > { %v4018_v41 = vpop.f32.mrb[2].mxu1 }
 0x194   : > { %v1747_v46 = vpop.f32.mrb[3].mxu1 }
 0x199   : > { %v4021_v35 = vpop.f32.mrb[4].mxu1 }
 0x19a   : > { %v5631_v52 = vpop.f32.mrb[5].mxu1 }
 0x19b   : > { %v5633_v45 = vpop.f32.mrb[6].mxu1 }
 0x19c   : > { %v5635_v22 = vpop.f32.mrb[7].mxu1 }
 0x1a1   : > { %v4025_v27 = vpop.f32.mrb[8].mxu1 }
 0x1a2   : > { %v4153_v33 = vpop.f32.mrb[8].mxu0  ;;  %v1776_v56 = vpop.f32.mrb[9].mxu1 }
 0x1a3   : > { %v4215_v63 = vadd.f32 %v4153_v33, %v4025_v27  ;;  %v2634_v57 = vpop.f32.mrb[9].mxu0  ;;  %v4026_v16 = vpop.f32.mrb[10].mxu1 }
 0x1a4   : > { %v4217_v26 = vadd.f32 %v2634_v57, %v1776_v56  ;;  %v4154_v20 = vpop.f32.mrb[10].mxu0  ;;  %v1779_v37 = vpop.f32.mrb[11].mxu1 }
 0x1a5   : > { %v4219_v21 = vadd.f32 %v4154_v20, %v4026_v16  ;;  %v2637_v43 = vpop.f32.mrb[11].mxu0 }
 0x1a6   : > { %v4221_v31 = vadd.f32 %v2637_v43, %v1779_v37 }
 0x1a9   : > { %v4029_v8 = vpop.f32.mrb[12].mxu1 }
 0x1aa   : > { %v4157_v50 = vpop.f32.mrb[12].mxu0  ;;  %v1792_v10 = vpop.f32.mrb[13].mxu1 }
 0x1ab   : > { %v4223_v6 = vadd.f32 %v4157_v50, %v4029_v8  ;;  %v2650_v39 = vpop.f32.mrb[13].mxu0  ;;  %v4030_v9 = vpop.f32.mrb[14].mxu1 }
 0x1ac   : > { %v4225_v59 = vadd.f32 %v2650_v39, %v1792_v10  ;;  %v4158_v3 = vpop.f32.mrb[14].mxu0  ;;  %v1795_v28 = vpop.f32.mrb[15].mxu1 }
 0x1ad   : > { %v4227_v61 = vadd.f32 %v4158_v3, %v4030_v9  ;;  %v2653_v7 = vpop.f32.mrb[15].mxu0 }
 0x1ae   : > { %v4229_v12 = vadd.f32 %v2653_v7, %v1795_v28 }
 0x1b1   : > { %v4185_v19 = vpop.f32.mrb[16].mxu1 }
 0x1b2   : > { %v4177_v36 = vpop.f32.mrb[0].mxu0  ;;  %v5637_v13 = vadd.f32 %v4215_v63, %v4185_v19  ;;  %v2868_v58 = vpop.f32.mrb[17].mxu1 }
 0x1b3   : > { %v4207_v24 = vadd.f32 %v4177_v36, %v4017_v54  ;;  %v2836_v49 = vpop.f32.mrb[1].mxu0  ;;  %v5639_v55 = vadd.f32 %v4217_v26, %v2868_v58  ;;  %v4186_v1 = vpop.f32.mrb[18].mxu1 }
 0x1b4   : > { %v4208_v11 = vadd.f32 %v2836_v49, %v1744_v15  ;;  %v4178_v18 = vpop.f32.mrb[2].mxu0  ;;  %v5641_v48 = vadd.f32 %v4219_v21, %v4186_v1  ;;  %v2871_v30 = vpop.f32.mrb[19].mxu1 }
 0x1b5   : > { %v4209_v51 = vadd.f32 %v4178_v18, %v4018_v41  ;;  %v2839_v53 = vpop.f32.mrb[3].mxu0  ;;  %v4222_v17 = vadd.f32 %v4221_v31, %v2871_v30  ;;  %v3019_v5 = vmul.f32 %v4207_v24, %v4207_v24 }
 0x1b6   : > { %v3725_v34 = vpack.c.bf16 %v5641_v48, %v5637_v13  ;;  %v4210_v42 = vadd.f32 %v2839_v53, %v1747_v46  ;;  %v3017_v60 = vmul.f32 %v4208_v11, %v4208_v11 }
 0x1b7   : > { %v3705_v23 = vpack.c.bf16 %v4209_v51, %v4207_v24  ;;  %v3720_v40 = vpack.c.bf16 %v4222_v17, %v5639_v55  ;;  %v3020_v41 = vmul.f32 %v4209_v51, %v4209_v51  ;;  %v3026_v36 = vmul.f32 %v4222_v17, %v4222_v17 }
 0x1b8   : > { %3756 = vst [vmem:[%s4569_s15 + $0x28] sm:$0xff] %v3725_v34   ;;  %v3700_v4 = vpack.c.bf16 %v4210_v42, %v4208_v11  ;;  %v2995_v2 = vadd.f32 %v4210_v42, %v4208_v11  ;;  %v3018_v32 = vmul.f32 %v4210_v42, %v4210_v42  ;;  %v3028_v11 = vmul.f32 %v5641_v48, %v5641_v48 }
 0x1b9   : > { %3752 = vst [vmem:[%s4569_s15 + $0x8] sm:$0xff] %v3705_v23   ;;  %3755 = vst [vmem:[%s4569_s15 + $0x20] sm:$0xff] %v3720_v40   ;;  %v4189_v0 = vpop.f32.mrb[20].mxu1 }
 0x1ba   : > { %3701 = vst [vmem:[%s4569_s15] sm:$0xff] %v3700_v4   ;;  %v2996_v14 = vadd.f32 %v4207_v24, %v2995_v2  ;;  %v3033_v25 = vadd.f32 %v3018_v32, %v3017_v60  ;;  %v4181_v29 = vpop.f32.mrb[4].mxu0  ;;  %v4224_v62 = vadd.f32 %v4223_v6, %v4189_v0  ;;  %v2884_v38 = vpop.f32.mrb[21].mxu1 }
 0x1bb   : > { %v4211_v44 = vadd.f32 %v4181_v29, %v4021_v35  ;;  %v2852_v47 = vpop.f32.mrb[5].mxu0  ;;  %v4226_v54 = vadd.f32 %v4225_v59, %v2884_v38  ;;  %v4190_v15 = vpop.f32.mrb[22].mxu1 }
 0x1bc   : > { %v3034_v46 = vadd.f32 %v3033_v25, %v3019_v5  ;;  %v4212_v27 = vadd.f32 %v2852_v47, %v5631_v52  ;;  %v2997_v33 = vadd.f32 %v4209_v51, %v2996_v14  ;;  %v4182_v56 = vpop.f32.mrb[6].mxu0  ;;  %v2887_v63 = vpop.f32.mrb[23].mxu1  ;;  %v4228_v16 = vadd.f32 %v4227_v61, %v4190_v15 }
 0x1bd   : > { %v4213_v57 = vadd.f32 %v4182_v56, %v5633_v45  ;;  %v2855_v26 = vpop.f32.mrb[7].mxu0  ;;  %v4230_v6 = vadd.f32 %v4229_v12, %v2887_v63  ;;  %v3023_v39 = vmul.f32 %v4211_v44, %v4211_v44  ;;  %v3027_v12 = vmul.f32 %v5637_v13, %v5637_v13 }
 0x1be   : > { %v2998_v20 = vadd.f32 %v4212_v27, %v2997_v33  ;;  %v3021_v37 = vmul.f32 %v4212_v27, %v4212_v27  ;;  %v3035_v35 = vadd.f32 %v3034_v46, %v3020_v41  ;;  %v4214_v21 = vadd.f32 %v2855_v26, %v5635_v22 }
 0x1bf   : > { %v3715_v43 = vpack.c.bf16 %v4213_v57, %v4211_v44  ;;  %v3735_v31 = vpack.c.bf16 %v4228_v16, %v4224_v62  ;;  %v3730_v59 = vpack.c.bf16 %v4230_v6, %v4226_v54  ;;  %v3024_v3 = vmul.f32 %v4213_v57, %v4213_v57 }
 0x1c0   : > { %v3036_v8 = vadd.f32 %v3035_v35, %v3021_v37  ;;  %v3710_v52 = vpack.c.bf16 %v4214_v21, %v4212_v27  ;;  %v2999_v50 = vadd.f32 %v4214_v21, %v2998_v20  ;;  %v3022_v10 = vmul.f32 %v4214_v21, %v4214_v21 }
 0x1c1   : > { %3754 = vst [vmem:[%s4569_s15 + $0x18] sm:$0xff] %v3715_v43   ;;  %3758 = vst [vmem:[%s4569_s15 + $0x38] sm:$0xff] %v3735_v31   ;;  %v3025_v22 = vmul.f32 %v5639_v55, %v5639_v55  ;;  %v3029_v51 = vmul.f32 %v4226_v54, %v4226_v54  ;;  %v3030_v42 = vmul.f32 %v4230_v6, %v4230_v6 }
 0x1c2   : > { %3753 = vst [vmem:[%s4569_s15 + $0x10] sm:$0xff] %v3710_v52   ;;  %v3000_v45 = vadd.f32 %v4211_v44, %v2999_v50  ;;  %v3037_v9 = vadd.f32 %v3036_v8, %v3022_v10  ;;  %3757 = vst [vmem:[%s4569_s15 + $0x30] sm:$0xff] %v3730_v59   ;;  %v3031_v40 = vmul.f32 %v4224_v62, %v4224_v62 }
 0x1c3   : > { %v3032_v4 = vmul.f32 %v4228_v16, %v4228_v16 }
 0x1c4   : > { %v3001_v28 = vadd.f32 %v4213_v57, %v3000_v45  ;;  %v3038_v61 = vadd.f32 %v3037_v9, %v3023_v39 }
 0x1c6   : > { %v3002_v7 = vadd.f32 %v5639_v55, %v3001_v28  ;;  %v3039_v19 = vadd.f32 %v3038_v61, %v3024_v3 }
 0x1c8   : > { %v3040_v58 = vadd.f32 %v3039_v19, %v3025_v22  ;;  %v3003_v24 = vadd.f32 %v4222_v17, %v3002_v7 }
 0x1ca   : > { %v3004_v49 = vadd.f32 %v5637_v13, %v3003_v24  ;;  %v3041_v1 = vadd.f32 %v3040_v58, %v3026_v36 }
 0x1cc   : > { %v3005_v18 = vadd.f32 %v5641_v48, %v3004_v49  ;;  %v3042_v30 = vadd.f32 %v3041_v1, %v3027_v12 }
 0x1ce   : > { %v3006_v53 = vadd.f32 %v4226_v54, %v3005_v18  ;;  %v3043_v34 = vadd.f32 %v3042_v30, %v3028_v11 }
 0x1d0   : > { %v3007_v55 = vadd.f32 %v4230_v6, %v3006_v53  ;;  %v3044_v23 = vadd.f32 %v3043_v34, %v3029_v51 }
 0x1d2   : > { %v3008_v17 = vadd.f32 %v4224_v62, %v3007_v55  ;;  %v3045_v60 = vadd.f32 %v3044_v23, %v3030_v42 }
 0x1d4   : > { %v3009_v2 = vadd.f32 %v4228_v16, %v3008_v17  ;;  %v3046_v13 = vadd.f32 %v3045_v60, %v3031_v40 }
 0x1d6   : > { %v3010_v32 = vrot.slane %v3009_v2, 4  ;;  %v3047_v0 = vadd.f32 %v3046_v13, %v3032_v4 }
 0x1d8   : > { %v3011_v5 = vadd.f32 %v3010_v32, %v3009_v2  ;;  %v3048_v14 = vrot.slane %v3047_v0, 4 }
 0x1da   : > { %v3012_v48 = vrot.slane %v3011_v5, 2  ;;  %v3049_v25 = vadd.f32 %v3048_v14, %v3047_v0 }
 0x1dc   : > { %v3013_v29 = vadd.f32 %v3012_v48, %v3011_v5  ;;  %v3050_v38 = vrot.slane %v3049_v25, 2 }
 0x1de   : > { %v3014_v44 = vrot.slane %v3013_v29, 1  ;;  %v3051_v47 = vadd.f32 %v3050_v38, %v3049_v25 }
 0x1e0   : > { %v3015_v54 = vadd.f32 %v3014_v44, %v3013_v29  ;;  %v3052_v15 = vrot.slane %v3051_v47, 1 }
 0x1e2   : > { %3016 = vst [vmem:[%s304_s18] sm:$0x1] %v3015_v54  ;;  %v3053_v62 = vadd.f32 %v3052_v15, %v3051_v47 }
 0x1e4   : > { %3054 = vst [vmem:[%s311_s22] sm:$0x1] %v3053_v62 }
 0x1e5 PF: > { %s17_s25 = sadd.s32 1, %s4487_s25   ;;  %s5783_s21 = smov %s4479_s23 }
 0x1e6   : > { %p14_p9 = scmp.ge.s32.totalorder %s17_s25, 6   ;;  %s5784_s22 = smov %s4483_s24 }
 0x1e7   : > { %s5785_s23 = smov %s5788_s26  ;;  %s5786_s24 = smov %s5792_s27 }
 0x1e8   :  { %16 = sbr.rel (!%p14_p9) target bundleno = 3 (0x3), region = 105 }

</bundles_post_ra>
